<compile_context>
chip_gen: v7x
topology: tpu7x:2x2x1
jax: 0.10.0
libtpu: 0.0.40
codegen_flags: <defaults>
</compile_context>

<pallas_src>
import math

import numpy as np
import jax
import jax.numpy as jnp
from jax import lax
from jax.experimental import pallas as pl
from jax.experimental.pallas import tpu as pltpu


def _make_ffm_kernel(num_fields, field_dim, vocab, n_items, num_bags, de_pad,
                     i_idx, j_idx):
    F = int(num_fields)
    d = int(field_dim)
    V = int(vocab)
    N = int(n_items)
    M = int(num_bags)
    D = F * d                      # vector embedding width
    De = int(de_pad)               # fused [vector | bias | zero-pad] rows
    P = len(i_idx)
    FF = F * F

    def kernel(tab_ref, idx_ref, w_ref, aux_ref, bias_ref, out_ref):
        tab = tab_ref[...]                       # (De, V)  f32, VMEM-resident
        idx = idx_ref[...]                       # (N, TB)  i32
        w = w_ref[...]                           # (N, TB)  f32
        aux = aux_ref[...]                       # (2M, TB) i32: offsets | fields
        TB = idx.shape[1]

        offs = [aux[m:m + 1, :] for m in range(M)]          # end-of-bag offsets
        flds = [aux[M + m:M + m + 1, :] for m in range(M)]  # field id per bag

        iota_v = lax.broadcasted_iota(jnp.int32, (V, TB), 0)

        # ---- in-kernel gather + weighted bag sums -------------------------
        # e_n[e, b] = table[indices[n, b], e]  via  table^T (De,V) @ onehot (V,TB)
        # bag m of sample b covers items n with offs[m-1, b] < n <= offs[m, b].
        svec = [jnp.zeros((De, TB), jnp.float32) for _ in range(M)]
        for n in range(N):
            onehot = (iota_v == idx[n:n + 1, :]).astype(jnp.float32)   # (V, TB)
            e_n = jnp.dot(tab, onehot,
                          preferred_element_type=jnp.float32)          # (De, TB)
            w_n = w[n:n + 1, :]                                        # (1, TB)
            for m in range(M):
                if m == 0:
                    in_bag = offs[0] >= n
                else:
                    in_bag = jnp.logical_and(offs[m - 1] < n, offs[m] >= n)
                coeff = jnp.where(in_bag, w_n, 0.0)                    # (1, TB)
                svec[m] = svec[m] + e_n * coeff

        # ---- pair-count matrix: count[a*F + c, b] = #{p: fields[i_p]=a, fields[j_p]=c}
        q_iota = lax.broadcasted_iota(jnp.int32, (FF, 1), 0)
        count = jnp.zeros((FF, TB), jnp.float32)
        for p in range(P):
            ip = int(i_idx[p])
            jp = int(j_idx[p])
            code = flds[ip] * F + flds[jp]                              # (1, TB)
            count = count + (q_iota == code).astype(jnp.float32)

        # ---- pairwise FFM interactions (symmetric in (a,c): upper triangle only)
        pacc = jnp.zeros((d, TB), jnp.float32)
        for a in range(F):
            for c in range(a, F):
                va = svec[a][c * d:(c + 1) * d, :]      # V[b, a, c, :]
                vc = svec[c][a * d:(a + 1) * d, :]      # V[b, c, a, :]
                if a == c:
                    wrow = count[a * F + a:a * F + a + 1, :]
                else:
                    wrow = (count[a * F + c:a * F + c + 1, :]
                            + count[c * F + a:c * F + a + 1, :])
                pacc = pacc + wrow * (va * vc)

        pair = jnp.sum(pacc, axis=0, keepdims=True)                     # (1, TB)
        linear = svec[0][D:D + 1, :]                                    # bias row
        for m in range(1, M):
            linear = linear + svec[m][D:D + 1, :]
        out_ref[...] = pair + linear + bias_ref[0, 0]

    return kernel


def weighted_ffm_forward(indices, weights, offsets, fields,
                         vec_table, bias_table, bias_scalar,
                         num_fields, field_dim, block_b=512):
    B, N = indices.shape
    M = offsets.shape[1]
    F, d = int(num_fields), int(field_dim)
    D = F * d
    V = vec_table.shape[0]
    assert M == F, "number of bags per sample must equal num_fields"
    assert block_b % 128 == 0, "block_b must be a multiple of 128"

    # fused f32 [vector | bias] table, zero-padded to a sublane multiple, transposed
    fused = jnp.concatenate([vec_table, bias_table], axis=1).astype(jnp.float32)  # (V, D+1)
    de_pad = ((D + 1 + 7) // 8) * 8
    fused = jnp.pad(fused, ((0, 0), (0, de_pad - (D + 1))))
    table_t = fused.T                                                   # (de_pad, V)

    # clamp fields into [0, F) (reference would index out of bounds otherwise)
    fields = jnp.clip(fields.astype(jnp.int32), 0, F - 1)

    # lane block: as large as possible, but keep >= 2 grid steps so the
    # "parallel" grid dim can split batch blocks across v7x's two TensorCores.
    TB = block_b
    while TB > 128 and pl.cdiv(B, TB) < 2:
        TB //= 2
    assert TB % 128 == 0
    Bp = pl.cdiv(B, TB) * TB

    # batch-on-lanes layout for every streamed input
    idx_t = indices.astype(jnp.int32).T                                 # (N, B)
    w_t = weights.astype(jnp.float32).T                                 # (N, B)
    aux_t = jnp.concatenate([offsets.astype(jnp.int32), fields], axis=1).T  # (2M, B)
    if Bp != B:
        pad = Bp - B
        idx_t = jnp.pad(idx_t, ((0, 0), (0, pad)))
        w_t = jnp.pad(w_t, ((0, 0), (0, pad)))
        # offsets = -1 -> empty bags; fields = -1 -> no pair-count contributions
        aux_t = jnp.pad(aux_t, ((0, 0), (0, pad)), constant_values=-1)
    bias_arr = jnp.reshape(jnp.asarray(bias_scalar, jnp.float32), (1, 1))

    i_idx, j_idx = np.tril_indices(F, -1)                               # strictly-lower pairs
    P = len(i_idx)
    kernel = _make_ffm_kernel(F, d, V, N, M, de_pad, i_idx, j_idx)

    grid = (Bp // TB,)
    cost = pl.CostEstimate(
        flops=int(Bp) * (2 * N * de_pad * V + 4 * N * M * de_pad
                         + 6 * P * d + 4 * F * F * d),
        transcendentals=0,
        bytes_accessed=int(table_t.size * 4 + idx_t.size * 4 + w_t.size * 4
                           + aux_t.size * 4 + Bp * 4),
    )

    out = pl.pallas_call(
        kernel,
        out_shape=jax.ShapeDtypeStruct((1, Bp), jnp.float32),           # lane-dense output
        grid=grid,
        in_specs=[
            pl.BlockSpec((de_pad, V), lambda b: (0, 0)),   # table^T: constant block, fetched once
            pl.BlockSpec((N, TB), lambda b: (0, b)),       # indices^T
            pl.BlockSpec((N, TB), lambda b: (0, b)),       # weights^T
            pl.BlockSpec((2 * M, TB), lambda b: (0, b)),   # offsets|fields ^T
            pl.BlockSpec(memory_space=pltpu.SMEM),         # global bias scalar
        ],
        out_specs=pl.BlockSpec((1, TB), lambda b: (0, b)),
        compiler_params=pltpu.CompilerParams(
            dimension_semantics=("parallel",),             # batch blocks -> megacore on v7x
            vmem_limit_bytes=32 * 1024 * 1024,             # tiny per-block footprint, safe on v7x
        ),
        cost_estimate=cost,
    )(table_t, idx_t, w_t, aux_t, bias_arr)
    # NOTE: padded tail lanes of `out` hold bias_scalar (not 0); slice them off.
    return out[0, :B]


def weighted_ffm_reference(indices, weights, offsets, fields,
                           vec_table, bias_table, bias_scalar,
                           num_fields, field_dim):
    """Pure-JAX reference mirroring the PyTorch forward semantics."""
    B, N = indices.shape
    M = offsets.shape[1]
    F, d = num_fields, field_dim

    def bag(table):
        emb = table[indices].astype(jnp.float32)                        # (B, N, D)
        we = emb * weights[:, :, None]
        ps = jnp.cumsum(jnp.pad(we, ((0, 0), (1, 0), (0, 0))), axis=1)  # (B, N+1, D)
        po = jnp.pad(offsets, ((0, 0), (1, 0)), constant_values=-1) + 1  # (B, M+1)
        D = emb.shape[2]
        i = jnp.arange(B)[:, None, None]
        k = jnp.arange(D)[None, None, :]
        hi = ps[i, po[:, 1:][:, :, None], k]
        lo = ps[i, po[:, :-1][:, :, None], k]
        return hi - lo                                                  # (B, M, D)

    vectors = bag(vec_table).reshape(B, F, F, d)
    biases = bag(bias_table)[..., 0]                                    # (B, M)
    i_idx, j_idx = np.tril_indices(F, -1)
    fi = fields[:, i_idx]
    fj = fields[:, j_idx]
    batches = jnp.arange(B)[:, None]
    Vi = vectors[batches, fi, fj]
    Vj = vectors[batches, fj, fi]
    pairwise = jnp.sum(Vi * Vj, axis=(-1, -2))
    linear = jnp.sum(biases, axis=1)
    return pairwise + linear + bias_scalar


if __name__ == "__main__":
    num_features = 64      # embedding table rows (V)
    num_fields = 4         # -> M = 4 bags per sample, P = 6 field pairs
    field_dim = 8          # per-field embedding dim (vector emb dim = 32)
    M = num_fields

    key = jax.random.PRNGKey(0)
    k1, k2, k3, k4, k5, k6, k7 = jax.random.split(key, 7)

    vec_init_scale = 1.0 / math.sqrt(field_dim)
    vec_table = jax.random.uniform(k1, (num_features, num_fields * field_dim),
                                   jnp.float32, -vec_init_scale, vec_init_scale)
    # non-zero biases so the linear term is exercised (module zero-inits them)
    bias_table = jax.random.uniform(k5, (num_features, 1), jnp.float32, -0.1, 0.1)
    bias_scalar = jnp.float32(0.25)

    def make_inputs(rng, B, N):
        ka, kb, kc, kd = jax.random.split(rng, 4)
        indices = jax.random.randint(ka, (B, N), 0, num_features)
        weights = jax.random.uniform(kb, (B, N), jnp.float32)
        offsets = jnp.sort(jax.random.randint(kc, (B, M), 0, N, dtype=jnp.int32), axis=1)
        fields = jax.random.randint(kd, (B, M), 0, num_fields, dtype=jnp.int32)
        return indices, weights, offsets, fields

    # main case: B multiple of the lane block
    B, N = 512, 8
    indices, weights, offsets, fields = make_inputs(k2, B, N)
    out = weighted_ffm_forward(indices, weights, offsets, fields,
                               vec_table, bias_table, bias_scalar,
                               num_fields, field_dim, block_b=512)
    out = jax.block_until_ready(out)
    ref = weighted_ffm_reference(indices, weights, offsets, fields,
                                 vec_table, bias_table, bias_scalar,
                                 num_fields, field_dim)
    np.testing.assert_allclose(np.asarray(out), np.asarray(ref), rtol=2e-2, atol=2e-2)

    # ragged-tail case: exercises batch padding (B not a multiple of the block)
    B2 = 200
    indices2, weights2, offsets2, fields2 = make_inputs(k7, B2, N)
    out2 = weighted_ffm_forward(indices2, weights2, offsets2, fields2,
                                vec_table, bias_table, bias_scalar,
                                num_fields, field_dim, block_b=512)
    out2 = jax.block_until_ready(out2)
    ref2 = weighted_ffm_reference(indices2, weights2, offsets2, fields2,
                                  vec_table, bias_table, bias_scalar,
                                  num_fields, field_dim)
    np.testing.assert_allclose(np.asarray(out2), np.asarray(ref2), rtol=2e-2, atol=2e-2)

    print("KERNEL_OK")
</pallas_src>

<mosaic_0001>
module attributes {stable_mosaic.version = 11 : i64} {
  func.func @kernel(%arg0: i32, %arg1: memref<40x64xf32, #tpu.memory_space<vmem>>, %arg2: memref<8x256xi32, #tpu.memory_space<vmem>>, %arg3: memref<8x256xf32, #tpu.memory_space<vmem>>, %arg4: memref<8x256xi32, #tpu.memory_space<vmem>>, %arg5: memref<1x1xf32, #tpu.memory_space<smem>>, %arg6: memref<1x256xf32, #tpu.memory_space<vmem>>) attributes {dimension_semantics = [#tpu.dimension_semantics<parallel>], iteration_bounds = array<i64: 2>, scalar_prefetch = 0 : i64, scratch_operands = 0 : i64, tpu.core_type = #tpu.core_type<tc>, window_params = [{pipeline_mode = #tpu.pipeline_mode<synchronous>, transform_indices = @transform_0, window_bounds = array<i64: 40, 64>}, {transform_indices = @transform_1, window_bounds = array<i64: 8, 256>}, {transform_indices = @transform_2, window_bounds = array<i64: 8, 256>}, {transform_indices = @transform_3, window_bounds = array<i64: 8, 256>}, {transform_indices = @transform_4, window_bounds = array<i64: 1, 1>}, {transform_indices = @transform_5, window_bounds = array<i64: 1, 256>}]} {
    %c0 = arith.constant 0 : index
    %c0_0 = arith.constant 0 : index
    %0 = vector.load %arg1[%c0, %c0_0] : memref<40x64xf32, #tpu.memory_space<vmem>>, vector<40x64xf32>
    %c0_1 = arith.constant 0 : index
    %c0_2 = arith.constant 0 : index
    %1 = vector.load %arg2[%c0_1, %c0_2] : memref<8x256xi32, #tpu.memory_space<vmem>>, vector<8x256xi32>
    %c0_3 = arith.constant 0 : index
    %c0_4 = arith.constant 0 : index
    %2 = vector.load %arg3[%c0_3, %c0_4] : memref<8x256xf32, #tpu.memory_space<vmem>>, vector<8x256xf32>
    %c0_5 = arith.constant 0 : index
    %c0_6 = arith.constant 0 : index
    %3 = vector.load %arg4[%c0_5, %c0_6] : memref<8x256xi32, #tpu.memory_space<vmem>>, vector<8x256xi32>
    %4 = vector.extract_strided_slice %3 {offsets = [0, 0], sizes = [1, 256], strides = [1, 1]} : vector<8x256xi32> to vector<1x256xi32>
    %5 = vector.extract_strided_slice %3 {offsets = [1, 0], sizes = [1, 256], strides = [1, 1]} : vector<8x256xi32> to vector<1x256xi32>
    %6 = vector.extract_strided_slice %3 {offsets = [2, 0], sizes = [1, 256], strides = [1, 1]} : vector<8x256xi32> to vector<1x256xi32>
    %7 = vector.extract_strided_slice %3 {offsets = [3, 0], sizes = [1, 256], strides = [1, 1]} : vector<8x256xi32> to vector<1x256xi32>
    %8 = vector.extract_strided_slice %3 {offsets = [4, 0], sizes = [1, 256], strides = [1, 1]} : vector<8x256xi32> to vector<1x256xi32>
    %9 = vector.extract_strided_slice %3 {offsets = [5, 0], sizes = [1, 256], strides = [1, 1]} : vector<8x256xi32> to vector<1x256xi32>
    %10 = vector.extract_strided_slice %3 {offsets = [6, 0], sizes = [1, 256], strides = [1, 1]} : vector<8x256xi32> to vector<1x256xi32>
    %11 = vector.extract_strided_slice %3 {offsets = [7, 0], sizes = [1, 256], strides = [1, 1]} : vector<8x256xi32> to vector<1x256xi32>
    %12 = tpu.iota {dimensions = array<i32: 0>} : vector<64x256xi32>
    %cst = arith.constant 0.000000e+00 : f32
    %13 = vector.broadcast %cst : f32 to vector<40x256xf32>
    %cst_7 = arith.constant 0.000000e+00 : f32
    %14 = vector.broadcast %cst_7 : f32 to vector<40x256xf32>
    %cst_8 = arith.constant 0.000000e+00 : f32
    %15 = vector.broadcast %cst_8 : f32 to vector<40x256xf32>
    %cst_9 = arith.constant 0.000000e+00 : f32
    %16 = vector.broadcast %cst_9 : f32 to vector<40x256xf32>
    %17 = vector.extract_strided_slice %1 {offsets = [0, 0], sizes = [1, 256], strides = [1, 1]} : vector<8x256xi32> to vector<1x256xi32>
    %18 = vector.broadcast %17 : vector<1x256xi32> to vector<64x256xi32>
    %19 = arith.cmpi eq, %12, %18 : vector<64x256xi32>
    %20 = arith.extui %19 : vector<64x256xi1> to vector<64x256xi32>
    %21 = arith.sitofp %20 : vector<64x256xi32> to vector<64x256xf32>
    %cst_10 = arith.constant dense<0.000000e+00> : vector<40x256xf32>
    %22 = tpu.matmul %0, %21, %cst_10 {dimension_numbers = #tpu.dot_dimension_numbers<[1], [0], [0], [1], [0, 0, 1, 1], [], []>} : vector<40x64xf32>, vector<64x256xf32>, vector<40x256xf32> -> vector<40x256xf32>
    %23 = vector.extract_strided_slice %2 {offsets = [0, 0], sizes = [1, 256], strides = [1, 1]} : vector<8x256xf32> to vector<1x256xf32>
    %c0_i32 = arith.constant 0 : i32
    %24 = vector.broadcast %c0_i32 : i32 to vector<1x256xi32>
    %25 = arith.cmpi sge, %4, %24 : vector<1x256xi32>
    %cst_11 = arith.constant 0.000000e+00 : f32
    %26 = vector.broadcast %cst_11 : f32 to vector<1x256xf32>
    %27 = arith.select %25, %23, %26 : vector<1x256xi1>, vector<1x256xf32>
    %28 = vector.broadcast %27 : vector<1x256xf32> to vector<40x256xf32>
    %29 = arith.mulf %22, %28 : vector<40x256xf32>
    %30 = arith.addf %13, %29 : vector<40x256xf32>
    %c0_i32_12 = arith.constant 0 : i32
    %31 = vector.broadcast %c0_i32_12 : i32 to vector<1x256xi32>
    %32 = arith.cmpi slt, %4, %31 : vector<1x256xi32>
    %c0_i32_13 = arith.constant 0 : i32
    %33 = vector.broadcast %c0_i32_13 : i32 to vector<1x256xi32>
    %34 = arith.cmpi sge, %5, %33 : vector<1x256xi32>
    %35 = arith.andi %32, %34 : vector<1x256xi1>
    %cst_14 = arith.constant 0.000000e+00 : f32
    %36 = vector.broadcast %cst_14 : f32 to vector<1x256xf32>
    %37 = arith.select %35, %23, %36 : vector<1x256xi1>, vector<1x256xf32>
    %38 = vector.broadcast %37 : vector<1x256xf32> to vector<40x256xf32>
    %39 = arith.mulf %22, %38 : vector<40x256xf32>
    %40 = arith.addf %14, %39 : vector<40x256xf32>
    %c0_i32_15 = arith.constant 0 : i32
    %41 = vector.broadcast %c0_i32_15 : i32 to vector<1x256xi32>
    %42 = arith.cmpi slt, %5, %41 : vector<1x256xi32>
    %c0_i32_16 = arith.constant 0 : i32
    %43 = vector.broadcast %c0_i32_16 : i32 to vector<1x256xi32>
    %44 = arith.cmpi sge, %6, %43 : vector<1x256xi32>
    %45 = arith.andi %42, %44 : vector<1x256xi1>
    %cst_17 = arith.constant 0.000000e+00 : f32
    %46 = vector.broadcast %cst_17 : f32 to vector<1x256xf32>
    %47 = arith.select %45, %23, %46 : vector<1x256xi1>, vector<1x256xf32>
    %48 = vector.broadcast %47 : vector<1x256xf32> to vector<40x256xf32>
    %49 = arith.mulf %22, %48 : vector<40x256xf32>
    %50 = arith.addf %15, %49 : vector<40x256xf32>
    %c0_i32_18 = arith.constant 0 : i32
    %51 = vector.broadcast %c0_i32_18 : i32 to vector<1x256xi32>
    %52 = arith.cmpi slt, %6, %51 : vector<1x256xi32>
    %c0_i32_19 = arith.constant 0 : i32
    %53 = vector.broadcast %c0_i32_19 : i32 to vector<1x256xi32>
    %54 = arith.cmpi sge, %7, %53 : vector<1x256xi32>
    %55 = arith.andi %52, %54 : vector<1x256xi1>
    %cst_20 = arith.constant 0.000000e+00 : f32
    %56 = vector.broadcast %cst_20 : f32 to vector<1x256xf32>
    %57 = arith.select %55, %23, %56 : vector<1x256xi1>, vector<1x256xf32>
    %58 = vector.broadcast %57 : vector<1x256xf32> to vector<40x256xf32>
    %59 = arith.mulf %22, %58 : vector<40x256xf32>
    %60 = arith.addf %16, %59 : vector<40x256xf32>
    %61 = vector.extract_strided_slice %1 {offsets = [1, 0], sizes = [1, 256], strides = [1, 1]} : vector<8x256xi32> to vector<1x256xi32>
    %62 = vector.broadcast %61 : vector<1x256xi32> to vector<64x256xi32>
    %63 = arith.cmpi eq, %12, %62 : vector<64x256xi32>
    %64 = arith.extui %63 : vector<64x256xi1> to vector<64x256xi32>
    %65 = arith.sitofp %64 : vector<64x256xi32> to vector<64x256xf32>
    %cst_21 = arith.constant dense<0.000000e+00> : vector<40x256xf32>
    %66 = tpu.matmul %0, %65, %cst_21 {dimension_numbers = #tpu.dot_dimension_numbers<[1], [0], [0], [1], [0, 0, 1, 1], [], []>} : vector<40x64xf32>, vector<64x256xf32>, vector<40x256xf32> -> vector<40x256xf32>
    %67 = vector.extract_strided_slice %2 {offsets = [1, 0], sizes = [1, 256], strides = [1, 1]} : vector<8x256xf32> to vector<1x256xf32>
    %c1_i32 = arith.constant 1 : i32
    %68 = vector.broadcast %c1_i32 : i32 to vector<1x256xi32>
    %69 = arith.cmpi sge, %4, %68 : vector<1x256xi32>
    %cst_22 = arith.constant 0.000000e+00 : f32
    %70 = vector.broadcast %cst_22 : f32 to vector<1x256xf32>
    %71 = arith.select %69, %67, %70 : vector<1x256xi1>, vector<1x256xf32>
    %72 = vector.broadcast %71 : vector<1x256xf32> to vector<40x256xf32>
    %73 = arith.mulf %66, %72 : vector<40x256xf32>
    %74 = arith.addf %30, %73 : vector<40x256xf32>
    %c1_i32_23 = arith.constant 1 : i32
    %75 = vector.broadcast %c1_i32_23 : i32 to vector<1x256xi32>
    %76 = arith.cmpi slt, %4, %75 : vector<1x256xi32>
    %c1_i32_24 = arith.constant 1 : i32
    %77 = vector.broadcast %c1_i32_24 : i32 to vector<1x256xi32>
    %78 = arith.cmpi sge, %5, %77 : vector<1x256xi32>
    %79 = arith.andi %76, %78 : vector<1x256xi1>
    %cst_25 = arith.constant 0.000000e+00 : f32
    %80 = vector.broadcast %cst_25 : f32 to vector<1x256xf32>
    %81 = arith.select %79, %67, %80 : vector<1x256xi1>, vector<1x256xf32>
    %82 = vector.broadcast %81 : vector<1x256xf32> to vector<40x256xf32>
    %83 = arith.mulf %66, %82 : vector<40x256xf32>
    %84 = arith.addf %40, %83 : vector<40x256xf32>
    %c1_i32_26 = arith.constant 1 : i32
    %85 = vector.broadcast %c1_i32_26 : i32 to vector<1x256xi32>
    %86 = arith.cmpi slt, %5, %85 : vector<1x256xi32>
    %c1_i32_27 = arith.constant 1 : i32
    %87 = vector.broadcast %c1_i32_27 : i32 to vector<1x256xi32>
    %88 = arith.cmpi sge, %6, %87 : vector<1x256xi32>
    %89 = arith.andi %86, %88 : vector<1x256xi1>
    %cst_28 = arith.constant 0.000000e+00 : f32
    %90 = vector.broadcast %cst_28 : f32 to vector<1x256xf32>
    %91 = arith.select %89, %67, %90 : vector<1x256xi1>, vector<1x256xf32>
    %92 = vector.broadcast %91 : vector<1x256xf32> to vector<40x256xf32>
    %93 = arith.mulf %66, %92 : vector<40x256xf32>
    %94 = arith.addf %50, %93 : vector<40x256xf32>
    %c1_i32_29 = arith.constant 1 : i32
    %95 = vector.broadcast %c1_i32_29 : i32 to vector<1x256xi32>
    %96 = arith.cmpi slt, %6, %95 : vector<1x256xi32>
    %c1_i32_30 = arith.constant 1 : i32
    %97 = vector.broadcast %c1_i32_30 : i32 to vector<1x256xi32>
    %98 = arith.cmpi sge, %7, %97 : vector<1x256xi32>
    %99 = arith.andi %96, %98 : vector<1x256xi1>
    %cst_31 = arith.constant 0.000000e+00 : f32
    %100 = vector.broadcast %cst_31 : f32 to vector<1x256xf32>
    %101 = arith.select %99, %67, %100 : vector<1x256xi1>, vector<1x256xf32>
    %102 = vector.broadcast %101 : vector<1x256xf32> to vector<40x256xf32>
    %103 = arith.mulf %66, %102 : vector<40x256xf32>
    %104 = arith.addf %60, %103 : vector<40x256xf32>
    %105 = vector.extract_strided_slice %1 {offsets = [2, 0], sizes = [1, 256], strides = [1, 1]} : vector<8x256xi32> to vector<1x256xi32>
    %106 = vector.broadcast %105 : vector<1x256xi32> to vector<64x256xi32>
    %107 = arith.cmpi eq, %12, %106 : vector<64x256xi32>
    %108 = arith.extui %107 : vector<64x256xi1> to vector<64x256xi32>
    %109 = arith.sitofp %108 : vector<64x256xi32> to vector<64x256xf32>
    %cst_32 = arith.constant dense<0.000000e+00> : vector<40x256xf32>
    %110 = tpu.matmul %0, %109, %cst_32 {dimension_numbers = #tpu.dot_dimension_numbers<[1], [0], [0], [1], [0, 0, 1, 1], [], []>} : vector<40x64xf32>, vector<64x256xf32>, vector<40x256xf32> -> vector<40x256xf32>
    %111 = vector.extract_strided_slice %2 {offsets = [2, 0], sizes = [1, 256], strides = [1, 1]} : vector<8x256xf32> to vector<1x256xf32>
    %c2_i32 = arith.constant 2 : i32
    %112 = vector.broadcast %c2_i32 : i32 to vector<1x256xi32>
    %113 = arith.cmpi sge, %4, %112 : vector<1x256xi32>
    %cst_33 = arith.constant 0.000000e+00 : f32
    %114 = vector.broadcast %cst_33 : f32 to vector<1x256xf32>
    %115 = arith.select %113, %111, %114 : vector<1x256xi1>, vector<1x256xf32>
    %116 = vector.broadcast %115 : vector<1x256xf32> to vector<40x256xf32>
    %117 = arith.mulf %110, %116 : vector<40x256xf32>
    %118 = arith.addf %74, %117 : vector<40x256xf32>
    %c2_i32_34 = arith.constant 2 : i32
    %119 = vector.broadcast %c2_i32_34 : i32 to vector<1x256xi32>
    %120 = arith.cmpi slt, %4, %119 : vector<1x256xi32>
    %c2_i32_35 = arith.constant 2 : i32
    %121 = vector.broadcast %c2_i32_35 : i32 to vector<1x256xi32>
    %122 = arith.cmpi sge, %5, %121 : vector<1x256xi32>
    %123 = arith.andi %120, %122 : vector<1x256xi1>
    %cst_36 = arith.constant 0.000000e+00 : f32
    %124 = vector.broadcast %cst_36 : f32 to vector<1x256xf32>
    %125 = arith.select %123, %111, %124 : vector<1x256xi1>, vector<1x256xf32>
    %126 = vector.broadcast %125 : vector<1x256xf32> to vector<40x256xf32>
    %127 = arith.mulf %110, %126 : vector<40x256xf32>
    %128 = arith.addf %84, %127 : vector<40x256xf32>
    %c2_i32_37 = arith.constant 2 : i32
    %129 = vector.broadcast %c2_i32_37 : i32 to vector<1x256xi32>
    %130 = arith.cmpi slt, %5, %129 : vector<1x256xi32>
    %c2_i32_38 = arith.constant 2 : i32
    %131 = vector.broadcast %c2_i32_38 : i32 to vector<1x256xi32>
    %132 = arith.cmpi sge, %6, %131 : vector<1x256xi32>
    %133 = arith.andi %130, %132 : vector<1x256xi1>
    %cst_39 = arith.constant 0.000000e+00 : f32
    %134 = vector.broadcast %cst_39 : f32 to vector<1x256xf32>
    %135 = arith.select %133, %111, %134 : vector<1x256xi1>, vector<1x256xf32>
    %136 = vector.broadcast %135 : vector<1x256xf32> to vector<40x256xf32>
    %137 = arith.mulf %110, %136 : vector<40x256xf32>
    %138 = arith.addf %94, %137 : vector<40x256xf32>
    %c2_i32_40 = arith.constant 2 : i32
    %139 = vector.broadcast %c2_i32_40 : i32 to vector<1x256xi32>
    %140 = arith.cmpi slt, %6, %139 : vector<1x256xi32>
    %c2_i32_41 = arith.constant 2 : i32
    %141 = vector.broadcast %c2_i32_41 : i32 to vector<1x256xi32>
    %142 = arith.cmpi sge, %7, %141 : vector<1x256xi32>
    %143 = arith.andi %140, %142 : vector<1x256xi1>
    %cst_42 = arith.constant 0.000000e+00 : f32
    %144 = vector.broadcast %cst_42 : f32 to vector<1x256xf32>
    %145 = arith.select %143, %111, %144 : vector<1x256xi1>, vector<1x256xf32>
    %146 = vector.broadcast %145 : vector<1x256xf32> to vector<40x256xf32>
    %147 = arith.mulf %110, %146 : vector<40x256xf32>
    %148 = arith.addf %104, %147 : vector<40x256xf32>
    %149 = vector.extract_strided_slice %1 {offsets = [3, 0], sizes = [1, 256], strides = [1, 1]} : vector<8x256xi32> to vector<1x256xi32>
    %150 = vector.broadcast %149 : vector<1x256xi32> to vector<64x256xi32>
    %151 = arith.cmpi eq, %12, %150 : vector<64x256xi32>
    %152 = arith.extui %151 : vector<64x256xi1> to vector<64x256xi32>
    %153 = arith.sitofp %152 : vector<64x256xi32> to vector<64x256xf32>
    %cst_43 = arith.constant dense<0.000000e+00> : vector<40x256xf32>
    %154 = tpu.matmul %0, %153, %cst_43 {dimension_numbers = #tpu.dot_dimension_numbers<[1], [0], [0], [1], [0, 0, 1, 1], [], []>} : vector<40x64xf32>, vector<64x256xf32>, vector<40x256xf32> -> vector<40x256xf32>
    %155 = vector.extract_strided_slice %2 {offsets = [3, 0], sizes = [1, 256], strides = [1, 1]} : vector<8x256xf32> to vector<1x256xf32>
    %c3_i32 = arith.constant 3 : i32
    %156 = vector.broadcast %c3_i32 : i32 to vector<1x256xi32>
    %157 = arith.cmpi sge, %4, %156 : vector<1x256xi32>
    %cst_44 = arith.constant 0.000000e+00 : f32
    %158 = vector.broadcast %cst_44 : f32 to vector<1x256xf32>
    %159 = arith.select %157, %155, %158 : vector<1x256xi1>, vector<1x256xf32>
    %160 = vector.broadcast %159 : vector<1x256xf32> to vector<40x256xf32>
    %161 = arith.mulf %154, %160 : vector<40x256xf32>
    %162 = arith.addf %118, %161 : vector<40x256xf32>
    %c3_i32_45 = arith.constant 3 : i32
    %163 = vector.broadcast %c3_i32_45 : i32 to vector<1x256xi32>
    %164 = arith.cmpi slt, %4, %163 : vector<1x256xi32>
    %c3_i32_46 = arith.constant 3 : i32
    %165 = vector.broadcast %c3_i32_46 : i32 to vector<1x256xi32>
    %166 = arith.cmpi sge, %5, %165 : vector<1x256xi32>
    %167 = arith.andi %164, %166 : vector<1x256xi1>
    %cst_47 = arith.constant 0.000000e+00 : f32
    %168 = vector.broadcast %cst_47 : f32 to vector<1x256xf32>
    %169 = arith.select %167, %155, %168 : vector<1x256xi1>, vector<1x256xf32>
    %170 = vector.broadcast %169 : vector<1x256xf32> to vector<40x256xf32>
    %171 = arith.mulf %154, %170 : vector<40x256xf32>
    %172 = arith.addf %128, %171 : vector<40x256xf32>
    %c3_i32_48 = arith.constant 3 : i32
    %173 = vector.broadcast %c3_i32_48 : i32 to vector<1x256xi32>
    %174 = arith.cmpi slt, %5, %173 : vector<1x256xi32>
    %c3_i32_49 = arith.constant 3 : i32
    %175 = vector.broadcast %c3_i32_49 : i32 to vector<1x256xi32>
    %176 = arith.cmpi sge, %6, %175 : vector<1x256xi32>
    %177 = arith.andi %174, %176 : vector<1x256xi1>
    %cst_50 = arith.constant 0.000000e+00 : f32
    %178 = vector.broadcast %cst_50 : f32 to vector<1x256xf32>
    %179 = arith.select %177, %155, %178 : vector<1x256xi1>, vector<1x256xf32>
    %180 = vector.broadcast %179 : vector<1x256xf32> to vector<40x256xf32>
    %181 = arith.mulf %154, %180 : vector<40x256xf32>
    %182 = arith.addf %138, %181 : vector<40x256xf32>
    %c3_i32_51 = arith.constant 3 : i32
    %183 = vector.broadcast %c3_i32_51 : i32 to vector<1x256xi32>
    %184 = arith.cmpi slt, %6, %183 : vector<1x256xi32>
    %c3_i32_52 = arith.constant 3 : i32
    %185 = vector.broadcast %c3_i32_52 : i32 to vector<1x256xi32>
    %186 = arith.cmpi sge, %7, %185 : vector<1x256xi32>
    %187 = arith.andi %184, %186 : vector<1x256xi1>
    %cst_53 = arith.constant 0.000000e+00 : f32
    %188 = vector.broadcast %cst_53 : f32 to vector<1x256xf32>
    %189 = arith.select %187, %155, %188 : vector<1x256xi1>, vector<1x256xf32>
    %190 = vector.broadcast %189 : vector<1x256xf32> to vector<40x256xf32>
    %191 = arith.mulf %154, %190 : vector<40x256xf32>
    %192 = arith.addf %148, %191 : vector<40x256xf32>
    %193 = vector.extract_strided_slice %1 {offsets = [4, 0], sizes = [1, 256], strides = [1, 1]} : vector<8x256xi32> to vector<1x256xi32>
    %194 = vector.broadcast %193 : vector<1x256xi32> to vector<64x256xi32>
    %195 = arith.cmpi eq, %12, %194 : vector<64x256xi32>
    %196 = arith.extui %195 : vector<64x256xi1> to vector<64x256xi32>
    %197 = arith.sitofp %196 : vector<64x256xi32> to vector<64x256xf32>
    %cst_54 = arith.constant dense<0.000000e+00> : vector<40x256xf32>
    %198 = tpu.matmul %0, %197, %cst_54 {dimension_numbers = #tpu.dot_dimension_numbers<[1], [0], [0], [1], [0, 0, 1, 1], [], []>} : vector<40x64xf32>, vector<64x256xf32>, vector<40x256xf32> -> vector<40x256xf32>
    %199 = vector.extract_strided_slice %2 {offsets = [4, 0], sizes = [1, 256], strides = [1, 1]} : vector<8x256xf32> to vector<1x256xf32>
    %c4_i32 = arith.constant 4 : i32
    %200 = vector.broadcast %c4_i32 : i32 to vector<1x256xi32>
    %201 = arith.cmpi sge, %4, %200 : vector<1x256xi32>
    %cst_55 = arith.constant 0.000000e+00 : f32
    %202 = vector.broadcast %cst_55 : f32 to vector<1x256xf32>
    %203 = arith.select %201, %199, %202 : vector<1x256xi1>, vector<1x256xf32>
    %204 = vector.broadcast %203 : vector<1x256xf32> to vector<40x256xf32>
    %205 = arith.mulf %198, %204 : vector<40x256xf32>
    %206 = arith.addf %162, %205 : vector<40x256xf32>
    %c4_i32_56 = arith.constant 4 : i32
    %207 = vector.broadcast %c4_i32_56 : i32 to vector<1x256xi32>
    %208 = arith.cmpi slt, %4, %207 : vector<1x256xi32>
    %c4_i32_57 = arith.constant 4 : i32
    %209 = vector.broadcast %c4_i32_57 : i32 to vector<1x256xi32>
    %210 = arith.cmpi sge, %5, %209 : vector<1x256xi32>
    %211 = arith.andi %208, %210 : vector<1x256xi1>
    %cst_58 = arith.constant 0.000000e+00 : f32
    %212 = vector.broadcast %cst_58 : f32 to vector<1x256xf32>
    %213 = arith.select %211, %199, %212 : vector<1x256xi1>, vector<1x256xf32>
    %214 = vector.broadcast %213 : vector<1x256xf32> to vector<40x256xf32>
    %215 = arith.mulf %198, %214 : vector<40x256xf32>
    %216 = arith.addf %172, %215 : vector<40x256xf32>
    %c4_i32_59 = arith.constant 4 : i32
    %217 = vector.broadcast %c4_i32_59 : i32 to vector<1x256xi32>
    %218 = arith.cmpi slt, %5, %217 : vector<1x256xi32>
    %c4_i32_60 = arith.constant 4 : i32
    %219 = vector.broadcast %c4_i32_60 : i32 to vector<1x256xi32>
    %220 = arith.cmpi sge, %6, %219 : vector<1x256xi32>
    %221 = arith.andi %218, %220 : vector<1x256xi1>
    %cst_61 = arith.constant 0.000000e+00 : f32
    %222 = vector.broadcast %cst_61 : f32 to vector<1x256xf32>
    %223 = arith.select %221, %199, %222 : vector<1x256xi1>, vector<1x256xf32>
    %224 = vector.broadcast %223 : vector<1x256xf32> to vector<40x256xf32>
    %225 = arith.mulf %198, %224 : vector<40x256xf32>
    %226 = arith.addf %182, %225 : vector<40x256xf32>
    %c4_i32_62 = arith.constant 4 : i32
    %227 = vector.broadcast %c4_i32_62 : i32 to vector<1x256xi32>
    %228 = arith.cmpi slt, %6, %227 : vector<1x256xi32>
    %c4_i32_63 = arith.constant 4 : i32
    %229 = vector.broadcast %c4_i32_63 : i32 to vector<1x256xi32>
    %230 = arith.cmpi sge, %7, %229 : vector<1x256xi32>
    %231 = arith.andi %228, %230 : vector<1x256xi1>
    %cst_64 = arith.constant 0.000000e+00 : f32
    %232 = vector.broadcast %cst_64 : f32 to vector<1x256xf32>
    %233 = arith.select %231, %199, %232 : vector<1x256xi1>, vector<1x256xf32>
    %234 = vector.broadcast %233 : vector<1x256xf32> to vector<40x256xf32>
    %235 = arith.mulf %198, %234 : vector<40x256xf32>
    %236 = arith.addf %192, %235 : vector<40x256xf32>
    %237 = vector.extract_strided_slice %1 {offsets = [5, 0], sizes = [1, 256], strides = [1, 1]} : vector<8x256xi32> to vector<1x256xi32>
    %238 = vector.broadcast %237 : vector<1x256xi32> to vector<64x256xi32>
    %239 = arith.cmpi eq, %12, %238 : vector<64x256xi32>
    %240 = arith.extui %239 : vector<64x256xi1> to vector<64x256xi32>
    %241 = arith.sitofp %240 : vector<64x256xi32> to vector<64x256xf32>
    %cst_65 = arith.constant dense<0.000000e+00> : vector<40x256xf32>
    %242 = tpu.matmul %0, %241, %cst_65 {dimension_numbers = #tpu.dot_dimension_numbers<[1], [0], [0], [1], [0, 0, 1, 1], [], []>} : vector<40x64xf32>, vector<64x256xf32>, vector<40x256xf32> -> vector<40x256xf32>
    %243 = vector.extract_strided_slice %2 {offsets = [5, 0], sizes = [1, 256], strides = [1, 1]} : vector<8x256xf32> to vector<1x256xf32>
    %c5_i32 = arith.constant 5 : i32
    %244 = vector.broadcast %c5_i32 : i32 to vector<1x256xi32>
    %245 = arith.cmpi sge, %4, %244 : vector<1x256xi32>
    %cst_66 = arith.constant 0.000000e+00 : f32
    %246 = vector.broadcast %cst_66 : f32 to vector<1x256xf32>
    %247 = arith.select %245, %243, %246 : vector<1x256xi1>, vector<1x256xf32>
    %248 = vector.broadcast %247 : vector<1x256xf32> to vector<40x256xf32>
    %249 = arith.mulf %242, %248 : vector<40x256xf32>
    %250 = arith.addf %206, %249 : vector<40x256xf32>
    %c5_i32_67 = arith.constant 5 : i32
    %251 = vector.broadcast %c5_i32_67 : i32 to vector<1x256xi32>
    %252 = arith.cmpi slt, %4, %251 : vector<1x256xi32>
    %c5_i32_68 = arith.constant 5 : i32
    %253 = vector.broadcast %c5_i32_68 : i32 to vector<1x256xi32>
    %254 = arith.cmpi sge, %5, %253 : vector<1x256xi32>
    %255 = arith.andi %252, %254 : vector<1x256xi1>
    %cst_69 = arith.constant 0.000000e+00 : f32
    %256 = vector.broadcast %cst_69 : f32 to vector<1x256xf32>
    %257 = arith.select %255, %243, %256 : vector<1x256xi1>, vector<1x256xf32>
    %258 = vector.broadcast %257 : vector<1x256xf32> to vector<40x256xf32>
    %259 = arith.mulf %242, %258 : vector<40x256xf32>
    %260 = arith.addf %216, %259 : vector<40x256xf32>
    %c5_i32_70 = arith.constant 5 : i32
    %261 = vector.broadcast %c5_i32_70 : i32 to vector<1x256xi32>
    %262 = arith.cmpi slt, %5, %261 : vector<1x256xi32>
    %c5_i32_71 = arith.constant 5 : i32
    %263 = vector.broadcast %c5_i32_71 : i32 to vector<1x256xi32>
    %264 = arith.cmpi sge, %6, %263 : vector<1x256xi32>
    %265 = arith.andi %262, %264 : vector<1x256xi1>
    %cst_72 = arith.constant 0.000000e+00 : f32
    %266 = vector.broadcast %cst_72 : f32 to vector<1x256xf32>
    %267 = arith.select %265, %243, %266 : vector<1x256xi1>, vector<1x256xf32>
    %268 = vector.broadcast %267 : vector<1x256xf32> to vector<40x256xf32>
    %269 = arith.mulf %242, %268 : vector<40x256xf32>
    %270 = arith.addf %226, %269 : vector<40x256xf32>
    %c5_i32_73 = arith.constant 5 : i32
    %271 = vector.broadcast %c5_i32_73 : i32 to vector<1x256xi32>
    %272 = arith.cmpi slt, %6, %271 : vector<1x256xi32>
    %c5_i32_74 = arith.constant 5 : i32
    %273 = vector.broadcast %c5_i32_74 : i32 to vector<1x256xi32>
    %274 = arith.cmpi sge, %7, %273 : vector<1x256xi32>
    %275 = arith.andi %272, %274 : vector<1x256xi1>
    %cst_75 = arith.constant 0.000000e+00 : f32
    %276 = vector.broadcast %cst_75 : f32 to vector<1x256xf32>
    %277 = arith.select %275, %243, %276 : vector<1x256xi1>, vector<1x256xf32>
    %278 = vector.broadcast %277 : vector<1x256xf32> to vector<40x256xf32>
    %279 = arith.mulf %242, %278 : vector<40x256xf32>
    %280 = arith.addf %236, %279 : vector<40x256xf32>
    %281 = vector.extract_strided_slice %1 {offsets = [6, 0], sizes = [1, 256], strides = [1, 1]} : vector<8x256xi32> to vector<1x256xi32>
    %282 = vector.broadcast %281 : vector<1x256xi32> to vector<64x256xi32>
    %283 = arith.cmpi eq, %12, %282 : vector<64x256xi32>
    %284 = arith.extui %283 : vector<64x256xi1> to vector<64x256xi32>
    %285 = arith.sitofp %284 : vector<64x256xi32> to vector<64x256xf32>
    %cst_76 = arith.constant dense<0.000000e+00> : vector<40x256xf32>
    %286 = tpu.matmul %0, %285, %cst_76 {dimension_numbers = #tpu.dot_dimension_numbers<[1], [0], [0], [1], [0, 0, 1, 1], [], []>} : vector<40x64xf32>, vector<64x256xf32>, vector<40x256xf32> -> vector<40x256xf32>
    %287 = vector.extract_strided_slice %2 {offsets = [6, 0], sizes = [1, 256], strides = [1, 1]} : vector<8x256xf32> to vector<1x256xf32>
    %c6_i32 = arith.constant 6 : i32
    %288 = vector.broadcast %c6_i32 : i32 to vector<1x256xi32>
    %289 = arith.cmpi sge, %4, %288 : vector<1x256xi32>
    %cst_77 = arith.constant 0.000000e+00 : f32
    %290 = vector.broadcast %cst_77 : f32 to vector<1x256xf32>
    %291 = arith.select %289, %287, %290 : vector<1x256xi1>, vector<1x256xf32>
    %292 = vector.broadcast %291 : vector<1x256xf32> to vector<40x256xf32>
    %293 = arith.mulf %286, %292 : vector<40x256xf32>
    %294 = arith.addf %250, %293 : vector<40x256xf32>
    %c6_i32_78 = arith.constant 6 : i32
    %295 = vector.broadcast %c6_i32_78 : i32 to vector<1x256xi32>
    %296 = arith.cmpi slt, %4, %295 : vector<1x256xi32>
    %c6_i32_79 = arith.constant 6 : i32
    %297 = vector.broadcast %c6_i32_79 : i32 to vector<1x256xi32>
    %298 = arith.cmpi sge, %5, %297 : vector<1x256xi32>
    %299 = arith.andi %296, %298 : vector<1x256xi1>
    %cst_80 = arith.constant 0.000000e+00 : f32
    %300 = vector.broadcast %cst_80 : f32 to vector<1x256xf32>
    %301 = arith.select %299, %287, %300 : vector<1x256xi1>, vector<1x256xf32>
    %302 = vector.broadcast %301 : vector<1x256xf32> to vector<40x256xf32>
    %303 = arith.mulf %286, %302 : vector<40x256xf32>
    %304 = arith.addf %260, %303 : vector<40x256xf32>
    %c6_i32_81 = arith.constant 6 : i32
    %305 = vector.broadcast %c6_i32_81 : i32 to vector<1x256xi32>
    %306 = arith.cmpi slt, %5, %305 : vector<1x256xi32>
    %c6_i32_82 = arith.constant 6 : i32
    %307 = vector.broadcast %c6_i32_82 : i32 to vector<1x256xi32>
    %308 = arith.cmpi sge, %6, %307 : vector<1x256xi32>
    %309 = arith.andi %306, %308 : vector<1x256xi1>
    %cst_83 = arith.constant 0.000000e+00 : f32
    %310 = vector.broadcast %cst_83 : f32 to vector<1x256xf32>
    %311 = arith.select %309, %287, %310 : vector<1x256xi1>, vector<1x256xf32>
    %312 = vector.broadcast %311 : vector<1x256xf32> to vector<40x256xf32>
    %313 = arith.mulf %286, %312 : vector<40x256xf32>
    %314 = arith.addf %270, %313 : vector<40x256xf32>
    %c6_i32_84 = arith.constant 6 : i32
    %315 = vector.broadcast %c6_i32_84 : i32 to vector<1x256xi32>
    %316 = arith.cmpi slt, %6, %315 : vector<1x256xi32>
    %c6_i32_85 = arith.constant 6 : i32
    %317 = vector.broadcast %c6_i32_85 : i32 to vector<1x256xi32>
    %318 = arith.cmpi sge, %7, %317 : vector<1x256xi32>
    %319 = arith.andi %316, %318 : vector<1x256xi1>
    %cst_86 = arith.constant 0.000000e+00 : f32
    %320 = vector.broadcast %cst_86 : f32 to vector<1x256xf32>
    %321 = arith.select %319, %287, %320 : vector<1x256xi1>, vector<1x256xf32>
    %322 = vector.broadcast %321 : vector<1x256xf32> to vector<40x256xf32>
    %323 = arith.mulf %286, %322 : vector<40x256xf32>
    %324 = arith.addf %280, %323 : vector<40x256xf32>
    %325 = vector.extract_strided_slice %1 {offsets = [7, 0], sizes = [1, 256], strides = [1, 1]} : vector<8x256xi32> to vector<1x256xi32>
    %326 = vector.broadcast %325 : vector<1x256xi32> to vector<64x256xi32>
    %327 = arith.cmpi eq, %12, %326 : vector<64x256xi32>
    %328 = arith.extui %327 : vector<64x256xi1> to vector<64x256xi32>
    %329 = arith.sitofp %328 : vector<64x256xi32> to vector<64x256xf32>
    %cst_87 = arith.constant dense<0.000000e+00> : vector<40x256xf32>
    %330 = tpu.matmul %0, %329, %cst_87 {dimension_numbers = #tpu.dot_dimension_numbers<[1], [0], [0], [1], [0, 0, 1, 1], [], []>} : vector<40x64xf32>, vector<64x256xf32>, vector<40x256xf32> -> vector<40x256xf32>
    %331 = vector.extract_strided_slice %2 {offsets = [7, 0], sizes = [1, 256], strides = [1, 1]} : vector<8x256xf32> to vector<1x256xf32>
    %c7_i32 = arith.constant 7 : i32
    %332 = vector.broadcast %c7_i32 : i32 to vector<1x256xi32>
    %333 = arith.cmpi sge, %4, %332 : vector<1x256xi32>
    %cst_88 = arith.constant 0.000000e+00 : f32
    %334 = vector.broadcast %cst_88 : f32 to vector<1x256xf32>
    %335 = arith.select %333, %331, %334 : vector<1x256xi1>, vector<1x256xf32>
    %336 = vector.broadcast %335 : vector<1x256xf32> to vector<40x256xf32>
    %337 = arith.mulf %330, %336 : vector<40x256xf32>
    %338 = arith.addf %294, %337 : vector<40x256xf32>
    %c7_i32_89 = arith.constant 7 : i32
    %339 = vector.broadcast %c7_i32_89 : i32 to vector<1x256xi32>
    %340 = arith.cmpi slt, %4, %339 : vector<1x256xi32>
    %c7_i32_90 = arith.constant 7 : i32
    %341 = vector.broadcast %c7_i32_90 : i32 to vector<1x256xi32>
    %342 = arith.cmpi sge, %5, %341 : vector<1x256xi32>
    %343 = arith.andi %340, %342 : vector<1x256xi1>
    %cst_91 = arith.constant 0.000000e+00 : f32
    %344 = vector.broadcast %cst_91 : f32 to vector<1x256xf32>
    %345 = arith.select %343, %331, %344 : vector<1x256xi1>, vector<1x256xf32>
    %346 = vector.broadcast %345 : vector<1x256xf32> to vector<40x256xf32>
    %347 = arith.mulf %330, %346 : vector<40x256xf32>
    %348 = arith.addf %304, %347 : vector<40x256xf32>
    %c7_i32_92 = arith.constant 7 : i32
    %349 = vector.broadcast %c7_i32_92 : i32 to vector<1x256xi32>
    %350 = arith.cmpi slt, %5, %349 : vector<1x256xi32>
    %c7_i32_93 = arith.constant 7 : i32
    %351 = vector.broadcast %c7_i32_93 : i32 to vector<1x256xi32>
    %352 = arith.cmpi sge, %6, %351 : vector<1x256xi32>
    %353 = arith.andi %350, %352 : vector<1x256xi1>
    %cst_94 = arith.constant 0.000000e+00 : f32
    %354 = vector.broadcast %cst_94 : f32 to vector<1x256xf32>
    %355 = arith.select %353, %331, %354 : vector<1x256xi1>, vector<1x256xf32>
    %356 = vector.broadcast %355 : vector<1x256xf32> to vector<40x256xf32>
    %357 = arith.mulf %330, %356 : vector<40x256xf32>
    %358 = arith.addf %314, %357 : vector<40x256xf32>
    %c7_i32_95 = arith.constant 7 : i32
    %359 = vector.broadcast %c7_i32_95 : i32 to vector<1x256xi32>
    %360 = arith.cmpi slt, %6, %359 : vector<1x256xi32>
    %c7_i32_96 = arith.constant 7 : i32
    %361 = vector.broadcast %c7_i32_96 : i32 to vector<1x256xi32>
    %362 = arith.cmpi sge, %7, %361 : vector<1x256xi32>
    %363 = arith.andi %360, %362 : vector<1x256xi1>
    %cst_97 = arith.constant 0.000000e+00 : f32
    %364 = vector.broadcast %cst_97 : f32 to vector<1x256xf32>
    %365 = arith.select %363, %331, %364 : vector<1x256xi1>, vector<1x256xf32>
    %366 = vector.broadcast %365 : vector<1x256xf32> to vector<40x256xf32>
    %367 = arith.mulf %330, %366 : vector<40x256xf32>
    %368 = arith.addf %324, %367 : vector<40x256xf32>
    %369 = tpu.iota {dimensions = array<i32: 0>} : vector<16x1xi32>
    %cst_98 = arith.constant 0.000000e+00 : f32
    %370 = vector.broadcast %cst_98 : f32 to vector<16x256xf32>
    %c4_i32_99 = arith.constant 4 : i32
    %371 = vector.broadcast %c4_i32_99 : i32 to vector<1x256xi32>
    %372 = arith.muli %9, %371 : vector<1x256xi32>
    %373 = arith.addi %372, %8 : vector<1x256xi32>
    %374 = vector.broadcast %369 : vector<16x1xi32> to vector<16x256xi32>
    %375 = vector.broadcast %373 : vector<1x256xi32> to vector<16x256xi32>
    %376 = arith.cmpi eq, %374, %375 : vector<16x256xi32>
    %377 = arith.extui %376 : vector<16x256xi1> to vector<16x256xi32>
    %378 = arith.sitofp %377 : vector<16x256xi32> to vector<16x256xf32>
    %379 = arith.addf %370, %378 : vector<16x256xf32>
    %c4_i32_100 = arith.constant 4 : i32
    %380 = vector.broadcast %c4_i32_100 : i32 to vector<1x256xi32>
    %381 = arith.muli %10, %380 : vector<1x256xi32>
    %382 = arith.addi %381, %8 : vector<1x256xi32>
    %383 = vector.broadcast %369 : vector<16x1xi32> to vector<16x256xi32>
    %384 = vector.broadcast %382 : vector<1x256xi32> to vector<16x256xi32>
    %385 = arith.cmpi eq, %383, %384 : vector<16x256xi32>
    %386 = arith.extui %385 : vector<16x256xi1> to vector<16x256xi32>
    %387 = arith.sitofp %386 : vector<16x256xi32> to vector<16x256xf32>
    %388 = arith.addf %379, %387 : vector<16x256xf32>
    %c4_i32_101 = arith.constant 4 : i32
    %389 = vector.broadcast %c4_i32_101 : i32 to vector<1x256xi32>
    %390 = arith.muli %10, %389 : vector<1x256xi32>
    %391 = arith.addi %390, %9 : vector<1x256xi32>
    %392 = vector.broadcast %369 : vector<16x1xi32> to vector<16x256xi32>
    %393 = vector.broadcast %391 : vector<1x256xi32> to vector<16x256xi32>
    %394 = arith.cmpi eq, %392, %393 : vector<16x256xi32>
    %395 = arith.extui %394 : vector<16x256xi1> to vector<16x256xi32>
    %396 = arith.sitofp %395 : vector<16x256xi32> to vector<16x256xf32>
    %397 = arith.addf %388, %396 : vector<16x256xf32>
    %c4_i32_102 = arith.constant 4 : i32
    %398 = vector.broadcast %c4_i32_102 : i32 to vector<1x256xi32>
    %399 = arith.muli %11, %398 : vector<1x256xi32>
    %400 = arith.addi %399, %8 : vector<1x256xi32>
    %401 = vector.broadcast %369 : vector<16x1xi32> to vector<16x256xi32>
    %402 = vector.broadcast %400 : vector<1x256xi32> to vector<16x256xi32>
    %403 = arith.cmpi eq, %401, %402 : vector<16x256xi32>
    %404 = arith.extui %403 : vector<16x256xi1> to vector<16x256xi32>
    %405 = arith.sitofp %404 : vector<16x256xi32> to vector<16x256xf32>
    %406 = arith.addf %397, %405 : vector<16x256xf32>
    %c4_i32_103 = arith.constant 4 : i32
    %407 = vector.broadcast %c4_i32_103 : i32 to vector<1x256xi32>
    %408 = arith.muli %11, %407 : vector<1x256xi32>
    %409 = arith.addi %408, %9 : vector<1x256xi32>
    %410 = vector.broadcast %369 : vector<16x1xi32> to vector<16x256xi32>
    %411 = vector.broadcast %409 : vector<1x256xi32> to vector<16x256xi32>
    %412 = arith.cmpi eq, %410, %411 : vector<16x256xi32>
    %413 = arith.extui %412 : vector<16x256xi1> to vector<16x256xi32>
    %414 = arith.sitofp %413 : vector<16x256xi32> to vector<16x256xf32>
    %415 = arith.addf %406, %414 : vector<16x256xf32>
    %c4_i32_104 = arith.constant 4 : i32
    %416 = vector.broadcast %c4_i32_104 : i32 to vector<1x256xi32>
    %417 = arith.muli %11, %416 : vector<1x256xi32>
    %418 = arith.addi %417, %10 : vector<1x256xi32>
    %419 = vector.broadcast %369 : vector<16x1xi32> to vector<16x256xi32>
    %420 = vector.broadcast %418 : vector<1x256xi32> to vector<16x256xi32>
    %421 = arith.cmpi eq, %419, %420 : vector<16x256xi32>
    %422 = arith.extui %421 : vector<16x256xi1> to vector<16x256xi32>
    %423 = arith.sitofp %422 : vector<16x256xi32> to vector<16x256xf32>
    %424 = arith.addf %415, %423 : vector<16x256xf32>
    %cst_105 = arith.constant 0.000000e+00 : f32
    %425 = vector.broadcast %cst_105 : f32 to vector<8x256xf32>
    %426 = vector.extract_strided_slice %338 {offsets = [0, 0], sizes = [8, 256], strides = [1, 1]} : vector<40x256xf32> to vector<8x256xf32>
    %427 = vector.extract_strided_slice %338 {offsets = [0, 0], sizes = [8, 256], strides = [1, 1]} : vector<40x256xf32> to vector<8x256xf32>
    %428 = vector.extract_strided_slice %424 {offsets = [0, 0], sizes = [1, 256], strides = [1, 1]} : vector<16x256xf32> to vector<1x256xf32>
    %429 = arith.mulf %426, %427 : vector<8x256xf32>
    %430 = vector.broadcast %428 : vector<1x256xf32> to vector<8x256xf32>
    %431 = arith.mulf %430, %429 : vector<8x256xf32>
    %432 = arith.addf %425, %431 : vector<8x256xf32>
    %433 = vector.extract_strided_slice %338 {offsets = [8, 0], sizes = [8, 256], strides = [1, 1]} : vector<40x256xf32> to vector<8x256xf32>
    %434 = vector.extract_strided_slice %348 {offsets = [0, 0], sizes = [8, 256], strides = [1, 1]} : vector<40x256xf32> to vector<8x256xf32>
    %435 = vector.extract_strided_slice %424 {offsets = [1, 0], sizes = [1, 256], strides = [1, 1]} : vector<16x256xf32> to vector<1x256xf32>
    %436 = vector.extract_strided_slice %424 {offsets = [4, 0], sizes = [1, 256], strides = [1, 1]} : vector<16x256xf32> to vector<1x256xf32>
    %437 = arith.addf %435, %436 : vector<1x256xf32>
    %438 = arith.mulf %433, %434 : vector<8x256xf32>
    %439 = vector.broadcast %437 : vector<1x256xf32> to vector<8x256xf32>
    %440 = arith.mulf %439, %438 : vector<8x256xf32>
    %441 = arith.addf %432, %440 : vector<8x256xf32>
    %442 = vector.extract_strided_slice %338 {offsets = [16, 0], sizes = [8, 256], strides = [1, 1]} : vector<40x256xf32> to vector<8x256xf32>
    %443 = vector.extract_strided_slice %358 {offsets = [0, 0], sizes = [8, 256], strides = [1, 1]} : vector<40x256xf32> to vector<8x256xf32>
    %444 = vector.extract_strided_slice %424 {offsets = [2, 0], sizes = [1, 256], strides = [1, 1]} : vector<16x256xf32> to vector<1x256xf32>
    %445 = vector.extract_strided_slice %424 {offsets = [8, 0], sizes = [1, 256], strides = [1, 1]} : vector<16x256xf32> to vector<1x256xf32>
    %446 = arith.addf %444, %445 : vector<1x256xf32>
    %447 = arith.mulf %442, %443 : vector<8x256xf32>
    %448 = vector.broadcast %446 : vector<1x256xf32> to vector<8x256xf32>
    %449 = arith.mulf %448, %447 : vector<8x256xf32>
    %450 = arith.addf %441, %449 : vector<8x256xf32>
    %451 = vector.extract_strided_slice %338 {offsets = [24, 0], sizes = [8, 256], strides = [1, 1]} : vector<40x256xf32> to vector<8x256xf32>
    %452 = vector.extract_strided_slice %368 {offsets = [0, 0], sizes = [8, 256], strides = [1, 1]} : vector<40x256xf32> to vector<8x256xf32>
    %453 = vector.extract_strided_slice %424 {offsets = [3, 0], sizes = [1, 256], strides = [1, 1]} : vector<16x256xf32> to vector<1x256xf32>
    %454 = vector.extract_strided_slice %424 {offsets = [12, 0], sizes = [1, 256], strides = [1, 1]} : vector<16x256xf32> to vector<1x256xf32>
    %455 = arith.addf %453, %454 : vector<1x256xf32>
    %456 = arith.mulf %451, %452 : vector<8x256xf32>
    %457 = vector.broadcast %455 : vector<1x256xf32> to vector<8x256xf32>
    %458 = arith.mulf %457, %456 : vector<8x256xf32>
    %459 = arith.addf %450, %458 : vector<8x256xf32>
    %460 = vector.extract_strided_slice %348 {offsets = [8, 0], sizes = [8, 256], strides = [1, 1]} : vector<40x256xf32> to vector<8x256xf32>
    %461 = vector.extract_strided_slice %348 {offsets = [8, 0], sizes = [8, 256], strides = [1, 1]} : vector<40x256xf32> to vector<8x256xf32>
    %462 = vector.extract_strided_slice %424 {offsets = [5, 0], sizes = [1, 256], strides = [1, 1]} : vector<16x256xf32> to vector<1x256xf32>
    %463 = arith.mulf %460, %461 : vector<8x256xf32>
    %464 = vector.broadcast %462 : vector<1x256xf32> to vector<8x256xf32>
    %465 = arith.mulf %464, %463 : vector<8x256xf32>
    %466 = arith.addf %459, %465 : vector<8x256xf32>
    %467 = vector.extract_strided_slice %348 {offsets = [16, 0], sizes = [8, 256], strides = [1, 1]} : vector<40x256xf32> to vector<8x256xf32>
    %468 = vector.extract_strided_slice %358 {offsets = [8, 0], sizes = [8, 256], strides = [1, 1]} : vector<40x256xf32> to vector<8x256xf32>
    %469 = vector.extract_strided_slice %424 {offsets = [6, 0], sizes = [1, 256], strides = [1, 1]} : vector<16x256xf32> to vector<1x256xf32>
    %470 = vector.extract_strided_slice %424 {offsets = [9, 0], sizes = [1, 256], strides = [1, 1]} : vector<16x256xf32> to vector<1x256xf32>
    %471 = arith.addf %469, %470 : vector<1x256xf32>
    %472 = arith.mulf %467, %468 : vector<8x256xf32>
    %473 = vector.broadcast %471 : vector<1x256xf32> to vector<8x256xf32>
    %474 = arith.mulf %473, %472 : vector<8x256xf32>
    %475 = arith.addf %466, %474 : vector<8x256xf32>
    %476 = vector.extract_strided_slice %348 {offsets = [24, 0], sizes = [8, 256], strides = [1, 1]} : vector<40x256xf32> to vector<8x256xf32>
    %477 = vector.extract_strided_slice %368 {offsets = [8, 0], sizes = [8, 256], strides = [1, 1]} : vector<40x256xf32> to vector<8x256xf32>
    %478 = vector.extract_strided_slice %424 {offsets = [7, 0], sizes = [1, 256], strides = [1, 1]} : vector<16x256xf32> to vector<1x256xf32>
    %479 = vector.extract_strided_slice %424 {offsets = [13, 0], sizes = [1, 256], strides = [1, 1]} : vector<16x256xf32> to vector<1x256xf32>
    %480 = arith.addf %478, %479 : vector<1x256xf32>
    %481 = arith.mulf %476, %477 : vector<8x256xf32>
    %482 = vector.broadcast %480 : vector<1x256xf32> to vector<8x256xf32>
    %483 = arith.mulf %482, %481 : vector<8x256xf32>
    %484 = arith.addf %475, %483 : vector<8x256xf32>
    %485 = vector.extract_strided_slice %358 {offsets = [16, 0], sizes = [8, 256], strides = [1, 1]} : vector<40x256xf32> to vector<8x256xf32>
    %486 = vector.extract_strided_slice %358 {offsets = [16, 0], sizes = [8, 256], strides = [1, 1]} : vector<40x256xf32> to vector<8x256xf32>
    %487 = vector.extract_strided_slice %424 {offsets = [10, 0], sizes = [1, 256], strides = [1, 1]} : vector<16x256xf32> to vector<1x256xf32>
    %488 = arith.mulf %485, %486 : vector<8x256xf32>
    %489 = vector.broadcast %487 : vector<1x256xf32> to vector<8x256xf32>
    %490 = arith.mulf %489, %488 : vector<8x256xf32>
    %491 = arith.addf %484, %490 : vector<8x256xf32>
    %492 = vector.extract_strided_slice %358 {offsets = [24, 0], sizes = [8, 256], strides = [1, 1]} : vector<40x256xf32> to vector<8x256xf32>
    %493 = vector.extract_strided_slice %368 {offsets = [16, 0], sizes = [8, 256], strides = [1, 1]} : vector<40x256xf32> to vector<8x256xf32>
    %494 = vector.extract_strided_slice %424 {offsets = [11, 0], sizes = [1, 256], strides = [1, 1]} : vector<16x256xf32> to vector<1x256xf32>
    %495 = vector.extract_strided_slice %424 {offsets = [14, 0], sizes = [1, 256], strides = [1, 1]} : vector<16x256xf32> to vector<1x256xf32>
    %496 = arith.addf %494, %495 : vector<1x256xf32>
    %497 = arith.mulf %492, %493 : vector<8x256xf32>
    %498 = vector.broadcast %496 : vector<1x256xf32> to vector<8x256xf32>
    %499 = arith.mulf %498, %497 : vector<8x256xf32>
    %500 = arith.addf %491, %499 : vector<8x256xf32>
    %501 = vector.extract_strided_slice %368 {offsets = [24, 0], sizes = [8, 256], strides = [1, 1]} : vector<40x256xf32> to vector<8x256xf32>
    %502 = vector.extract_strided_slice %368 {offsets = [24, 0], sizes = [8, 256], strides = [1, 1]} : vector<40x256xf32> to vector<8x256xf32>
    %503 = vector.extract_strided_slice %424 {offsets = [15, 0], sizes = [1, 256], strides = [1, 1]} : vector<16x256xf32> to vector<1x256xf32>
    %504 = arith.mulf %501, %502 : vector<8x256xf32>
    %505 = vector.broadcast %503 : vector<1x256xf32> to vector<8x256xf32>
    %506 = arith.mulf %505, %504 : vector<8x256xf32>
    %507 = arith.addf %500, %506 : vector<8x256xf32>
    %cst_106 = arith.constant dense<0.000000e+00> : vector<256xf32>
    %508 = vector.multi_reduction <add>, %507, %cst_106 [0] : vector<8x256xf32> to vector<256xf32>
    %509 = vector.shape_cast %508 : vector<256xf32> to vector<1x256xf32>
    %510 = vector.extract_strided_slice %338 {offsets = [32, 0], sizes = [1, 256], strides = [1, 1]} : vector<40x256xf32> to vector<1x256xf32>
    %511 = vector.extract_strided_slice %348 {offsets = [32, 0], sizes = [1, 256], strides = [1, 1]} : vector<40x256xf32> to vector<1x256xf32>
    %512 = arith.addf %510, %511 : vector<1x256xf32>
    %513 = vector.extract_strided_slice %358 {offsets = [32, 0], sizes = [1, 256], strides = [1, 1]} : vector<40x256xf32> to vector<1x256xf32>
    %514 = arith.addf %512, %513 : vector<1x256xf32>
    %515 = vector.extract_strided_slice %368 {offsets = [32, 0], sizes = [1, 256], strides = [1, 1]} : vector<40x256xf32> to vector<1x256xf32>
    %516 = arith.addf %514, %515 : vector<1x256xf32>
    %517 = arith.addf %509, %516 : vector<1x256xf32>
    %c0_107 = arith.constant 0 : index
    %c0_108 = arith.constant 0 : index
    %518 = memref.load %arg5[%c0_107, %c0_108] : memref<1x1xf32, #tpu.memory_space<smem>>
    %519 = vector.broadcast %518 : f32 to vector<1x256xf32>
    %520 = arith.addf %517, %519 : vector<1x256xf32>
    %c0_109 = arith.constant 0 : index
    %c0_110 = arith.constant 0 : index
    %521 = vector.load %arg6[%c0_109, %c0_110] : memref<1x256xf32, #tpu.memory_space<vmem>>, vector<1x256xf32>
    tpu.vector_store %arg6[%c0_109, %c0_110], %520 {strides = array<i32>} : memref<1x256xf32, #tpu.memory_space<vmem>>, vector<1x256xf32>,
    return
  }
  func.func @transform_0(%arg0: i32) -> (i32, i32) {
    %c0_i32 = arith.constant 0 : i32
    %c0_i32_0 = arith.constant 0 : i32
    %c0_i32_1 = arith.constant 0 : i32
    return %c0_i32, %c0_i32_0 : i32, i32
  }
  func.func @transform_1(%arg0: i32) -> (i32, i32) {
    %c0_i32 = arith.constant 0 : i32
    %c0_i32_0 = arith.constant 0 : i32
    return %c0_i32, %arg0 : i32, i32
  }
  func.func @transform_2(%arg0: i32) -> (i32, i32) {
    %c0_i32 = arith.constant 0 : i32
    %c0_i32_0 = arith.constant 0 : i32
    return %c0_i32, %arg0 : i32, i32
  }
  func.func @transform_3(%arg0: i32) -> (i32, i32) {
    %c0_i32 = arith.constant 0 : i32
    %c0_i32_0 = arith.constant 0 : i32
    return %c0_i32, %arg0 : i32, i32
  }
  func.func @transform_4(%arg0: i32) -> (i32, i32) {
    %c0_i32 = arith.constant 0 : i32
    %c0_i32_0 = arith.constant 0 : i32
    %c0_i32_1 = arith.constant 0 : i32
    return %c0_i32, %c0_i32_0 : i32, i32
  }
  func.func @transform_5(%arg0: i32) -> (i32, i32) {
    %c0_i32 = arith.constant 0 : i32
    %c0_i32_0 = arith.constant 0 : i32
    return %c0_i32, %arg0 : i32, i32
  }
}

</mosaic_0001>

<bundles_post_ra>
// kernel: tpu_custom_call.1
= control target key start
LH: loop header
LB: loop body
LE: loop exit
PB: predicated region body
PF: predicated region fallthrough
CT: control target
= control target key end

     0   :  { %s6836_s0 = inlined_call_operand.hbm [shape: f32[40,64], index: 0, kind: input, shape index: {}]   ;;  %s6837_s1 = inlined_call_operand.hbm [shape: s32[8,512], index: 1, kind: input, shape index: {}]   ;;  %s6838_s2 = inlined_call_operand.hbm [shape: f32[8,512], index: 2, kind: input, shape index: {}]   ;;  %s6839_s3 = inlined_call_operand.hbm [shape: s32[8,512], index: 3, kind: input, shape index: {}]   ;;  %s6840_s4 = inlined_call_operand.<no memory space> [shape: f32[1,1], index: 4, kind: input, shape index: {}]   ;;  %s6841_s5 = inlined_call_operand.hbm [shape: f32[1,512], index: 5, kind: output, shape index: {}]  }
   0x1   :  { %6975 = sst [smem:[#allocation119_spill]] %s6837_s1 }
   0x2   :  { %10 = sst [smem:[#allocation2]] %s6840_s4 }
   0x3   :  { %11 = vsyncpa [#allocation4], 0 }
   0x4   :  { %12 = vsyncpa [#allocation7], 0 }
   0x5   :  { %14 = vsyncpa [#allocation7 + $0x1], 0 }
   0x6   :  { %15 = vsyncpa [#allocation10], 0 }
   0x7   :  { %17 = vsyncpa [#allocation10 + $0x1], 0 }
   0x8   :  { %18 = vsyncpa [#allocation5], 0 }
   0x9   :  { %20 = vsyncpa [#allocation5 + $0x1], 0  ;;  %s3966_s20 = smov 0   ;;  %s3968_s21 = smov 0  }
   0xa   :  { %s3970_s22 = smov 0   ;;  %s3972_s23 = smov 0  }
   0xb LB: > { %s3987_s4 = sadd.s32 1, %s3920_s23   ;;  %s54_s24 = sadd.s32 1, %s3916_s22  ;;  %s3920_s23 = sphi %s3972_s23, %s7408_s23   ;;  %s3916_s22 = sphi %s3970_s22, %s7412_s22   ;;  %s3912_s21 = sphi %s3968_s21, %s7411_s21   ;;  %s3908_s20 = sphi %s3966_s20, %s7410_s20  }
   0xc   : > { %6976 = sst [smem:[#allocation16_spill]] %s3987_s4  ;;  %s51_s25 = ssub.s32 %s3920_s23, %s3987_s4 }
   0xd   : > { %p6842_p0 = scmp.ne.s32.totalorder %s3916_s22, %s3912_s21  ;;  %p52_p1 = scmp.eq.s32.totalorder %s51_s25, 0 }
   0xe   : > { %p62_p2 = scmp.eq.s32.totalorder %s3920_s23, 0  ;;  %p3686_p4 = scmp.lt.s32.totalorder %s3920_s23, 2 }
   0xf   : > { %s3998_s26 = scalar_select %p52_p1, %s3916_s22, %s54_s24  }
  0x10   : > { %p63_p5 = por %p62_p2, %p6842_p0  ;;  %s206_s27 = sand.u32 1, %s3920_s23  }
  0x11   : > { %6977 = sst [smem:[#allocation17_spill]] %s3998_s26  ;;  %s6843_s28 = sand.u32 1, %s3916_s22  }
  0x12   : > { %s4007_s29 = sshll.u32 %s6843_s28, 4  ;;  %s4010_s30 = sshll.u32 %s3920_s23, 8 }
  0x13   : > { %s6978_s1 = sld [smem:[#allocation119_spill]]  ;;  %s210_s9 = scalar_lea.vmem [#allocation6], %s4007_s29 }
  0x14   : > { %s218_s10 = sshll.u32 %s210_s9, 4  ;;  %p4019_p6 = pnand %p3686_p4, %p63_p5  ;;  %s4023_s10 = int_to_ptr.vmem [resolvable:$true] %s218_s10 }
  0x15   : > { %s4025_s12 = scalar_lea.sflag [#allocation7], %s206_s27 }
  0x16   : > { %s6979_s11 = scalar_select %p4019_p6, 1, 0 }
  0x17   : > { %p4031_p8 = pneg %p4019_p6 }
  0x19   : > { %s4016_s8 = scalar_lea.hbm %s6978_s1, %s4010_s30  ;;  %s3733_s17 = scalar_lea.hbm %s6978_s1, 512 }
  0x1a   : > { %s3728_s13 = scalar_lea.hbm %s4016_s8, 256  ;;  %p3734_p11 = scmp.lt.u32.totalorder %s4016_s8, %s6978_s1 }
  0x1b   : > { %p3729_p7 = scmp.ne.s32.totalorder %s4016_s8, %s3728_s13  ;;  %p3735_p12 = scmp.lt.u32.totalorder %s3733_s17, %s3728_s13 }
  0x1c   : > { %s6980_s14 = scalar_select %p4031_p8, 1, 0 }
  0x1d   : > { %p3731_p9 = pnand %p4031_p8, %p3729_p7  ;;  %p3736_p13 = por %p3735_p12, %p3734_p11 }
  0x1e   : > { %p3737_p1 = scmp.lt.u32.totalorder %s3728_s13, %s4016_s8 }
  0x1f   : > { %p3732_p10 = pneg %p3731_p9 }
  0x20   : > { %p3738_p2 = por %p3737_p1, %p3736_p13 }
  0x22   : > { %p3739_p4 = pnand %p3738_p2, %p3732_p10 }
  0x24   : > { %3742 = shalt.err (!%p3739_p4)
}
  0x25   : > { %s3743_s24 = scalar_lea.vmem %s4023_s10, 256  ;;  %s3922_s25 = smov [#allocation6]  }
  0x26   : > { %p3744_p5 = scmp.ne.s32.totalorder %s4023_s10, %s3743_s24  ;;  %s3748_s27 = sshll.u32 %s3922_s25, 4  ;;  %s3749_s27 = int_to_ptr.vmem [resolvable:$false] %s3748_s27 }
  0x27   : > { %s3750_s6 = scalar_lea.vmem %s3749_s27, 512  ;;  %p3751_p3 = scmp.lt.s32.totalorder %s4023_s10, %s3749_s27 }
  0x28   : > { %p3746_p7 = pnand %p3744_p5, %p4031_p8  ;;  %p3752_p0 = scmp.lt.s32.totalorder %s3750_s6, %s3743_s24 }
  0x2a   : > { %p3747_p9 = pneg %p3746_p7  ;;  %p3753_p11 = por %p3752_p0, %p3751_p3 }
  0x2c   : > { %p3754_p12 = pnand %p3753_p11, %p3747_p9 }
  0x2e   : > { %3757 = shalt.err (!%p3754_p12)
}
  0x2f   : > { %3674 = dma.hbm_to_vmem [thread:$0]  (!%p4019_p6), %s4016_s8, 256, %s4023_s10, %s4025_s12  }
  0x30   : > { %s4056_s7 = sadd.s32 4294967295, %s3920_s23   ;;  %s3179_s9 = sadd.s32 4294967294, %s3920_s23  }
  0x31   : > { %p67_p0 = scmp.ne.s32.totalorder %s3912_s21, %s3908_s20  ;;  %p6844_p3 = scmp.eq.s32.totalorder %s4056_s7, 0 }
  0x32   : > { %p164_p10 = scmp.eq.s32.totalorder %s4056_s7, 1  ;;  %p170_p13 = scmp.eq.s32.totalorder %s3179_s9, 1 }
  0x33   : > { %p4065_p1 = por %p6844_p3, %p67_p0  ;;  %p3180_p2 = scmp.ge.s32.totalorder %s3920_s23, 1 }
  0x34   : > { %p6982_p4 = scmp.ne.s32.totalorder %s3916_s22, %s3912_s21  ;;  %p4077_p7 = por %p170_p13, %p67_p0 }
  0x35   : > { %s6981_s13 = scalar_select %p4065_p1, 1, 0 }
  0x36   : > { %p4073_p5 = por %p164_p10, %p6982_p4  ;;  %p177_p9 = scmp.lt.s32.totalorder %s3920_s23, 3 }
  0x37   : > { %s6984_s10 = scalar_select %p4077_p7, 1, 0 }
  0x38   : > { %s6983_s8 = scalar_select %p4073_p5, 1, 0 }
  0x39   : > { %p4082_p11 = pnand %p3180_p2, %p177_p9  ;;  %s3923_s16 = smov [#allocation3]  }
  0x3a   : > { %s189_s17 = sshll.u32 %s3923_s16, 4  ;;  %s4094_s24 = scalar_lea.hbm %s6838_s2, %s4010_s30  ;;  %s4086_s17 = int_to_ptr.vmem [resolvable:$true] %s189_s17 }
  0x3b   : > { %s6985_s15 = scalar_select %p4082_p11, 1, 0 }
  0x3c   : > { %p3667_p12 = pneg %p4082_p11  ;;  %s229_s25 = scalar_lea.vmem [#allocation8], %s4007_s29 }
  0x3d   : > { %s237_s27 = sshll.u32 %s229_s25, 4  ;;  %s3758_s9 = scalar_lea.hbm %s4094_s24, 256  ;;  %s238_s27 = int_to_ptr.vmem [resolvable:$true] %s237_s27 }
  0x3e   : > { %p4099_p0 = pnand %p3667_p12, %p6844_p3  ;;  %p3759_p10 = scmp.ne.s32.totalorder %s4094_s24, %s3758_s9 }
  0x3f   : > { %s3763_s19 = scalar_lea.hbm %s6838_s2, 512  ;;  %p3764_p4 = scmp.lt.u32.totalorder %s4094_s24, %s6838_s2 }
  0x40   : > { %s6986_s6 = scalar_select %p4099_p0, 1, 0 }
  0x41   : > { %p3761_p13 = pnand %p3759_p10, %p4031_p8  ;;  %p3765_p9 = scmp.lt.u32.totalorder %s3763_s19, %s3758_s9 }
  0x42   : > { %p3767_p12 = scmp.lt.u32.totalorder %s3758_s9, %s4094_s24 }
  0x43   : > { %p3762_p2 = pneg %p3761_p13  ;;  %p3766_p7 = por %p3765_p9, %p3764_p4 }
  0x45   : > { %p3768_p3 = por %p3767_p12, %p3766_p7 }
  0x47   : > { %p3769_p5 = pnand %p3768_p3, %p3762_p2 }
  0x49   : > { %3772 = shalt.err (!%p3769_p5)
}
  0x4a   : > { %s3773_s25 = scalar_lea.vmem %s238_s27, 256  ;;  %s3924_s26 = smov [#allocation8]  }
  0x4b   : > { %p3774_p1 = scmp.ne.s32.totalorder %s238_s27, %s3773_s25  ;;  %s3778_s4 = sshll.u32 %s3924_s26, 4  ;;  %s3779_s4 = int_to_ptr.vmem [resolvable:$false] %s3778_s4 }
  0x4c   : > { %s3780_s16 = scalar_lea.vmem %s3779_s4, 512  ;;  %p3781_p11 = scmp.lt.s32.totalorder %s238_s27, %s3779_s4 }
  0x4d   : > { %p3776_p10 = pnand %p3774_p1, %p4031_p8  ;;  %p3782_p0 = scmp.lt.s32.totalorder %s3780_s16, %s3773_s25 }
  0x4f   : > { %p3777_p13 = pneg %p3776_p10  ;;  %p3783_p6 = por %p3782_p0, %p3781_p11 }
  0x51   : > { %p3784_p4 = pnand %p3783_p6, %p3777_p13 }
  0x53   : > { %3787 = shalt.err (!%p3784_p4)
}
  0x54   : > { %p6987_p9 = scmp.ne.s32.totalorder %s6979_s11, 0  ;;  %s3788_s9 = scalar_lea.hbm %s6836_s0, 640 }
  0x55   : > { %p3789_p3 = scmp.ne.s32.totalorder %s6836_s0, %s3788_s9  ;;  %p6988_p1 = scmp.ne.s32.totalorder %s6986_s6, 0 }
  0x56   : > { %3677 = dma.hbm_to_vmem [thread:$0]  (!%p6987_p9), %s4094_s24, 256, %s238_s27, %s4025_s12  }
  0x57   : > { %p3790_p5 = pneg %p6988_p1  ;;  %p3795_p6 = scmp.lt.u32.totalorder %s3788_s9, %s6836_s0 }
  0x59   : > { %p3791_p7 = pnand %p3790_p5, %p3789_p3 }
  0x5b   : > { %p3792_p11 = pneg %p3791_p7 }
  0x5d   : > { %p3797_p0 = pnand %p3795_p6, %p3792_p11 }
  0x5f   : > { %3800 = shalt.err (!%p3797_p0)
}
  0x60   : > { %s3801_s12 = scalar_lea.vmem %s4086_s17, 640  ;;  %p3809_p13 = scmp.lt.s32.totalorder %s4086_s17, %s4086_s17 }
  0x61   : > { %p3802_p2 = scmp.ne.s32.totalorder %s4086_s17, %s3801_s12  ;;  %p3810_p4 = scmp.lt.s32.totalorder %s3801_s12, %s3801_s12 }
  0x63   : > { %p3804_p12 = pnand %p3802_p2, %p3790_p5  ;;  %p3811_p9 = por %p3810_p4, %p3809_p13 }
  0x65   : > { %p3805_p10 = pneg %p3804_p12 }
  0x67   : > { %p3812_p8 = pnand %p3811_p9, %p3805_p10 }
  0x69   : > { %3815 = shalt.err (!%p3812_p8)
}
  0x6a   : > { %s3925_s24 = smov 128   ;;  %s3926_s27 = smov 8  }
  0x6b   : > { %3670 = dma.hbm_to_vmem [thread:$0]  (!%p6988_p1), %s6836_s0, 640, %s4086_s17, [#allocation4], %s3925_s24, %s3925_s24, %s3926_s27  }
  0x6c   : > { %s4146_s9 = scalar_lea.hbm %s6839_s3, %s4010_s30  ;;  %s248_s18 = scalar_lea.vmem [#allocation9], %s4007_s29 }
  0x6d   : > { %s256_s19 = sshll.u32 %s248_s18, 4  ;;  %s6989_s4 = sand.u32 1, %s3916_s22   ;;  %s257_s19 = int_to_ptr.vmem [resolvable:$true] %s256_s19 }
  0x6e   : > { %s245_s26 = scalar_lea.sflag [#allocation10], %s6989_s4  ;;  %s3816_s12 = scalar_lea.hbm %s4146_s9, 256 }
  0x6f   : > { %p3817_p8 = scmp.ne.s32.totalorder %s4146_s9, %s3816_s12  ;;  %p6990_p9 = scmp.ne.s32.totalorder %s6980_s14, 0 }
  0x70   : > { %s3821_s24 = scalar_lea.hbm %s6839_s3, 512  ;;  %p3822_p1 = scmp.lt.u32.totalorder %s4146_s9, %s6839_s3 }
  0x71   : > { %p3819_p3 = pnand %p3817_p8, %p6990_p9  ;;  %p3823_p7 = scmp.lt.u32.totalorder %s3821_s24, %s3816_s12 }
  0x72   : > { %p3825_p6 = scmp.lt.u32.totalorder %s3816_s12, %s4146_s9 }
  0x73   : > { %p3820_p5 = pneg %p3819_p3  ;;  %p3824_p11 = por %p3823_p7, %p3822_p1 }
  0x75   : > { %p3826_p0 = por %p3825_p6, %p3824_p11 }
  0x77   : > { %p3827_p2 = pnand %p3826_p0, %p3820_p5 }
  0x79   : > { %3830 = shalt.err (!%p3827_p2)
}
  0x7a   : > { %s3831_s29 = scalar_lea.vmem %s257_s19, 256  ;;  %s3927_s25 = smov [#allocation9]  }
  0x7b   : > { %p3832_p12 = scmp.ne.s32.totalorder %s257_s19, %s3831_s29  ;;  %s3836_s16 = sshll.u32 %s3927_s25, 4  ;;  %s3837_s16 = int_to_ptr.vmem [resolvable:$false] %s3836_s16 }
  0x7c   : > { %s3838_s1 = scalar_lea.vmem %s3837_s16, 512  ;;  %p3839_p4 = scmp.lt.s32.totalorder %s257_s19, %s3837_s16 }
  0x7d   : > { %p3834_p10 = pnand %p3832_p12, %p6990_p9  ;;  %p3840_p8 = scmp.lt.s32.totalorder %s3838_s1, %s3831_s29 }
  0x7f   : > { %p3835_p13 = pneg %p3834_p10  ;;  %p3841_p3 = por %p3840_p8, %p3839_p4 }
  0x81   : > { %p3842_p1 = pnand %p3841_p3, %p3835_p13 }
  0x83   : > { %3845 = shalt.err (!%p3842_p1)
}
  0x84   : > { %p6991_p7 = scmp.ne.s32.totalorder %s6979_s11, 0  ;;  %p6992_p5 = scmp.ne.s32.totalorder %s6985_s15, 0 }
  0x86   : > { %3680 = dma.hbm_to_vmem [thread:$0]  (!%p6991_p7), %s4146_s9, 256, %s257_s19, %s245_s26  }
  0x87   : > { %265 = sbr.rel (%p6992_p5) target bundleno = 626 (0x272), region = 40 }
  0x8e   : > { %p6993_p11 = scmp.eq.s32.totalorder %s4056_s7, 0 }
  0x90   : > { %3891 = dma.done.wait (%p6993_p11), [#allocation4], 640   ;;  %p6994_p9 = pmov %p6993_p11 }
  0x91   : > { %s271_s14 = sand.u32 1, %s4056_s7   ;;  %s4176_s28 = sand.u32 1, %s3912_s21  }
  0x92   : > { %3893 = vsyncadd (%p6994_p9), [#allocation4], 4294966656  ;;  %s4179_s18 = sshll.u32 %s4176_s28, 4  ;;  %s272_s11 = scalar_lea.sflag [#allocation7], %s271_s14 }
  0x93   : > { %s275_s9 = scalar_lea.vmem [#allocation6], %s4179_s18  ;;  %p6995_p6 = scmp.ne.s32.totalorder %s6981_s13, 0 }
  0x95   : > { %3895 = dma.done.wait (%p6995_p6), %s272_s11, 512  }
  0x96   : > { %3897 = vsyncadd (%p6995_p6), %s272_s11, 4294966784  ;;  %s284_s15 = scalar_lea.vmem [#allocation8], %s4179_s18  ;;  %s290_s19 = scalar_lea.sflag [#allocation10], %s4176_s28 }
  0x97   : > { %s293_s4 = scalar_lea.vmem [#allocation9], %s4179_s18 }
  0x98   : > { %3899 = dma.done.wait (%p6995_p6), %s290_s19, 256  }
  0x99   : > { %3901 = vsyncadd (%p6995_p6), %s290_s19, 4294967040  ;;  %v6855_v0 = vlaneseq  ;;  %v6856_v1 = vmov 0.0   ;;  %v4207_v6 = vld [vmem:[%s275_s9 + $0x8] sm:$0xff]  ;;  %v4209_v7 = vld [vmem:[%s275_s9] sm:$0xff]  ;;  %v3929_v14 = vmov 1.0|1.0  }
  0x9a   : > { %490 = vmatprep.mubr.f32.mxu0 %v6856_v1  ;;  %783 = vmatprep.mubr.f32.mxu1 %v6856_v1  ;;  %v4354_v25 = vld [vmem:[#allocation3] sm:$0xff]  ;;  %v4379_v26 = vld [vmem:[#allocation3 + $0x8] sm:$0xff]  ;;  %v4414_v28 = vld [vmem:[#allocation3 + $0x10] sm:$0xff]  ;;  %v6858_v53 = vmov 0   ;;  %s3012_s13 = sld [smem:[#allocation2]]  ;;  %s3197_s26 = sshll.u32 %s4176_s28, 1 }
  0x9b   : > { %v4196_v2 = vshrl.u32 %v6855_v0, 7  ;;  %v4482_v33 = vld [vmem:[#allocation3 + $0x18] sm:$0xff]  ;;  %v4549_v38 = vld [vmem:[#allocation3 + $0x20] sm:$0xff]  ;;  %s3526_s12 = sshll.u32 %s4056_s7, 5  ;;  %s329_s17 = scalar_lea.vmem [#allocation11], %s3197_s26 }
  0x9c   : > { %v4910_v52 = vld [vmem:[%s293_s4] sm:$0xff]  ;;  %v4918_v55 = vld [vmem:[%s293_s4 + $0x8] sm:$0xff]  ;;  %s3054_s6 = sshll.u32 %s329_s17, 4  ;;  %s6792_s27 = scalar_lea.hbm %s6841_s5, %s3526_s12  ;;  %s6794_s6 = int_to_ptr.vmem [resolvable:$true] %s3054_s6 }
  0x9d   : > { %6996 = vst [vmem:[#allocation18_spill] sm:$0xff] %v4196_v2  ;;  %v4199_v3 = vsub.s32 0, %v4196_v2  ;;  %v4202_v4 = vsub.s32 1, %v4196_v2  ;;  %v4205_v5 = vadd.s32 8, %v4196_v2  ;;  %v4212_v8 = vadd.s32 16, %v4196_v2  ;;  %v4927_v58 = vld [vmem:[%s284_s15] sm:$0xff] }
  0x9e   : > { %v4215_v9 = vadd.s32 24, %v4196_v2  ;;  %v4255_v15 = vadd.s32 32, %v4196_v2  ;;  %v4258_v16 = vadd.s32 40, %v4196_v2  ;;  %v4276_v17 = vadd.s32 48, %v4196_v2  ;;  %s3040_s29 = scalar_lea.sflag [#allocation5], %s4176_s28  ;;  %s3846_s25 = scalar_lea.vmem %s6794_s6, 32 }
  0x9f   : > { %6997 = vst [vmem:[#allocation19_spill] sm:$0xff] %v4199_v3  ;;  %6998 = vst [vmem:[#allocation20_spill] sm:$0xff] %v4202_v4  ;;  %v4219_v10 = vrot.slane %v4207_v6, %v4199_v3  ;;  %v4223_v11 = vrot.slane %v4207_v6, %v4202_v4  ;;  %v4227_v12 = vrot.slane %v4209_v7, %v4199_v3  ;;  %v4284_v18 = vadd.s32 56, %v4196_v2  ;;  %p3847_p0 = scmp.ne.s32.totalorder %s6794_s6, %s3846_s25  ;;  %p7405_p2 = scmp.ne.s32.totalorder %s6983_s8, 0 }
  0xa0   : > { %6999 = vst [vmem:[#allocation21_spill] sm:$0xff] %v4205_v5  ;;  %v4231_v13 = vrot.slane %v4209_v7, %v4202_v4  ;;  %v4287_v19 = vsub.s32 2, %v4196_v2  ;;  %v4300_v20 = vsub.s32 3, %v4196_v2  ;;  %v1526_v27 = vsub.s32 4, %v4196_v2  ;;  %s3932_s7 = smov [#allocation11]  }
  0xa1   : > { %vm363_vm0 = vcmp.eq.s32.totalorder %v4196_v2, %v4219_v10  ;;  %vm365_vm1 = vcmp.eq.s32.totalorder %v4205_v5, %v4219_v10  ;;  %vm672_vm2 = vcmp.eq.s32.totalorder %v4196_v2, %v4223_v11  ;;  %vm674_vm3 = vcmp.eq.s32.totalorder %v4205_v5, %v4223_v11  ;;  %p3848_p12 = pnand %p3847_p0, %p7405_p2  ;;  %s3850_s16 = sshll.u32 %s3932_s7, 4  ;;  %s3851_s16 = int_to_ptr.vmem [resolvable:$false] %s3850_s16 }
  0xa2   : > { %vm3527_vm4 = vmpackc.low %vm365_vm1, %vm363_vm0  ;;  %vm362_vm5 = vcmp.eq.s32.totalorder %v4196_v2, %v4227_v12  ;;  %vm364_vm6 = vcmp.eq.s32.totalorder %v4205_v5, %v4227_v12  ;;  %vm671_vm7 = vcmp.eq.s32.totalorder %v4196_v2, %v4231_v13  ;;  %vm673_vm8 = vcmp.eq.s32.totalorder %v4205_v5, %v4231_v13  ;;  %7000 = vst [vmem:[#allocation22_spill] sm:$0xff] %v4287_v19  ;;  %s3852_s1 = scalar_lea.vmem %s3851_s16, 64  ;;  %p3853_p13 = scmp.lt.s32.totalorder %s6794_s6, %s3851_s16 }
  0xa3   : > { %3528 = vmatprep.subr.msk.bf16.mxu0 %vm3527_vm4, %v3929_v14  ;;  %vm3543_vm9 = vmpackc.low %vm674_vm3, %vm672_vm2  ;;  %vm367_vm10 = vcmp.eq.s32.totalorder %v4212_v8, %v4219_v10  ;;  %vm369_vm11 = vcmp.eq.s32.totalorder %v4215_v9, %v4219_v10  ;;  %vm676_vm13 = vcmp.eq.s32.totalorder %v4212_v8, %v4223_v11  ;;  %vm678_vm14 = vcmp.eq.s32.totalorder %v4215_v9, %v4223_v11  ;;  %p3849_p10 = pneg %p3848_p12  ;;  %p3854_p4 = scmp.lt.s32.totalorder %s3852_s1, %s3846_s25 }
  0xa4   : > { %3544 = vmatprep.subr.msk.bf16.mxu1 %vm3543_vm9, %v3929_v14  ;;  %vm3529_vm12 = vmpackc.low %vm364_vm6, %vm362_vm5  ;;  %vm366_vm0 = vcmp.eq.s32.totalorder %v4212_v8, %v4227_v12  ;;  %vm368_vm1 = vcmp.eq.s32.totalorder %v4215_v9, %v4227_v12  ;;  %vm675_vm3 = vcmp.eq.s32.totalorder %v4212_v8, %v4231_v13  ;;  %vm677_vm4 = vcmp.eq.s32.totalorder %v4215_v9, %v4231_v13 }
  0xa5   : > { %3530 = vmatpush1.bf16.msk.msra.mxu0 %vm3529_vm12, %v3929_v14  ;;  %vm3545_vm15 = vmpackc.low %vm673_vm8, %vm671_vm7  ;;  %vm371_vm6 = vcmp.eq.s32.totalorder %v4255_v15, %v4219_v10  ;;  %vm373_vm7 = vcmp.eq.s32.totalorder %v4258_v16, %v4219_v10  ;;  %vm680_vm9 = vcmp.eq.s32.totalorder %v4255_v15, %v4223_v11  ;;  %vm370_vm12 = vcmp.eq.s32.totalorder %v4255_v15, %v4227_v12  ;;  %p3855_p8 = por %p3854_p4, %p3853_p13 }
  0xa6   : > { %3546 = vmatpush1.bf16.msk.msra.mxu1 %vm3545_vm15, %v3929_v14  ;;  %vm3531_vm2 = vmpackc.low %vm369_vm11, %vm367_vm10  ;;  %vm682_vm10 = vcmp.eq.s32.totalorder %v4258_v16, %v4223_v11  ;;  %7001 = vst [vmem:[#allocation23_spill] sm:$0xff] %v4300_v20  ;;  %vm679_vm15 = vcmp.eq.s32.totalorder %v4255_v15, %v4231_v13  ;;  %v4314_v21 = vrot.slane %v4207_v6, %v4287_v19  ;;  %v4431_v30 = vsub.s32 5, %v4196_v2 }
  0xa7   : > { %3532 = vmatprep.subr.msk.bf16.mxu0 %vm3531_vm2, %v3929_v14  ;;  %vm3547_vm5 = vmpackc.low %vm678_vm14, %vm676_vm13  ;;  %vm372_vm13 = vcmp.eq.s32.totalorder %v4258_v16, %v4227_v12  ;;  %vm375_vm2 = vcmp.eq.s32.totalorder %v4276_v17, %v4219_v10  ;;  %v4323_v22 = vrot.slane %v4209_v7, %v4287_v19  ;;  %v4332_v23 = vrot.slane %v4207_v6, %v4300_v20  ;;  %p3856_p3 = pnand %p3855_p8, %p3849_p10 }
  0xa8   : > { %3548 = vmatprep.subr.msk.bf16.mxu1 %vm3547_vm5, %v3929_v14  ;;  %vm3533_vm8 = vmpackc.low %vm368_vm1, %vm366_vm0  ;;  %vm681_vm0 = vcmp.eq.s32.totalorder %v4258_v16, %v4231_v13  ;;  %vm684_vm5 = vcmp.eq.s32.totalorder %v4276_v17, %v4223_v11  ;;  %v4341_v24 = vrot.slane %v4209_v7, %v4300_v20  ;;  %7004 = vst [vmem:[#allocation24_spill] sm:$0xff] %v4431_v30  ;;  %v4615_v41 = vsub.s32 6, %v4196_v2 }
  0xa9   : > { %3534 = vmatpush1.bf16.msk.msra.mxu0 %vm3533_vm8, %v3929_v14  ;;  %vm3549_vm11 = vmpackc.low %vm677_vm4, %vm675_vm3  ;;  %vm377_vm3 = vcmp.eq.s32.totalorder %v4284_v18, %v4219_v10  ;;  %vm374_vm8 = vcmp.eq.s32.totalorder %v4276_v17, %v4227_v12  ;;  %v4462_v32 = vrot.slane %v4207_v6, %v1526_v27  ;;  %v4500_v35 = vrot.slane %v4207_v6, %v4431_v30 }
  0xaa   : > { %3550 = vmatpush1.bf16.msk.msra.mxu1 %vm3549_vm11, %v3929_v14  ;;  %vm3535_vm14 = vmpackc.low %vm373_vm7, %vm371_vm6  ;;  %vm686_vm6 = vcmp.eq.s32.totalorder %v4284_v18, %v4223_v11  ;;  %vm683_vm11 = vcmp.eq.s32.totalorder %v4276_v17, %v4231_v13  ;;  %v4529_v36 = vrot.slane %v4209_v7, %v1526_v27  ;;  %v4544_v37 = vrot.slane %v4209_v7, %v4431_v30 }
  0xab   : > { %3536 = vmatprep.subr.msk.bf16.mxu0 %vm3535_vm14, %v3929_v14  ;;  %vm3551_vm1 = vmpackc.low %vm682_vm10, %vm680_vm9  ;;  %vm376_vm9 = vcmp.eq.s32.totalorder %v4284_v18, %v4227_v12  ;;  %vm959_vm14 = vcmp.eq.s32.totalorder %v4196_v2, %v4314_v21  ;;  %7013 = vst [vmem:[#allocation25_spill] sm:$0xff] %v4615_v41  ;;  %v4624_v42 = vsub.s32 7, %v4196_v2  ;;  %v4675_v45 = vrot.slane %v4207_v6, %v4615_v41  ;;  %v4963_v12 = vld [vmem:[%s284_s15 + $0x8] sm:$0xff] }
  0xac   : > { %3552 = vmatprep.subr.msk.bf16.mxu1 %vm3551_vm1, %v3929_v14  ;;  %vm3537_vm4 = vmpackc.low %vm372_vm13, %vm370_vm12  ;;  %vm685_vm12 = vcmp.eq.s32.totalorder %v4284_v18, %v4231_v13  ;;  %vm958_vm1 = vcmp.eq.s32.totalorder %v4196_v2, %v4323_v22  ;;  %v4751_v49 = vrot.slane %v4209_v7, %v4615_v41  ;;  %v4934_v61 = vrot.slane %v4927_v58, 7 }
  0xad   : > { %3538 = vmatpush1.bf16.msk.msra.mxu0 %vm3537_vm4, %v3929_v14  ;;  %vm3553_vm7 = vmpackc.low %vm681_vm0, %vm679_vm15  ;;  %vm961_vm15 = vcmp.eq.s32.totalorder %v4205_v5, %v4314_v21  ;;  %vm410_vm4 = vcmask 523264   ;;  %7014 = vst [vmem:[#allocation26_spill] sm:$0xff] %v4624_v42  ;;  %v4692_v47 = vrot.slane %v4207_v6, %v4624_v42  ;;  %v4758_v50 = vrot.slane %v4209_v7, %v4624_v42 }
  0xae   : > { %3554 = vmatpush1.bf16.msk.msra.mxu1 %vm3553_vm7, %v3929_v14  ;;  %vm3539_vm10 = vmpackc.low %vm377_vm3, %vm375_vm2  ;;  %vm960_vm2 = vcmp.eq.s32.totalorder %v4205_v5, %v4323_v22  ;;  %v4942_v6 = vrot.slane %v4927_v58, 6  ;;  %v4959_v11 = vrot.slane %v4927_v58, 1  ;;  %v5009_v31 = vrot.slane %v4963_v12, 1 }
  0xaf   : > { %3540 = vmatprep.subr.msk.bf16.mxu0 %vm3539_vm10, %v3929_v14  ;;  %vm3555_vm13 = vmpackc.low %vm686_vm6, %vm684_vm5  ;;  %vm1246_vm5 = vcmp.eq.s32.totalorder %v4196_v2, %v4332_v23  ;;  %vm1248_vm6 = vcmp.eq.s32.totalorder %v4205_v5, %v4332_v23  ;;  %v5055_v48 = vrot.slane %v4927_v58, 2  ;;  %v5235_v0 = vrot.slane %v4963_v12, 4 }
  0xb0   : > { %3556 = vmatprep.subr.msk.bf16.mxu1 %vm3555_vm13, %v3929_v14  ;;  %vm3541_vm0 = vmpackc.low %vm376_vm9, %vm374_vm8  ;;  %vm1245_vm8 = vcmp.eq.s32.totalorder %v4196_v2, %v4341_v24  ;;  %vm1247_vm9 = vcmp.eq.s32.totalorder %v4205_v5, %v4341_v24 }
  0xb1   : > { %3542 = vmatpush1.bf16.msk.msra.mxu0 %vm3541_vm0, %v3929_v14  ;;  %vm3557_vm3 = vmpackc.low %vm685_vm12, %vm683_vm11  ;;  %vm963_vm11 = vcmp.eq.s32.totalorder %v4212_v8, %v4314_v21  ;;  %vm965_vm12 = vcmp.eq.s32.totalorder %v4215_v9, %v4314_v21 }
  0xb2   : > { %3558 = vmatpush1.bf16.msk.msra.mxu1 %vm3557_vm3, %v3929_v14  ;;  %vm3559_vm7 = vmpackc.low %vm961_vm15, %vm959_vm14  ;;  %vm962_vm14 = vcmp.eq.s32.totalorder %v4212_v8, %v4323_v22  ;;  %vm964_vm15 = vcmp.eq.s32.totalorder %v4215_v9, %v4323_v22 }
  0xb3   : > { %3560 = vmatprep.subr.msk.bf16.mxu0 %vm3559_vm7, %v3929_v14  ;;  %vm3561_vm10 = vmpackc.low %vm960_vm2, %vm958_vm1  ;;  %vm1250_vm1 = vcmp.eq.s32.totalorder %v4212_v8, %v4332_v23  ;;  %vm1252_vm2 = vcmp.eq.s32.totalorder %v4215_v9, %v4332_v23 }
  0xb4   : > { %3230 = vmatmul.mubr.msk.f32.vlgmr.msra.gmra.mrb[0].mxu0 %vm410_vm4, %v4354_v25  ;;  %vm3575_vm13 = vmpackc.low %vm1248_vm6, %vm1246_vm5  ;;  %vm1249_vm5 = vcmp.eq.s32.totalorder %v4212_v8, %v4341_v24  ;;  %vm1251_vm6 = vcmp.eq.s32.totalorder %v4215_v9, %v4341_v24 }
  0xb5   : > { %3267 = vmatmul.mubr.msk.f32.vlgmr.msra.gmra.mrb[0].mxu1 %vm410_vm4, %v4354_v25  ;;  %3562 = vmatpush1.bf16.msk.msra.mxu0 %vm3561_vm10, %v3929_v14  ;;  %vm3577_vm0 = vmpackc.low %vm1247_vm9, %vm1245_vm8  ;;  %vm967_vm8 = vcmp.eq.s32.totalorder %v4255_v15, %v4314_v21  ;;  %vm969_vm9 = vcmp.eq.s32.totalorder %v4258_v16, %v4314_v21 }
  0xb6   : > { %3576 = vmatprep.subr.msk.bf16.mxu1 %vm3575_vm13, %v3929_v14  ;;  %496 = vmatprep.mubr.f32.mxu0 %v6856_v1  ;;  %vm3563_vm3 = vmpackc.low %vm965_vm12, %vm963_vm11  ;;  %vm966_vm11 = vcmp.eq.s32.totalorder %v4255_v15, %v4323_v22  ;;  %vm968_vm12 = vcmp.eq.s32.totalorder %v4258_v16, %v4323_v22 }
  0xb7   : > { %789 = vmatprep.mubr.f32.mxu1 %v6856_v1  ;;  %3578 = vmatpush1.bf16.msk.msra.mxu1 %vm3577_vm0, %v3929_v14  ;;  %vm3565_vm7 = vmpackc.low %vm964_vm15, %vm962_vm14  ;;  %vm1254_vm14 = vcmp.eq.s32.totalorder %v4255_v15, %v4332_v23  ;;  %vm1256_vm15 = vcmp.eq.s32.totalorder %v4258_v16, %v4332_v23 }
  0xb8   : > { %3231 = vmatmul.mubr.msk.f32.gmra.mrb[2].mxu0 %vm410_vm4, %v4379_v26  ;;  %3564 = vmatprep.subr.msk.bf16.mxu0 %vm3563_vm3, %v3929_v14  ;;  %vm3579_vm10 = vmpackc.low %vm1252_vm2, %vm1250_vm1  ;;  %vm1253_vm1 = vcmp.eq.s32.totalorder %v4255_v15, %v4341_v24  ;;  %vm1255_vm2 = vcmp.eq.s32.totalorder %v4258_v16, %v4341_v24 }
  0xb9   : > { %3268 = vmatmul.mubr.msk.f32.gmra.mrb[2].mxu1 %vm410_vm4, %v4379_v26  ;;  %3566 = vmatpush1.bf16.msk.msra.mxu0 %vm3565_vm7, %v3929_v14  ;;  %vm4422_vm13 = vmpackc.low %vm1251_vm6, %vm1249_vm5  ;;  %vm971_vm5 = vcmp.eq.s32.totalorder %v4276_v17, %v4314_v21  ;;  %vm973_vm6 = vcmp.eq.s32.totalorder %v4284_v18, %v4314_v21 }
  0xba   : > { %502 = vmatprep.mubr.f32.mxu0 %v6856_v1  ;;  %795 = vmatprep.mubr.f32.mxu1 %v6856_v1  ;;  %vm3567_vm0 = vmpackc.low %vm969_vm9, %vm967_vm8  ;;  %vm970_vm8 = vcmp.eq.s32.totalorder %v4276_v17, %v4323_v22  ;;  %vm972_vm9 = vcmp.eq.s32.totalorder %v4284_v18, %v4323_v22 }
  0xbb   : > { %3580 = vmatprep.subr.msk.bf16.mxu1 %vm3579_vm10, %v3929_v14  ;;  %3568 = vmatprep.subr.msk.bf16.mxu0 %vm3567_vm0, %v3929_v14  ;;  %vm4453_vm3 = vmpackc.low %vm968_vm12, %vm966_vm11  ;;  %vm1258_vm11 = vcmp.eq.s32.totalorder %v4276_v17, %v4332_v23  ;;  %vm1260_vm12 = vcmp.eq.s32.totalorder %v4284_v18, %v4332_v23 }
  0xbc   : > { %3232 = vmatmul.mubr.msk.f32.gmra.mrb[4].mxu0 %vm410_vm4, %v4414_v28  ;;  %3582 = vmatpush1.bf16.msk.msra.mxu1 %vm4422_vm13, %v3929_v14  ;;  %vm3583_vm7 = vmpackc.low %vm1256_vm15, %vm1254_vm14  ;;  %vm1257_vm14 = vcmp.eq.s32.totalorder %v4276_v17, %v4341_v24  ;;  %vm1259_vm15 = vcmp.eq.s32.totalorder %v4284_v18, %v4341_v24  ;;  %v4994_v24 = vrot.slane %v4963_v12, 7 }
  0xbd   : > { %3269 = vmatmul.mubr.msk.f32.gmra.mrb[4].mxu1 %vm410_vm4, %v4414_v28  ;;  %508 = vmatprep.mubr.f32.mxu0 %v6856_v1  ;;  %vm4490_vm10 = vmpackc.low %vm1255_vm2, %vm1253_vm1  ;;  %vm1533_vm1 = vcmp.eq.s32.totalorder %v4196_v2, %v4462_v32  ;;  %vm1535_vm2 = vcmp.eq.s32.totalorder %v4205_v5, %v4462_v32 }
  0xbe   : > { %801 = vmatprep.mubr.f32.mxu1 %v6856_v1  ;;  %3570 = vmatpush1.bf16.msk.msra.mxu0 %vm4453_vm3, %v3929_v14  ;;  %vm3571_vm13 = vmpackc.low %vm973_vm6, %vm971_vm5  ;;  %vm1820_vm6 = vcmp.eq.s32.totalorder %v4196_v2, %v4500_v35 }
  0xbf   : > { %3584 = vmatprep.subr.msk.bf16.mxu1 %vm3583_vm7, %v3929_v14  ;;  %3572 = vmatprep.subr.msk.bf16.mxu0 %vm3571_vm13, %v3929_v14  ;;  %vm3573_vm0 = vmpackc.low %vm972_vm9, %vm970_vm8  ;;  %vm1822_vm7 = vcmp.eq.s32.totalorder %v4205_v5, %v4500_v35  ;;  %vm1532_vm9 = vcmp.eq.s32.totalorder %v4196_v2, %v4529_v36  ;;  %vm1821_vm13 = vcmp.eq.s32.totalorder %v4205_v5, %v4544_v37 }
  0xc0   : > { %3233 = vmatmul.mubr.msk.f32.gmra.mrb[6].mxu0 %vm410_vm4, %v4482_v33  ;;  %3586 = vmatpush1.bf16.msk.msra.mxu1 %vm4490_vm10, %v3929_v14  ;;  %vm3587_vm3 = vmpackc.low %vm1260_vm12, %vm1258_vm11  ;;  %vm1534_vm10 = vcmp.eq.s32.totalorder %v4205_v5, %v4529_v36  ;;  %vm1819_vm12 = vcmp.eq.s32.totalorder %v4196_v2, %v4544_v37 }
  0xc1   : > { %3270 = vmatmul.mubr.msk.f32.gmra.mrb[6].mxu1 %vm410_vm4, %v4482_v33  ;;  %514 = vmatprep.mubr.f32.mxu0 %v6856_v1  ;;  %vm3589_vm5 = vmpackc.low %vm1259_vm15, %vm1257_vm14  ;;  %vm1537_vm14 = vcmp.eq.s32.totalorder %v4212_v8, %v4462_v32  ;;  %vm1539_vm15 = vcmp.eq.s32.totalorder %v4215_v9, %v4462_v32 }
  0xc2   : > { %807 = vmatprep.mubr.f32.mxu1 %v6856_v1  ;;  %3574 = vmatpush1.bf16.msk.msra.mxu0 %vm3573_vm0, %v3929_v14  ;;  %vm3591_vm8 = vmpackc.low %vm1535_vm2, %vm1533_vm1  ;;  %vm1824_vm1 = vcmp.eq.s32.totalorder %v4212_v8, %v4500_v35  ;;  %vm1826_vm2 = vcmp.eq.s32.totalorder %v4215_v9, %v4500_v35 }
  0xc3   : > { %3588 = vmatprep.subr.msk.bf16.mxu1 %vm3587_vm3, %v3929_v14  ;;  %3592 = vmatprep.subr.msk.bf16.mxu0 %vm3591_vm8, %v3929_v14  ;;  %vm3607_vm11 = vmpackc.low %vm1822_vm7, %vm1820_vm6  ;;  %vm1538_vm6 = vcmp.eq.s32.totalorder %v4215_v9, %v4529_v36  ;;  %vm1823_vm8 = vcmp.eq.s32.totalorder %v4212_v8, %v4544_v37 }
  0xc4   : > { %3234 = vmatmul.mubr.msk.f32.gmra.mrb[8].mxu0 %vm410_vm4, %v4549_v38  ;;  %3590 = vmatpush1.bf16.msk.msra.mxu1 %vm3589_vm5, %v3929_v14  ;;  %vm3593_vm0 = vmpackc.low %vm1534_vm10, %vm1532_vm9  ;;  %vm1536_vm5 = vcmp.eq.s32.totalorder %v4212_v8, %v4529_v36  ;;  %vm1825_vm9 = vcmp.eq.s32.totalorder %v4215_v9, %v4544_v37 }
  0xc5   : > { %3271 = vmatmul.mubr.msk.f32.gmra.mrb[8].mxu1 %vm410_vm4, %v4549_v38  ;;  %1070 = vmatprep.mubr.f32.mxu0 %v6856_v1  ;;  %vm3609_vm3 = vmpackc.low %vm1821_vm13, %vm1819_vm12  ;;  %vm1543_vm12 = vcmp.eq.s32.totalorder %v4258_v16, %v4462_v32 }
  0xc6   : > { %1357 = vmatprep.mubr.f32.mxu1 %v6856_v1  ;;  %3608 = vmatprep.subr.msk.bf16.mxu1 %vm3607_vm11, %v3929_v14  ;;  %vm4595_vm7 = vmpackc.low %vm1539_vm15, %vm1537_vm14  ;;  %vm1541_vm11 = vcmp.eq.s32.totalorder %v4255_v15, %v4462_v32  ;;  %vm1828_vm14 = vcmp.eq.s32.totalorder %v4255_v15, %v4500_v35  ;;  %vm1830_vm15 = vcmp.eq.s32.totalorder %v4258_v16, %v4500_v35 }
  0xc7   : > { %vm4606_vm10 = vmpackc.low %vm1826_vm2, %vm1824_vm1  ;;  %vm1540_vm1 = vcmp.eq.s32.totalorder %v4255_v15, %v4529_v36  ;;  %vm1542_vm2 = vcmp.eq.s32.totalorder %v4258_v16, %v4529_v36 }
  0xc8   : > { %3304 = vmatmul.mubr.msk.f32.vlgmr.msra.gmra.mrb[10].mxu0 %vm410_vm4, %v4354_v25  ;;  %vm3597_vm13 = vmpackc.low %vm1538_vm6, %vm1536_vm5  ;;  %vm1827_vm5 = vcmp.eq.s32.totalorder %v4255_v15, %v4544_v37  ;;  %vm1829_vm6 = vcmp.eq.s32.totalorder %v4258_v16, %v4544_v37 }
  0xc9   : > { %3594 = vmatpush1.bf16.msk.msra.mxu0 %vm3593_vm0, %v3929_v14  ;;  %3341 = vmatmul.mubr.msk.f32.vlgmr.msra.gmra.mrb[10].mxu1 %vm410_vm4, %v4354_v25  ;;  %vm3613_vm0 = vmpackc.low %vm1825_vm9, %vm1823_vm8  ;;  %vm1545_vm8 = vcmp.eq.s32.totalorder %v4276_v17, %v4462_v32  ;;  %vm1547_vm9 = vcmp.eq.s32.totalorder %v4284_v18, %v4462_v32 }
  0xca   : > { %1076 = vmatprep.mubr.f32.mxu0 %v6856_v1  ;;  %3610 = vmatpush1.bf16.msk.msra.mxu1 %vm3609_vm3, %v3929_v14  ;;  %vm4651_vm3 = vmpackc.low %vm1543_vm12, %vm1541_vm11  ;;  %vm1832_vm11 = vcmp.eq.s32.totalorder %v4276_v17, %v4500_v35  ;;  %vm1834_vm12 = vcmp.eq.s32.totalorder %v4284_v18, %v4500_v35 }
  0xcb   : > { %1363 = vmatprep.mubr.f32.mxu1 %v6856_v1  ;;  %3596 = vmatprep.subr.msk.bf16.mxu0 %vm4595_vm7, %v3929_v14  ;;  %vm4665_vm7 = vmpackc.low %vm1830_vm15, %vm1828_vm14  ;;  %vm1544_vm14 = vcmp.eq.s32.totalorder %v4276_v17, %v4529_v36  ;;  %vm1546_vm15 = vcmp.eq.s32.totalorder %v4284_v18, %v4529_v36 }
  0xcc   : > { %3305 = vmatmul.mubr.msk.f32.gmra.mrb[12].mxu0 %vm410_vm4, %v4379_v26  ;;  %3612 = vmatprep.subr.msk.bf16.mxu1 %vm4606_vm10, %v3929_v14  ;;  %vm4682_vm10 = vmpackc.low %vm1542_vm2, %vm1540_vm1  ;;  %vm1831_vm1 = vcmp.eq.s32.totalorder %v4276_v17, %v4544_v37  ;;  %vm1833_vm2 = vcmp.eq.s32.totalorder %v4284_v18, %v4544_v37 }
  0xcd   : > { %3342 = vmatmul.mubr.msk.f32.gmra.mrb[12].mxu1 %vm410_vm4, %v4379_v26  ;;  %3598 = vmatpush1.bf16.msk.msra.mxu0 %vm3597_vm13, %v3929_v14  ;;  %vm4704_vm13 = vmpackc.low %vm1829_vm6, %vm1827_vm5  ;;  %vm2107_vm5 = vcmp.eq.s32.totalorder %v4196_v2, %v4675_v45  ;;  %vm2109_vm6 = vcmp.eq.s32.totalorder %v4205_v5, %v4675_v45 }
  0xce   : > { %1082 = vmatprep.mubr.f32.mxu0 %v6856_v1  ;;  %3614 = vmatpush1.bf16.msk.msra.mxu1 %vm3613_vm0, %v3929_v14  ;;  %vm3603_vm0 = vmpackc.low %vm1547_vm9, %vm1545_vm8  ;;  %vm2390_vm8 = vcmp.eq.s32.totalorder %v4196_v2, %v4692_v47  ;;  %vm2392_vm9 = vcmp.eq.s32.totalorder %v4205_v5, %v4692_v47 }
  0xcf   : > { %1369 = vmatprep.mubr.f32.mxu1 %v6856_v1  ;;  %3600 = vmatprep.subr.msk.bf16.mxu0 %vm4651_vm3, %v3929_v14  ;;  %vm3619_vm3 = vmpackc.low %vm1834_vm12, %vm1832_vm11 }
  0xd0   : > { %3306 = vmatmul.mubr.msk.f32.gmra.mrb[14].mxu0 %vm410_vm4, %v4414_v28  ;;  %3616 = vmatprep.subr.msk.bf16.mxu1 %vm4665_vm7, %v3929_v14  ;;  %vm3605_vm7 = vmpackc.low %vm1546_vm15, %vm1544_vm14  ;;  %vm2108_vm14 = vcmp.eq.s32.totalorder %v4205_v5, %v4751_v49  ;;  %vm2389_vm15 = vcmp.eq.s32.totalorder %v4196_v2, %v4758_v50 }
  0xd1   : > { %3343 = vmatmul.mubr.msk.f32.gmra.mrb[14].mxu1 %vm410_vm4, %v4414_v28  ;;  %1088 = vmatprep.mubr.f32.mxu0 %v6856_v1  ;;  %vm3621_vm11 = vmpackc.low %vm1833_vm2, %vm1831_vm1  ;;  %vm2111_vm1 = vcmp.eq.s32.totalorder %v4212_v8, %v4675_v45  ;;  %vm2113_vm2 = vcmp.eq.s32.totalorder %v4215_v9, %v4675_v45 }
  0xd2   : > { %3602 = vmatpush1.bf16.msk.msra.mxu0 %vm4682_vm10, %v3929_v14  ;;  %1375 = vmatprep.mubr.f32.mxu1 %v6856_v1  ;;  %vm3623_vm10 = vmpackc.low %vm2109_vm6, %vm2107_vm5  ;;  %vm2394_vm5 = vcmp.eq.s32.totalorder %v4212_v8, %v4692_v47  ;;  %vm2396_vm6 = vcmp.eq.s32.totalorder %v4215_v9, %v4692_v47 }
  0xd3   : > { %3618 = vmatpush1.bf16.msk.msra.mxu1 %vm4704_vm13, %v3929_v14  ;;  %3604 = vmatprep.subr.msk.bf16.mxu0 %vm3603_vm0, %v3929_v14  ;;  %vm3639_vm12 = vmpackc.low %vm2392_vm9, %vm2390_vm8  ;;  %vm2106_vm13 = vcmp.eq.s32.totalorder %v4196_v2, %v4751_v49  ;;  %vm2391_vm0 = vcmp.eq.s32.totalorder %v4205_v5, %v4758_v50  ;;  %vm2110_vm8 = vcmp.eq.s32.totalorder %v4212_v8, %v4751_v49 }
  0xd4   : > { %3307 = vmatmul.mubr.msk.f32.gmra.mrb[16].mxu0 %vm410_vm4, %v4482_v33  ;;  %3620 = vmatprep.subr.msk.bf16.mxu1 %vm3619_vm3, %v3929_v14  ;;  %vm3625_vm3 = vmpackc.low %vm2108_vm14, %vm2106_vm13  ;;  %vm2112_vm9 = vcmp.eq.s32.totalorder %v4215_v9, %v4751_v49  ;;  %vm2115_vm14 = vcmp.eq.s32.totalorder %v4255_v15, %v4675_v45 }
  0xd5   : > { %3344 = vmatmul.mubr.msk.f32.gmra.mrb[16].mxu1 %vm410_vm4, %v4482_v33  ;;  %1094 = vmatprep.mubr.f32.mxu0 %v6856_v1  ;;  %vm3643_vm13 = vmpackc.low %vm2396_vm6, %vm2394_vm5  ;;  %vm2114_vm5 = vcmp.eq.s32.totalorder %v4255_v15, %v4751_v49  ;;  %vm2116_vm6 = vcmp.eq.s32.totalorder %v4258_v16, %v4751_v49 }
  0xd6   : > { %3606 = vmatpush1.bf16.msk.msra.mxu0 %vm3605_vm7, %v3929_v14  ;;  %1381 = vmatprep.mubr.f32.mxu1 %v6856_v1  ;;  %vm3641_vm7 = vmpackc.low %vm2391_vm0, %vm2389_vm15  ;;  %vm2117_vm15 = vcmp.eq.s32.totalorder %v4258_v16, %v4675_v45 }
  0xd7   : > { %3622 = vmatpush1.bf16.msk.msra.mxu1 %vm3621_vm11, %v3929_v14  ;;  %3624 = vmatprep.subr.msk.bf16.mxu0 %vm3623_vm10, %v3929_v14  ;;  %vm3627_vm11 = vmpackc.low %vm2113_vm2, %vm2111_vm1  ;;  %vm2393_vm10 = vcmp.eq.s32.totalorder %v4212_v8, %v4758_v50  ;;  %vm2398_vm1 = vcmp.eq.s32.totalorder %v4255_v15, %v4692_v47  ;;  %vm2400_vm2 = vcmp.eq.s32.totalorder %v4258_v16, %v4692_v47 }
  0xd8   : > { %3308 = vmatmul.mubr.msk.f32.gmra.mrb[18].mxu0 %vm410_vm4, %v4549_v38  ;;  %3640 = vmatprep.subr.msk.bf16.mxu1 %vm3639_vm12, %v3929_v14  ;;  %vm2395_vm12 = vcmp.eq.s32.totalorder %v4215_v9, %v4758_v50  ;;  %vm3629_vm0 = vmpackc.low %vm2112_vm9, %vm2110_vm8  ;;  %vm2397_vm8 = vcmp.eq.s32.totalorder %v4255_v15, %v4758_v50  ;;  %vm2399_vm9 = vcmp.eq.s32.totalorder %v4258_v16, %v4758_v50 }
  0xd9   : > { %3345 = vmatmul.mubr.msk.f32.gmra.mrb[18].mxu1 %vm410_vm4, %v4549_v38  ;;  %1644 = vmatprep.mubr.f32.mxu0 %v6856_v1 }
  0xda   : > { %1931 = vmatprep.mubr.f32.mxu1 %v6856_v1 }
  0xdc   : > { %3378 = vmatmul.mubr.msk.f32.vlgmr.msra.gmra.mrb[20].mxu0 %vm410_vm4, %v4354_v25 }
  0xdd   : > { %3626 = vmatpush1.bf16.msk.msra.mxu0 %vm3625_vm3, %v3929_v14  ;;  %3415 = vmatmul.mubr.msk.f32.vlgmr.msra.gmra.mrb[20].mxu1 %vm410_vm4, %v4354_v25  ;;  %vm3645_vm3 = vmpackc.low %vm2395_vm12, %vm2393_vm10  ;;  %vm2119_vm10 = vcmp.eq.s32.totalorder %v4276_v17, %v4675_v45  ;;  %vm2121_vm12 = vcmp.eq.s32.totalorder %v4284_v18, %v4675_v45 }
  0xde   : > { %1650 = vmatprep.mubr.f32.mxu0 %v6856_v1  ;;  %3642 = vmatpush1.bf16.msk.msra.mxu1 %vm3641_vm7, %v3929_v14  ;;  %vm3631_vm7 = vmpackc.low %vm2117_vm15, %vm2115_vm14  ;;  %vm2402_vm14 = vcmp.eq.s32.totalorder %v4276_v17, %v4692_v47  ;;  %vm2404_vm15 = vcmp.eq.s32.totalorder %v4284_v18, %v4692_v47 }
  0xdf   : > { %1937 = vmatprep.mubr.f32.mxu1 %v6856_v1  ;;  %3628 = vmatprep.subr.msk.bf16.mxu0 %vm3627_vm11, %v3929_v14  ;;  %vm3647_vm11 = vmpackc.low %vm2400_vm2, %vm2398_vm1  ;;  %vm2118_vm2 = vcmp.eq.s32.totalorder %v4276_v17, %v4751_v49 }
  0xe0   : > { %3379 = vmatmul.mubr.msk.f32.gmra.mrb[22].mxu0 %vm410_vm4, %v4379_v26  ;;  %3644 = vmatprep.subr.msk.bf16.mxu1 %vm3643_vm13, %v3929_v14  ;;  %vm4835_vm13 = vmpackc.low %vm2116_vm6, %vm2114_vm5  ;;  %vm2401_vm6 = vcmp.eq.s32.totalorder %v4276_v17, %v4758_v50 }
  0xe1   : > { %3416 = vmatmul.mubr.msk.f32.gmra.mrb[22].mxu1 %vm410_vm4, %v4379_v26  ;;  %3630 = vmatpush1.bf16.msk.msra.mxu0 %vm3629_vm0, %v3929_v14  ;;  %vm3649_vm0 = vmpackc.low %vm2399_vm9, %vm2397_vm8 }
  0xe2   : > { %1656 = vmatprep.mubr.f32.mxu0 %v6856_v1  ;;  %3646 = vmatpush1.bf16.msk.msra.mxu1 %vm3645_vm3, %v3929_v14  ;;  %vm3635_vm1 = vmpackc.low %vm2121_vm12, %vm2119_vm10  ;;  %vm2120_vm3 = vcmp.eq.s32.totalorder %v4284_v18, %v4751_v49  ;;  %vm814_vm10 = vcmp.ge.s32.totalorder %v4910_v52, 1  ;;  %vm522_vm12 = vcmp.ge.s32.totalorder %v4918_v55, 0 }
  0xe3   : > { %1943 = vmatprep.mubr.f32.mxu1 %v6856_v1  ;;  %3632 = vmatprep.subr.msk.bf16.mxu0 %vm3631_vm7, %v3929_v14  ;;  %vm3651_vm5 = vmpackc.low %vm2404_vm15, %vm2402_vm14  ;;  %vm2403_vm7 = vcmp.eq.s32.totalorder %v4284_v18, %v4758_v50  ;;  %v852_v57 = vsel %vm814_vm10, 1, %v6858_v53  ;;  %v556_v59 = vsel %vm522_vm12, 1, %v6858_v53  ;;  %vm815_vm14 = vcmp.ge.s32.totalorder %v4918_v55, 1 }
  0xe4   : > { %3380 = vmatmul.mubr.msk.f32.gmra.mrb[24].mxu0 %vm410_vm4, %v4414_v28  ;;  %3648 = vmatprep.subr.msk.bf16.mxu1 %vm3647_vm11, %v3929_v14  ;;  %vm3637_vm8 = vmpackc.low %vm2120_vm3, %vm2118_vm2  ;;  %vm521_vm11 = vcmp.ge.s32.totalorder %v4910_v52, 0  ;;  %v854_v60 = vrot.slane %v852_v57, 1  ;;  %v558_v63 = vrot.slane %v556_v59, 1  ;;  %v853_v7 = vsel %vm815_vm14, 1, %v6858_v53 }
  0xe5   : > { %3417 = vmatmul.mubr.msk.f32.gmra.mrb[24].mxu1 %vm410_vm4, %v4414_v28  ;;  %1662 = vmatprep.mubr.f32.mxu0 %v6856_v1  ;;  %vm3653_vm9 = vmpackc.low %vm2403_vm7, %vm2401_vm6  ;;  %v555_v54 = vsel %vm521_vm11, 1, %v6858_v53  ;;  %v523_v8 = vsel %vm521_vm11, %v4927_v58, 0.0  ;;  %vm554_vm3 = vcmp.lt.s32.totalorder %v4918_v55, 0  ;;  %v855_v16 = vrot.slane %v853_v7, 1 }
  0xe6   : > { %3634 = vmatpush1.bf16.msk.msra.mxu0 %vm4835_vm13, %v3929_v14  ;;  %1949 = vmatprep.mubr.f32.mxu1 %v6856_v1  ;;  %v557_v56 = vrot.slane %v555_v54, 1  ;;  %vm856_vm2 = vcmp.ne.s32.totalorder %v854_v60, 0  ;;  %v4977_v17 = vrot.slane %v523_v8, %v4199_v3  ;;  %vm1102_vm7 = vcmp.ge.s32.totalorder %v4918_v55, 2 }
  0xe7   : > { %3650 = vmatpush1.bf16.msk.msra.mxu1 %vm3649_vm0, %v3929_v14  ;;  %3636 = vmatprep.subr.msk.bf16.mxu0 %vm3635_vm1, %v3929_v14  ;;  %vm1101_vm0 = vcmp.ge.s32.totalorder %v4910_v52, 2  ;;  %vm850_vm1 = vcmp.lt.s32.totalorder %v4910_v52, 1  ;;  %v820_v22 = vsel %vm814_vm10, %v4959_v11, 0.0  ;;  %vm857_vm11 = vcmp.ne.s32.totalorder %v855_v16, 0 }
  0xe8   : > { %3381 = vmatmul.mubr.msk.f32.gmra.mrb[26].mxu0 %vm410_vm4, %v4482_v33  ;;  %3652 = vmatprep.subr.msk.bf16.mxu1 %vm3651_vm5, %v3929_v14  ;;  %vm559_vm13 = vcmp.ne.s32.totalorder %v557_v56, 0  ;;  %vm560_vm5 = vcmp.ne.s32.totalorder %v558_v63, 0  ;;  %v1139_v13 = vsel %vm1101_vm0, 1, %v6858_v53  ;;  %vm4972_vm6 = vmand %vm850_vm1, %vm856_vm2  ;;  %v1140_v32 = vsel %vm1102_vm7, 1, %v6858_v53 }
  0xe9   : > { %3418 = vmatmul.mubr.msk.f32.gmra.mrb[26].mxu1 %vm410_vm4, %v4482_v33  ;;  %1668 = vmatprep.mubr.f32.mxu0 %v6856_v1  ;;  %v890_v29 = vsel %vm4972_vm6, %v4927_v58, 0.0  ;;  %vm1388_vm10 = vcmp.ge.s32.totalorder %v4910_v52, 3  ;;  %v920_v34 = vsel %vm4972_vm6, %v4934_v61, 0.0  ;;  %v524_v35 = vsel %vm522_vm12, %v4963_v12, 0.0 }
  0xea   : > { %3638 = vmatpush1.bf16.msk.msra.mxu0 %vm3637_vm8, %v3929_v14  ;;  %1955 = vmatprep.mubr.f32.mxu1 %v6856_v1  ;;  %vm4989_vm8 = vmand %vm554_vm3, %vm560_vm5  ;;  %v821_v40 = vsel %vm815_vm14, %v5009_v31, 0.0  ;;  %v1142_v44 = vrot.slane %v1140_v32, 1  ;;  %v1426_v45 = vsel %vm1388_vm10, 1, %v6858_v53  ;;  %v5049_v46 = vrot.slane %v890_v29, %v4202_v4 }
  0xeb   : > { %3654 = vmatpush1.bf16.msk.msra.mxu1 %vm3653_vm9, %v3929_v14  ;;  %vm851_vm9 = vcmp.lt.s32.totalorder %v4918_v55, 1  ;;  %v564_v36 = vsel %vm4989_vm8, %v4963_v12, 0.0  ;;  %v600_v37 = vsel %vm4989_vm8, %v4994_v24, 0.0  ;;  %v5052_v47 = vrot.slane %v920_v34, %v4287_v19 }
  0xec   : > { %3382 = vmatmul.mubr.msk.f32.gmra.mrb[28].mxu0 %vm410_vm4, %v4549_v38  ;;  %vm5041_vm12 = vmand %vm851_vm9, %vm857_vm11  ;;  %vm1389_vm14 = vcmp.ge.s32.totalorder %v4918_v55, 3  ;;  %v5059_v49 = vrot.slane %v524_v35, %v4199_v3  ;;  %v5062_v50 = vrot.slane %v564_v36, %v4199_v3  ;;  %v5065_v51 = vrot.slane %v600_v37, %v4202_v4 }
  0xed   : > { %3419 = vmatmul.mubr.msk.f32.gmra.mrb[28].mxu1 %vm410_vm4, %v4549_v38  ;;  %2218 = vmatprep.mubr.f32.mxu0 %v6856_v1  ;;  %v5077_v57 = vrot.slane %v821_v40, %v4199_v3  ;;  %v861_v59 = vsel %vm5041_vm12, %v5009_v31, 0.0  ;;  %v891_v60 = vsel %vm5041_vm12, %v4963_v12, 0.0  ;;  %v1428_v62 = vrot.slane %v1426_v45, 1 }
  0xee   : > { %2501 = vmatprep.mubr.f32.mxu1 %v6856_v1  ;;  %v921_v63 = vsel %vm5041_vm12, %v4994_v24, 0.0  ;;  %vm1138_vm1 = vcmp.lt.s32.totalorder %v4918_v55, 2  ;;  %vm1144_vm2 = vcmp.ne.s32.totalorder %v1142_v44, 0  ;;  %v1427_v7 = vsel %vm1389_vm14, 1, %v6858_v53 }
  0xef   : > { %v1107_v8 = vsel %vm1101_vm0, %v5055_v48, 0.0  ;;  %vm1675_vm3 = vcmp.ge.s32.totalorder %v4910_v52, 4  ;;  %vm5114_vm0 = vmand %vm1138_vm1, %vm1144_vm2  ;;  %vm1424_vm5 = vcmp.lt.s32.totalorder %v4910_v52, 3  ;;  %v1429_v23 = vrot.slane %v1427_v7, 1 }
  0xf0   : > { %3452 = vmatmul.mubr.msk.f32.vlgmr.msra.gmra.mrb[30].mxu0 %vm410_vm4, %v4354_v25  ;;  %v1713_v32 = vsel %vm1675_vm3, 1, %v6858_v53  ;;  %v5139_v36 = vrot.slane %v4927_v58, 3  ;;  %vm1962_vm9 = vcmp.ge.s32.totalorder %v4910_v52, 5  ;;  %v1178_v40 = vsel %vm5114_vm0, %v5009_v31, 0.0 }
  0xf1   : > { %3489 = vmatmul.mubr.msk.f32.vlgmr.msra.gmra.mrb[30].mxu1 %vm410_vm4, %v4354_v25  ;;  %2224 = vmatprep.mubr.f32.mxu0 %v6856_v1  ;;  %v4997_v25 = vrot.slane %v4963_v12, 6  ;;  %v1208_v45 = vsel %vm5114_vm0, %v4963_v12, 0.0  ;;  %v1715_v56 = vrot.slane %v1713_v32, 1  ;;  %vm1711_vm12 = vcmp.lt.s32.totalorder %v4910_v52, 4 }
  0xf2   : > { %2507 = vmatprep.mubr.f32.mxu1 %v6856_v1  ;;  %v1394_v7 = vsel %vm1388_vm10, %v5139_v36, 0.0  ;;  %vm1712_vm1 = vcmp.lt.s32.totalorder %v4918_v55, 4 }
  0xf4   : > { %3453 = vmatmul.mubr.msk.f32.gmra.mrb[32].mxu0 %vm410_vm4, %v4379_v26 }
  0xf5   : > { %3490 = vmatmul.mubr.msk.f32.gmra.mrb[32].mxu1 %vm410_vm4, %v4379_v26  ;;  %2230 = vmatprep.mubr.f32.mxu0 %v6856_v1  ;;  %v1141_v26 = vrot.slane %v1139_v13, 1  ;;  %v5103_v13 = vrot.slane %v861_v59, %v4199_v3 }
  0xf6   : > { %2513 = vmatprep.mubr.f32.mxu1 %v6856_v1 }
  0xf8   : > { %3454 = vmatmul.mubr.msk.f32.gmra.mrb[34].mxu0 %vm410_vm4, %v4414_v28 }
  0xf9   : > { %3491 = vmatmul.mubr.msk.f32.gmra.mrb[34].mxu1 %vm410_vm4, %v4414_v28  ;;  %2236 = vmatprep.mubr.f32.mxu0 %v6856_v1  ;;  %v860_v28 = vsel %vm4972_vm6, %v4959_v11, 0.0  ;;  %vm1430_vm6 = vcmp.ne.s32.totalorder %v1428_v62, 0  ;;  %v2000_v62 = vsel %vm1962_vm9, 1, %v6858_v53 }
  0xfa   : > { %2519 = vmatprep.mubr.f32.mxu1 %v6856_v1  ;;  %v5036_v39 = vrot.slane %v860_v28, %v4199_v3  ;;  %v5124_v28 = vrot.slane %v1107_v8, %v4199_v3  ;;  %vm5153_vm11 = vmand %vm1424_vm5, %vm1430_vm6 }
  0xfb   : > { %v1434_v8 = vsel %vm5153_vm11, %v5139_v36, 0.0 }
  0xfc   : > { %3455 = vmatmul.mubr.msk.f32.gmra.mrb[36].mxu0 %vm410_vm4, %v4482_v33  ;;  %v5209_v43 = vrot.slane %v1434_v8, %v4199_v3 }
  0xfd   : > { %3492 = vmatmul.mubr.msk.f32.gmra.mrb[36].mxu1 %vm410_vm4, %v4482_v33  ;;  %2242 = vmatprep.mubr.f32.mxu0 %v6856_v1  ;;  %v5017_v33 = vrot.slane %v820_v22, %v4199_v3  ;;  %v1464_v22 = vsel %vm5153_vm11, %v5055_v48, 0.0 }
  0xfe   : > { %2525 = vmatprep.mubr.f32.mxu1 %v6856_v1  ;;  %7042 = vst [vmem:[#allocation28_spill] sm:$0xff] %v5209_v43 }
 0x100   : > { %3456 = vmatmul.mubr.msk.f32.gmra.mrb[38].mxu0 %vm410_vm4, %v4549_v38 }
 0x101   : > { %3493 = vmatmul.mubr.msk.f32.gmra.mrb[38].mxu1 %vm410_vm4, %v4549_v38  ;;  %vm553_vm4 = vcmp.lt.s32.totalorder %v4910_v52, 0  ;;  %v634_v38 = vsel %vm4989_vm8, %v4997_v25, 0.0  ;;  %vm1676_vm8 = vcmp.ge.s32.totalorder %v4918_v55, 4 }
 0x102   : > { %vm4937_vm15 = vmand %vm553_vm4, %vm559_vm13  ;;  %vm1137_vm4 = vcmp.lt.s32.totalorder %v4910_v52, 2  ;;  %vm1143_vm13 = vcmp.ne.s32.totalorder %v1141_v26, 0  ;;  %v5068_v54 = vrot.slane %v634_v38, %v4287_v19  ;;  %v5121_v26 = vrot.slane %v921_v63, %v4287_v19 }
 0x103   : > { %v563_v9 = vsel %vm4937_vm15, %v4927_v58, 0.0  ;;  %v599_v10 = vsel %vm4937_vm15, %v4934_v61, 0.0  ;;  %v633_v14 = vsel %vm4937_vm15, %v4942_v6, 0.0  ;;  %vm5072_vm15 = vmand %vm1137_vm4, %vm1143_vm13  ;;  %v1714_v44 = vsel %vm1676_vm8, 1, %v6858_v53 }
 0x104   : > { %v4980_v18 = vrot.slane %v563_v9, %v4199_v3  ;;  %v4983_v21 = vrot.slane %v599_v10, %v4202_v4  ;;  %v5000_v27 = vrot.slane %v633_v14, %v4287_v19  ;;  %v1147_v9 = vsel %vm5072_vm15, %v5055_v48, 0.0 }
 0x105   : > { %v5099_v10 = vrot.slane %v4963_v12, 2  ;;  %v5106_v14 = vrot.slane %v891_v60, %v4202_v4  ;;  %v1177_v15 = vsel %vm5072_vm15, %v4959_v11, 0.0  ;;  %v1207_v16 = vsel %vm5072_vm15, %v4927_v58, 0.0 }
 0x106   : > { %v5127_v29 = vrot.slane %v1147_v9, %v4199_v3  ;;  %v5133_v34 = vrot.slane %v1177_v15, %v4202_v4  ;;  %v5143_v37 = vrot.slane %v1207_v16, %v4287_v19  ;;  %vm1431_vm4 = vcmp.ne.s32.totalorder %v1429_v23, 0 }
 0x107   : > { %v1108_v35 = vsel %vm1102_vm7, %v5099_v10, 0.0  ;;  %v1148_v38 = vsel %vm5114_vm0, %v5099_v10, 0.0  ;;  %vm1425_vm7 = vcmp.lt.s32.totalorder %v4918_v55, 3  ;;  %v5168_v60 = vrot.slane %v4963_v12, 3 }
 0x108   : > { %v5165_v59 = vrot.slane %v1108_v35, %v4199_v3  ;;  %vm1963_vm13 = vcmp.ge.s32.totalorder %v4918_v55, 5  ;;  %v5175_v63 = vrot.slane %v1148_v38, %v4199_v3  ;;  %v1716_v9 = vrot.slane %v1714_v44, 1  ;;  %vm5197_vm10 = vmand %vm1425_vm7, %vm1431_vm4 }
 0x109   : > { %v5184_v15 = vrot.slane %v1178_v40, %v4202_v4  ;;  %v5187_v16 = vrot.slane %v1208_v45, %v4287_v19  ;;  %v1494_v23 = vsel %vm5153_vm11, %v4959_v11, 0.0  ;;  %vm1717_vm15 = vcmp.ne.s32.totalorder %v1715_v56, 0 }
 0x10a   : > { %v2002_v35 = vrot.slane %v2000_v62, 1  ;;  %v2001_v38 = vsel %vm1963_vm13, 1, %v6858_v53  ;;  %v5206_v40 = vrot.slane %v1394_v7, %v4199_v3  ;;  %v1395_v11 = vsel %vm1389_vm14, %v5168_v60, 0.0  ;;  %vm5230_vm14 = vmand %vm1711_vm12, %vm1717_vm15 }
 0x10b   : > { %v5215_v44 = vrot.slane %v4927_v58, 4  ;;  %v1435_v45 = vsel %vm5197_vm10, %v5168_v60, 0.0  ;;  %v1465_v56 = vsel %vm5197_vm10, %v5099_v10, 0.0  ;;  %vm1718_vm2 = vcmp.ne.s32.totalorder %v1716_v9, 0 }
 0x10c   : > { %7041 = vst [vmem:[#allocation27_spill] sm:$0xff] %v5206_v40  ;;  %v5225_v62 = vrot.slane %v1464_v22, %v4202_v4  ;;  %v5228_v7 = vrot.slane %v1494_v23, %v4287_v19  ;;  %v2003_v1 = vrot.slane %v2001_v38, 1  ;;  %v1495_v53 = vsel %vm5197_vm10, %v5009_v31, 0.0  ;;  %vm5258_vm6 = vmand %vm1712_vm1, %vm1718_vm2 }
 0x10d   : > { %v5241_v9 = vrot.slane %v4927_v58, 5  ;;  %vm1998_vm0 = vcmp.lt.s32.totalorder %v4910_v52, 5  ;;  %vm2004_vm5 = vcmp.ne.s32.totalorder %v2002_v35, 0  ;;  %v5245_v22 = vrot.slane %v1395_v11, %v4199_v3 }
 0x10e   : > { %7043 = vst [vmem:[#allocation29_spill] sm:$0xff] %v5225_v62  ;;  %7044 = vst [vmem:[#allocation30_spill] sm:$0xff] %v5228_v7  ;;  %v5248_v23 = vrot.slane %v1435_v45, %v4199_v3  ;;  %v5251_v20 = vrot.slane %v1465_v56, %v4202_v4  ;;  %v1681_v32 = vsel %vm1675_vm3, %v5215_v44, 0.0  ;;  %v1721_v31 = vsel %vm5230_vm14, %v5215_v44, 0.0 }
 0x10f   : > { %7047 = vst [vmem:[#allocation31_spill] sm:$0xff] %v5245_v22  ;;  %v1751_v35 = vsel %vm5230_vm14, %v5139_v36, 0.0  ;;  %v1781_v38 = vsel %vm5230_vm14, %v5055_v48, 0.0  ;;  %v5272_v11 = vrot.slane %v4963_v12, 5  ;;  %v5275_v45 = vrot.slane %v1495_v53, %v4287_v19  ;;  %vm5280_vm3 = vmand %vm1998_vm0, %vm2004_vm5 }
 0x110   : > { %7048 = vst [vmem:[#allocation32_spill] sm:$0xff] %v5248_v23  ;;  %7049 = vst [vmem:[#allocation33_spill] sm:$0xff] %v5251_v20  ;;  %v1682_v56 = vsel %vm1676_vm8, %v5235_v0, 0.0  ;;  %vm1999_vm11 = vcmp.lt.s32.totalorder %v4918_v55, 5  ;;  %vm2005_vm7 = vcmp.ne.s32.totalorder %v2003_v1, 0  ;;  %v1722_v48 = vsel %vm5258_vm6, %v5235_v0, 0.0 }
 0x111   : > { %7052 = vst [vmem:[#allocation34_spill] sm:$0xff] %v5275_v45  ;;  %v1752_v53 = vsel %vm5258_vm6, %v5168_v60, 0.0  ;;  %v1782_v12 = vsel %vm5258_vm6, %v5099_v10, 0.0  ;;  %v1968_v8 = vsel %vm1962_vm9, %v5241_v9, 0.0  ;;  %v5298_v45 = vrot.slane %v1681_v32, %v4199_v3  ;;  %vm5321_vm8 = vmand %vm1999_vm11, %vm2005_vm7 }
 0x112   : > { %v5301_v1 = vrot.slane %v1721_v31, %v4199_v3  ;;  %v5304_v20 = vrot.slane %v1751_v35, %v4202_v4  ;;  %v5307_v23 = vrot.slane %v1781_v38, %v4287_v19  ;;  %v5310_v22 = vrot.slane %v1682_v56, %v4199_v3 }
 0x113   : > { %7055 = vst [vmem:[#allocation35_spill] sm:$0xff] %v5298_v45  ;;  %v2008_v10 = vsel %vm5280_vm3, %v5241_v9, 0.0  ;;  %v2038_v32 = vsel %vm5280_vm3, %v5215_v44, 0.0  ;;  %v1969_v58 = vsel %vm1963_vm13, %v5272_v11, 0.0  ;;  %v5326_v35 = vrot.slane %v1722_v48, %v4199_v3 }
 0x114   : > { %7056 = vst [vmem:[#allocation36_spill] sm:$0xff] %v5301_v1  ;;  %7057 = vst [vmem:[#allocation37_spill] sm:$0xff] %v5304_v20  ;;  %v5329_v38 = vrot.slane %v1752_v53, %v4202_v4  ;;  %v5332_v56 = vrot.slane %v1782_v12, %v4287_v19  ;;  %v2664_v20 = vmul.u32 4, %v4910_v52  ;;  %v2666_v1 = vrot.slane %v4910_v52, 7 }
 0x115   : > { %7058 = vst [vmem:[#allocation38_spill] sm:$0xff] %v5307_v23  ;;  %7059 = vst [vmem:[#allocation39_spill] sm:$0xff] %v5310_v22  ;;  %v5335_v22 = vrot.slane %v1968_v8, %v4199_v3  ;;  %v2068_v23 = vsel %vm5280_vm3, %v5139_v36, 0.0  ;;  %v2694_v48 = vrot.slane %v4910_v52, 6  ;;  %v5347_v53 = vrot.slane %v2038_v32, %v4202_v4 }
 0x116   : > { %7062 = vst [vmem:[#allocation40_spill] sm:$0xff] %v5326_v35  ;;  %7063 = vst [vmem:[#allocation41_spill] sm:$0xff] %v5329_v38  ;;  %v5344_v35 = vrot.slane %v2008_v10, %v4199_v3  ;;  %v5350_v12 = vrot.slane %v1969_v58, %v4199_v3  ;;  %v2009_v5 = vsel %vm5321_vm8, %v5272_v11, 0.0  ;;  %v2039_v36 = vsel %vm5321_vm8, %v5235_v0, 0.0 }
 0x117   : > { %7064 = vst [vmem:[#allocation42_spill] sm:$0xff] %v5332_v56  ;;  %7065 = vst [vmem:[#allocation43_spill] sm:$0xff] %v5335_v22  ;;  %v2069_v8 = vsel %vm5321_vm8, %v5168_v60, 0.0  ;;  %vm2249_vm9 = vcmp.ge.s32.totalorder %v4910_v52, 6  ;;  %v2668_v10 = vadd.s32 %v2666_v1, %v2664_v20  ;;  %v5363_v32 = vrot.slane %v2068_v23, %v4287_v19 }
 0x118   : > { %7066 = vst [vmem:[#allocation44_spill] sm:$0xff] %v5344_v35  ;;  %7067 = vst [vmem:[#allocation45_spill] sm:$0xff] %v5347_v53  ;;  %v7070_v58 = vmov 0   ;;  %vm2250_vm4 = vcmp.ge.s32.totalorder %v4918_v55, 6  ;;  %v2696_v53 = vadd.s32 %v2694_v48, %v2664_v20  ;;  %vm2532_vm13 = vcmp.ge.s32.totalorder %v4910_v52, 7 }
 0x119   : > { %7068 = vst [vmem:[#allocation46_spill] sm:$0xff] %v5350_v12  ;;  %7069 = vst [vmem:[#allocation47_spill] sm:$0xff] %v5363_v32  ;;  %v2283_v12 = vsel %vm2249_vm9, 1, %v7070_v58  ;;  %v2284_v22 = vsel %vm2250_vm4, 1, %v7070_v58  ;;  %v5374_v60 = vrot.slane %v2668_v10, %v4431_v30  ;;  %v5377_v23 = vrot.slane %v2009_v5, %v4199_v3 }
 0x11a   : > { %v2285_v35 = vrot.slane %v2283_v12, 1  ;;  %v5380_v1 = vrot.slane %v2039_v36, %v4202_v4  ;;  %v5383_v31 = vrot.slane %v2069_v8, %v4287_v19  ;;  %v2286_v48 = vrot.slane %v2284_v22, 1 }
 0x11b   : > { %7071 = vst [vmem:[#allocation48_spill] sm:$0xff] %v5374_v60  ;;  %7072 = vst [vmem:[#allocation49_spill] sm:$0xff] %v5377_v23  ;;  %vm2281_vm10 = vcmp.lt.s32.totalorder %v4910_v52, 6  ;;  %v2566_v12 = vsel %vm2532_vm13, 1, %v7070_v58  ;;  %vm2678_vm15 = vcmp.eq.s32.totalorder %v4196_v2, %v5374_v60  ;;  %vm2282_vm2 = vcmp.lt.s32.totalorder %v4918_v55, 6 }
 0x11c   : > { %7073 = vst [vmem:[#allocation50_spill] sm:$0xff] %v5380_v1  ;;  %7074 = vst [vmem:[#allocation51_spill] sm:$0xff] %v5383_v31  ;;  %vm2287_vm12 = vcmp.ne.s32.totalorder %v2285_v35, 0  ;;  %vm2288_vm14 = vcmp.ne.s32.totalorder %v2286_v48, 0  ;;  %v5397_v36 = vmul.u32 4, %v4918_v55  ;;  %v2667_v22 = vrot.slane %v4918_v55, 7 }
 0x11d   : > { %vm5391_vm1 = vmand %vm2281_vm10, %vm2287_vm12  ;;  %v2251_v35 = vsel %vm2249_vm9, %v4942_v6, 0.0  ;;  %v2568_v31 = vrot.slane %v2566_v12, 1  ;;  %v5411_v48 = vrot.slane %v2696_v53, %v4615_v41  ;;  %v7080_v1 = vmov 0.0  }
 0x11e   : > { %v2291_v8 = vsel %vm5391_vm1, %v4942_v6, 0.0  ;;  %vm5406_vm0 = vmand %vm2282_vm2, %vm2288_vm14  ;;  %v3494_v23 = vsel %vm2678_vm15, 1.0, %v7080_v1  ;;  %v2746_v32 = vrot.slane %v4910_v52, 5  ;;  %vm2533_vm5 = vcmp.ge.s32.totalorder %v4918_v55, 7 }
 0x11f   : > { %7079 = vst [vmem:[#allocation52_spill] sm:$0xff] %v5411_v48  ;;  %v2695_v56 = vrot.slane %v4918_v55, 6  ;;  %v5418_v38 = vrot.slane %v2251_v35, %v4199_v3  ;;  %v5421_v45 = vrot.slane %v2291_v8, %v4199_v3  ;;  %v2321_v12 = vsel %vm5391_vm1, %v5241_v9, 0.0 }
 0x120   : > { %v2351_v7 = vsel %vm5391_vm1, %v5215_v44, 0.0  ;;  %v2252_v62 = vsel %vm2250_vm4, %v4997_v25, 0.0  ;;  %v2292_v35 = vsel %vm5406_vm0, %v4997_v25, 0.0  ;;  %v2322_v8 = vsel %vm5406_vm0, %v5272_v11, 0.0 }
 0x121   : > { %7081 = vst [vmem:[#allocation53_spill] sm:$0xff] %v5418_v38  ;;  %7082 = vst [vmem:[#allocation54_spill] sm:$0xff] %v5421_v45  ;;  %v2352_v45 = vsel %vm5406_vm0, %v5235_v0, 0.0  ;;  %v2534_v44 = vsel %vm2532_vm13, %v4934_v61, 0.0  ;;  %vm2564_vm6 = vcmp.lt.s32.totalorder %v4910_v52, 7  ;;  %vm2570_vm3 = vcmp.ne.s32.totalorder %v2568_v31, 0 }
 0x122   : > { %vm2706_vm11 = vcmp.eq.s32.totalorder %v4196_v2, %v5411_v48  ;;  %v5448_v5 = vrot.slane %v2321_v12, %v4202_v4  ;;  %v5452_v43 = vrot.slane %v2668_v10, %v4615_v41  ;;  %v2748_v60 = vadd.s32 %v2746_v32, %v2664_v20  ;;  %vm5463_vm7 = vmand %vm2564_vm6, %vm2570_vm3 }
 0x123   : > { %v3498_v38 = vsel %vm2706_vm11, 1.0, %v7080_v1  ;;  %v5455_v0 = vrot.slane %v2351_v7, %v4287_v19  ;;  %v5458_v40 = vrot.slane %v2252_v62, %v4199_v3  ;;  %v5461_v52 = vrot.slane %v2292_v35, %v4199_v3 }
 0x124   : > { %7083 = vst [vmem:[#allocation55_spill] sm:$0xff] %v5448_v5  ;;  %7084 = vst [vmem:[#allocation56_spill] sm:$0xff] %v5452_v43  ;;  %v2718_v12 = vadd.f32 %v3498_v38, %v3494_v23  ;;  %v5468_v48 = vrot.slane %v2322_v8, %v4202_v4  ;;  %v5471_v5 = vrot.slane %v2352_v45, %v4287_v19  ;;  %v2574_v45 = vsel %vm5463_vm7, %v4934_v61, 0.0 }
 0x125   : > { %7085 = vst [vmem:[#allocation57_spill] sm:$0xff] %v5455_v0  ;;  %7086 = vst [vmem:[#allocation58_spill] sm:$0xff] %v5458_v40  ;;  %v5474_v20 = vrot.slane %v2534_v44, %v4199_v3  ;;  %vm2730_vm8 = vcmp.eq.s32.totalorder %v4196_v2, %v5452_v43  ;;  %v5480_v7 = vrot.slane %v2748_v60, %v4624_v42  ;;  %v2604_v23 = vsel %vm5463_vm7, %v4942_v6, 0.0 }
 0x126   : > { %7087 = vst [vmem:[#allocation59_spill] sm:$0xff] %v5461_v52  ;;  %7090 = vst [vmem:[#allocation60_spill] sm:$0xff] %v5468_v48  ;;  %v3502_v62 = vsel %vm2730_vm8, 1.0, %v7080_v1  ;;  %v5483_v32 = vrot.slane %v2696_v53, %v4624_v42  ;;  %v5486_v38 = vrot.slane %v2668_v10, %v4624_v42  ;;  %v2567_v8 = vsel %vm2533_vm5, 1, %v7070_v58 }
 0x127   : > { %7091 = vst [vmem:[#allocation61_spill] sm:$0xff] %v5471_v5  ;;  %7092 = vst [vmem:[#allocation62_spill] sm:$0xff] %v5474_v20  ;;  %v2742_v35 = vadd.f32 %v3502_v62, %v2718_v12  ;;  %v2634_v53 = vsel %vm5463_vm7, %v5241_v9, 0.0  ;;  %vm2758_vm9 = vcmp.eq.s32.totalorder %v4196_v2, %v5480_v7  ;;  %vm2565_vm10 = vcmp.lt.s32.totalorder %v4918_v55, 7 }
 0x128   : > { %7093 = vst [vmem:[#allocation63_spill] sm:$0xff] %v5480_v7  ;;  %7094 = vst [vmem:[#allocation64_spill] sm:$0xff] %v5483_v32  ;;  %vm2782_vm4 = vcmp.eq.s32.totalorder %v4196_v2, %v5483_v32  ;;  %vm2806_vm13 = vcmp.eq.s32.totalorder %v4196_v2, %v5486_v38  ;;  %v3506_v61 = vsel %vm2758_vm9, 1.0, %v7080_v1  ;;  %v2569_v10 = vrot.slane %v2567_v8, 1 }
 0x129   : > { %7095 = vst [vmem:[#allocation65_spill] sm:$0xff] %v5486_v38  ;;  %v3510_v6 = vsel %vm2782_vm4, 1.0, %v7080_v1  ;;  %v2770_v58 = vadd.f32 %v3506_v61, %v2742_v35  ;;  %v2669_v44 = vadd.s32 %v2667_v22, %v5397_v36  ;;  %v2697_v9 = vadd.s32 %v2695_v56, %v5397_v36 }
 0x12a   : > { %v2747_v60 = vrot.slane %v4918_v55, 5  ;;  %v5513_v31 = vrot.slane %v2574_v45, %v4199_v3  ;;  %v3514_v12 = vsel %vm2806_vm13, 1.0, %v7080_v1  ;;  %v2535_v62 = vsel %vm2533_vm5, %v4994_v24, 0.0 }
 0x12b   : > { %vm2571_vm12 = vcmp.ne.s32.totalorder %v2569_v10, 0  ;;  %v2794_v38 = vadd.f32 %v3510_v6, %v2770_v58  ;;  %v5524_v22 = vrot.slane %v2669_v44, %v4431_v30  ;;  %v5527_v56 = vrot.slane %v2697_v9, %v4615_v41 }
 0x12c   : > { %7096 = vst [vmem:[#allocation66_spill] sm:$0xff] %v5513_v31  ;;  %vm5519_vm15 = vmand %vm2565_vm10, %vm2571_vm12  ;;  %v5530_v45 = vrot.slane %v2669_v44, %v4615_v41  ;;  %v5533_v35 = vrot.slane %v2604_v23, %v4202_v4  ;;  %v2749_v6 = vadd.s32 %v2747_v60, %v5397_v36  ;;  %v5543_v10 = vrot.slane %v2634_v53, %v4287_v19 }
 0x12d   : > { %7099 = vst [vmem:[#allocation67_spill] sm:$0xff] %v5524_v22  ;;  %7100 = vst [vmem:[#allocation68_spill] sm:$0xff] %v5527_v56  ;;  %v2575_v55 = vsel %vm5519_vm15, %v4994_v24, 0.0  ;;  %v2605_v61 = vsel %vm5519_vm15, %v4997_v25, 0.0  ;;  %v5545_v58 = vadd.f32 %v3514_v12, %v2794_v38  ;;  %v5548_v41 = vrot.slane %v2535_v62, %v4199_v3 }
 0x12e   : > { %7101 = vst [vmem:[#allocation69_spill] sm:$0xff] %v5530_v45  ;;  %7102 = vst [vmem:[#allocation70_spill] sm:$0xff] %v5533_v35  ;;  %v2635_v23 = vsel %vm5519_vm15, %v5272_v11, 0.0  ;;  %vm2679_vm1 = vcmp.eq.s32.totalorder %v4196_v2, %v5524_v22  ;;  %vm2707_vm2 = vcmp.eq.s32.totalorder %v4196_v2, %v5527_v56  ;;  %vm2731_vm14 = vcmp.eq.s32.totalorder %v4196_v2, %v5530_v45 }
 0x12f   : > { %7103 = vst [vmem:[#allocation71_spill] sm:$0xff] %v5543_v10  ;;  %7104 = vst [vmem:[#allocation72_spill] sm:$0xff] %v5545_v58  ;;  %v5560_v24 = vrot.slane %v2749_v6, %v4624_v42  ;;  %v5563_v25 = vrot.slane %v2575_v55, %v4199_v3  ;;  %v5566_v36 = vrot.slane %v2605_v61, %v4202_v4  ;;  %v3495_v11 = vsel %vm2679_vm1, 1.0, %v7080_v1 }
 0x130   : > { %7105 = vst [vmem:[#allocation73_spill] sm:$0xff] %v5548_v41  ;;  %v3499_v38 = vsel %vm2707_vm2, 1.0, %v7080_v1  ;;  %v5573_v60 = vrot.slane %v2635_v23, %v4287_v19  ;;  %v5576_v12 = vsel %vm2731_vm14, 1.0, %v7080_v1  ;;  %v5586_v61 = vrot.slane %v2697_v9, %v4624_v42 }
 0x131   : > { %7106 = vst [vmem:[#allocation74_spill] sm:$0xff] %v5560_v24  ;;  %7107 = vst [vmem:[#allocation75_spill] sm:$0xff] %v5563_v25  ;;  %vm2759_vm0 = vcmp.eq.s32.totalorder %v4196_v2, %v5560_v24  ;;  %v5580_v8 = vadd.f32 %v3499_v38, %v3495_v11  ;;  %v5589_v6 = vrot.slane %v2669_v44, %v4624_v42 }
 0x132   : > { %7108 = vst [vmem:[#allocation76_spill] sm:$0xff] %v5566_v36  ;;  %7109 = vst [vmem:[#allocation77_spill] sm:$0xff] %v5573_v60  ;;  %v5583_v55 = vsel %vm2759_vm0, 1.0, %v7080_v1 }
 0x133   : > { %7110 = vst [vmem:[#allocation78_spill] sm:$0xff] %v5576_v12  ;;  %7111 = vst [vmem:[#allocation79_spill] sm:$0xff] %v5580_v8 }
 0x134   : > { %7112 = vst [vmem:[#allocation80_spill] sm:$0xff] %v5583_v55  ;;  %7113 = vst [vmem:[#allocation81_spill] sm:$0xff] %v5586_v61 }
 0x135   : > { %7114 = vst [vmem:[#allocation82_spill] sm:$0xff] %v5589_v6 }
 0x187   : > { %v492_v62 = vpop.f32.mrb[0].mxu0 }
 0x188   : > { %v533_v23 = vmul.f32 %v4977_v17, %v492_v62  ;;  %v573_v53 = vmul.f32 %v4980_v18, %v492_v62  ;;  %v609_v19 = vmul.f32 %v4983_v21, %v492_v62  ;;  %v643_v24 = vmul.f32 %v5000_v27, %v492_v62  ;;  %v785_v45 = vpop.f32.mrb[0].mxu1  ;;  %v494_v11 = vpop.f32.mrb[1].mxu0 }
 0x189   : > { %v830_v38 = vmul.f32 %v5017_v33, %v785_v45  ;;  %v870_v56 = vmul.f32 %v5036_v39, %v785_v45  ;;  %v900_v9 = vmul.f32 %v5049_v46, %v785_v45  ;;  %v930_v22 = vmul.f32 %v5052_v47, %v785_v45  ;;  %v787_v44 = vpop.f32.mrb[1].mxu1 }
 0x18a   : > { %v534_v42 = vmul.f32 %v5059_v49, %v494_v11  ;;  %v574_v32 = vmul.f32 %v5062_v50, %v494_v11  ;;  %v610_v7 = vmul.f32 %v5065_v51, %v494_v11  ;;  %v644_v43 = vmul.f32 %v5068_v54, %v494_v11 }
 0x18b   : > { %v5603_v62 = vadd.f32 %v830_v38, %v533_v23  ;;  %v5605_v4 = vadd.f32 %v870_v56, %v573_v53  ;;  %v5607_v30 = vadd.f32 %v900_v9, %v609_v19  ;;  %v5609_v3 = vadd.f32 %v930_v22, %v643_v24  ;;  %v498_v55 = vpop.f32.mrb[2].mxu0 }
 0x18c   : > { %v831_v45 = vmul.f32 %v5077_v57, %v787_v44  ;;  %v871_v1 = vmul.f32 %v5103_v13, %v787_v44  ;;  %v901_v6 = vmul.f32 %v5106_v14, %v787_v44  ;;  %v931_v2 = vmul.f32 %v5121_v26, %v787_v44  ;;  %v791_v61 = vpop.f32.mrb[2].mxu1  ;;  %v500_v12 = vpop.f32.mrb[3].mxu0 }
 0x18d   : > { %v535_v23 = vmul.f32 %v4977_v17, %v498_v55  ;;  %v575_v56 = vmul.f32 %v4980_v18, %v498_v55  ;;  %v611_v19 = vmul.f32 %v4983_v21, %v498_v55  ;;  %v645_v22 = vmul.f32 %v5000_v27, %v498_v55  ;;  %v793_v24 = vpop.f32.mrb[3].mxu1 }
 0x18e   : > { %v5619_v53 = vadd.f32 %v831_v45, %v534_v42  ;;  %v5621_v11 = vadd.f32 %v871_v1, %v574_v32  ;;  %v5623_v38 = vadd.f32 %v901_v6, %v610_v7  ;;  %v5625_v9 = vadd.f32 %v931_v2, %v644_v43 }
 0x18f   : > { %v832_v44 = vmul.f32 %v5017_v33, %v791_v61  ;;  %v872_v8 = vmul.f32 %v5036_v39, %v791_v61  ;;  %v902_v60 = vmul.f32 %v5049_v46, %v791_v61  ;;  %v932_v36 = vmul.f32 %v5052_v47, %v791_v61  ;;  %v504_v25 = vpop.f32.mrb[4].mxu0 }
 0x190   : > { %v536_v55 = vmul.f32 %v5059_v49, %v500_v12  ;;  %v576_v42 = vmul.f32 %v5062_v50, %v500_v12  ;;  %v612_v1 = vmul.f32 %v5065_v51, %v500_v12  ;;  %v646_v7 = vmul.f32 %v5068_v54, %v500_v12  ;;  %v797_v32 = vpop.f32.mrb[4].mxu1  ;;  %v506_v2 = vpop.f32.mrb[5].mxu0 }
 0x191   : > { %v5635_v43 = vadd.f32 %v832_v44, %v535_v23  ;;  %v5637_v6 = vadd.f32 %v872_v8, %v575_v56  ;;  %v5639_v45 = vadd.f32 %v902_v60, %v611_v19  ;;  %v5641_v41 = vadd.f32 %v932_v36, %v645_v22  ;;  %v799_v61 = vpop.f32.mrb[5].mxu1 }
 0x192   : > { %v833_v10 = vmul.f32 %v5077_v57, %v793_v24  ;;  %v873_v35 = vmul.f32 %v5103_v13, %v793_v24  ;;  %v903_v31 = vmul.f32 %v5106_v14, %v793_v24  ;;  %v933_v20 = vmul.f32 %v5121_v26, %v793_v24 }
 0x193   : > { %7115 = vst [vmem:[#allocation83_spill] sm:$0xff] %v5639_v45  ;;  %7116 = vst [vmem:[#allocation84_spill] sm:$0xff] %v5641_v41  ;;  %v537_v12 = vmul.f32 %v4977_v17, %v504_v25  ;;  %v577_v23 = vmul.f32 %v4980_v18, %v504_v25  ;;  %v613_v8 = vmul.f32 %v4983_v21, %v504_v25  ;;  %v510_v56 = vpop.f32.mrb[6].mxu0 }
 0x194   : > { %v647_v60 = vmul.f32 %v5000_v27, %v504_v25  ;;  %v5651_v36 = vadd.f32 %v833_v10, %v536_v55  ;;  %v5653_v19 = vadd.f32 %v873_v35, %v576_v42  ;;  %v5655_v22 = vadd.f32 %v903_v31, %v612_v1  ;;  %v803_v5 = vpop.f32.mrb[6].mxu1  ;;  %v512_v48 = vpop.f32.mrb[7].mxu0 }
 0x195   : > { %v5657_v44 = vadd.f32 %v933_v20, %v646_v7  ;;  %v834_v24 = vmul.f32 %v5017_v33, %v797_v32  ;;  %v874_v52 = vmul.f32 %v5036_v39, %v797_v32  ;;  %v904_v40 = vmul.f32 %v5049_v46, %v797_v32  ;;  %v805_v25 = vpop.f32.mrb[7].mxu1 }
 0x196   : > { %7117 = vst [vmem:[#allocation85_spill] sm:$0xff] %v5651_v36  ;;  %7118 = vst [vmem:[#allocation86_spill] sm:$0xff] %v5653_v19  ;;  %v934_v0 = vmul.f32 %v5052_v47, %v797_v32  ;;  %v538_v10 = vmul.f32 %v5059_v49, %v506_v2  ;;  %v578_v35 = vmul.f32 %v5062_v50, %v506_v2 }
 0x197   : > { %7119 = vst [vmem:[#allocation87_spill] sm:$0xff] %v5655_v22  ;;  %7120 = vst [vmem:[#allocation88_spill] sm:$0xff] %v5657_v44  ;;  %v614_v31 = vmul.f32 %v5065_v51, %v506_v2  ;;  %v648_v20 = vmul.f32 %v5068_v54, %v506_v2  ;;  %v5667_v55 = vadd.f32 %v834_v24, %v537_v12  ;;  %v516_v58 = vpop.f32.mrb[8].mxu0 }
 0x198   : > { %v5669_v42 = vadd.f32 %v874_v52, %v577_v23  ;;  %v5671_v1 = vadd.f32 %v904_v40, %v613_v8  ;;  %v5673_v7 = vadd.f32 %v934_v0, %v647_v60  ;;  %v835_v32 = vmul.f32 %v5077_v57, %v799_v61  ;;  %v809_v36 = vpop.f32.mrb[8].mxu1  ;;  %v518_v41 = vpop.f32.mrb[9].mxu0 }
 0x199   : > { %7121 = vst [vmem:[#allocation89_spill] sm:$0xff] %v5667_v55  ;;  %v875_v44 = vmul.f32 %v5103_v13, %v799_v61  ;;  %v905_v22 = vmul.f32 %v5106_v14, %v799_v61  ;;  %v935_v19 = vmul.f32 %v5121_v26, %v799_v61  ;;  %v539_v2 = vmul.f32 %v4977_v17, %v510_v56  ;;  %v811_v12 = vpop.f32.mrb[9].mxu1 }
 0x19a   : > { %7122 = vst [vmem:[#allocation90_spill] sm:$0xff] %v5669_v42  ;;  %7123 = vst [vmem:[#allocation91_spill] sm:$0xff] %v5671_v1  ;;  %v579_v52 = vmul.f32 %v4980_v18, %v510_v56  ;;  %v615_v40 = vmul.f32 %v4983_v21, %v510_v56  ;;  %v649_v0 = vmul.f32 %v5000_v27, %v510_v56 }
 0x19b   : > { %7124 = vst [vmem:[#allocation92_spill] sm:$0xff] %v5673_v7  ;;  %v5683_v23 = vadd.f32 %v835_v32, %v538_v10  ;;  %v5685_v8 = vadd.f32 %v875_v44, %v578_v35  ;;  %v5687_v60 = vadd.f32 %v905_v22, %v614_v31  ;;  %v5689_v24 = vadd.f32 %v935_v19, %v648_v20  ;;  %v1072_v55 = vpop.f32.mrb[10].mxu0 }
 0x19c   : > { %v836_v61 = vmul.f32 %v5017_v33, %v803_v5  ;;  %v876_v7 = vmul.f32 %v5036_v39, %v803_v5  ;;  %v906_v1 = vmul.f32 %v5049_v46, %v803_v5  ;;  %v936_v42 = vmul.f32 %v5052_v47, %v803_v5  ;;  %v1074_v35 = vpop.f32.mrb[11].mxu0  ;;  %v5699_v19 = vpop.f32.mrb[10].mxu1 }
 0x19d   : > { %7125 = vst [vmem:[#allocation93_spill] sm:$0xff] %v5683_v23  ;;  %7126 = vst [vmem:[#allocation94_spill] sm:$0xff] %v5685_v8  ;;  %v540_v56 = vmul.f32 %v5059_v49, %v512_v48  ;;  %v580_v10 = vmul.f32 %v5062_v50, %v512_v48  ;;  %v616_v44 = vmul.f32 %v5065_v51, %v512_v48  ;;  %v5709_v5 = vpop.f32.mrb[11].mxu1 }
 0x19e   : > { %7127 = vst [vmem:[#allocation95_spill] sm:$0xff] %v5687_v60  ;;  %7128 = vst [vmem:[#allocation96_spill] sm:$0xff] %v5689_v24  ;;  %v650_v22 = vmul.f32 %v5068_v54, %v512_v48  ;;  %v5701_v31 = vadd.f32 %v836_v61, %v539_v2  ;;  %v5703_v20 = vadd.f32 %v876_v7, %v579_v52 }
 0x19f   : > { %v5705_v32 = vadd.f32 %v906_v1, %v615_v40  ;;  %v5707_v24 = vadd.f32 %v936_v42, %v649_v0  ;;  %v837_v60 = vmul.f32 %v5077_v57, %v805_v25  ;;  %v877_v8 = vmul.f32 %v5103_v13, %v805_v25  ;;  %v5719_v42 = vpop.f32.mrb[12].mxu0 }
 0x1a0   : > { %v907_v23 = vmul.f32 %v5106_v14, %v805_v25  ;;  %v937_v48 = vmul.f32 %v5121_v26, %v805_v25  ;;  %v541_v45 = vmul.f32 %v4977_v17, %v516_v58  ;;  %v581_v2 = vmul.f32 %v4980_v18, %v516_v58  ;;  %v5731_v25 = vpop.f32.mrb[12].mxu1 }
 0x1a1   : > { %7129 = vst [vmem:[#allocation97_spill] sm:$0xff] %v5707_v24  ;;  %v617_v7 = vmul.f32 %v4983_v21, %v516_v58  ;;  %v651_v1 = vmul.f32 %v5000_v27, %v516_v58  ;;  %v5721_v52 = vadd.f32 %v837_v60, %v540_v56  ;;  %v5723_v40 = vadd.f32 %v877_v8, %v580_v10  ;;  %v5729_v24 = vpop.f32.mrb[13].mxu0  ;;  %v5737_v58 = vpop.f32.mrb[13].mxu1 }
 0x1a2   : > { %v5725_v0 = vadd.f32 %v907_v23, %v616_v44  ;;  %v5727_v61 = vadd.f32 %v937_v48, %v650_v22  ;;  %v838_v17 = vmul.f32 %v5017_v33, %v809_v36  ;;  %v878_v18 = vmul.f32 %v5036_v39, %v809_v36 }
 0x1a3   : > { %v908_v21 = vmul.f32 %v5049_v46, %v809_v36  ;;  %v938_v27 = vmul.f32 %v5052_v47, %v809_v36  ;;  %v542_v8 = vmul.f32 %v5059_v49, %v518_v41  ;;  %v582_v23 = vmul.f32 %v5062_v50, %v518_v41  ;;  %v5751_v46 = vpop.f32.mrb[14].mxu0 }
 0x1a4   : > { %v618_v60 = vmul.f32 %v5065_v51, %v518_v41  ;;  %v652_v56 = vmul.f32 %v5068_v54, %v518_v41  ;;  %v5743_v10 = vadd.f32 %v838_v17, %v541_v45  ;;  %v5745_v44 = vadd.f32 %v878_v18, %v581_v2  ;;  %v5757_v36 = vpop.f32.mrb[15].mxu0  ;;  %v5759_v41 = vpop.f32.mrb[14].mxu1 }
 0x1a5   : > { %v5747_v33 = vadd.f32 %v908_v21, %v617_v7  ;;  %v5749_v39 = vadd.f32 %v938_v27, %v651_v1  ;;  %v839_v47 = vmul.f32 %v5077_v57, %v811_v12  ;;  %v879_v49 = vmul.f32 %v5103_v13, %v811_v12  ;;  %v5765_v2 = vpop.f32.mrb[15].mxu1 }
 0x1a6   : > { %v909_v50 = vmul.f32 %v5106_v14, %v811_v12  ;;  %v939_v51 = vmul.f32 %v5121_v26, %v811_v12  ;;  %v1117_v54 = vmul.f32 %v5124_v28, %v1072_v55  ;;  %v1157_v45 = vmul.f32 %v5127_v29, %v1072_v55 }
 0x1a7   : > { %7130 = vst [vmem:[#allocation98_spill] sm:$0xff] %v5747_v33  ;;  %7131 = vst [vmem:[#allocation99_spill] sm:$0xff] %v5749_v39  ;;  %v1187_v22 = vmul.f32 %v5133_v34, %v1072_v55  ;;  %v1217_v48 = vmul.f32 %v5143_v37, %v1072_v55  ;;  %v5767_v57 = vadd.f32 %v839_v47, %v542_v8  ;;  %v5779_v18 = vpop.f32.mrb[16].mxu0 }
 0x1a8   : > { %v5769_v13 = vadd.f32 %v879_v49, %v582_v23  ;;  %v5771_v14 = vadd.f32 %v909_v50, %v618_v60  ;;  %v5773_v26 = vadd.f32 %v939_v51, %v652_v56  ;;  %v1127_v12 = vadd.f32 %v1117_v54, %v5603_v62  ;;  %v5785_v23 = vpop.f32.mrb[17].mxu0  ;;  %v5787_v60 = vpop.f32.mrb[16].mxu1  ;;  %v7138_v56 = vld [vmem:[#allocation29_spill] sm:$0xff]  ;;  %v7139_v49 = vld [vmem:[#allocation30_spill] sm:$0xff] }
 0x1a9   : > { %7132 = vst [vmem:[#allocation100_spill] sm:$0xff] %v5767_v57  ;;  %v1167_v7 = vadd.f32 %v1157_v45, %v5605_v4  ;;  %v1197_v1 = vadd.f32 %v1187_v22, %v5607_v30  ;;  %v1227_v17 = vadd.f32 %v1217_v48, %v5609_v3  ;;  %v1118_v55 = vmul.f32 %v5165_v59, %v1074_v35  ;;  %v7136_v4 = vld [vmem:[#allocation27_spill] sm:$0xff]  ;;  %v7137_v30 = vld [vmem:[#allocation28_spill] sm:$0xff]  ;;  %v5797_v51 = vpop.f32.mrb[17].mxu1 }
 0x1aa   : > { %7133 = vst [vmem:[#allocation101_spill] sm:$0xff] %v5769_v13  ;;  %7134 = vst [vmem:[#allocation102_spill] sm:$0xff] %v5771_v14  ;;  %v1158_v21 = vmul.f32 %v5175_v63, %v1074_v35  ;;  %v1188_v27 = vmul.f32 %v5184_v15, %v1074_v35  ;;  %v1218_v8 = vmul.f32 %v5187_v16, %v1074_v35 }
 0x1ab   : > { %7135 = vst [vmem:[#allocation103_spill] sm:$0xff] %v5773_v26  ;;  %v1404_v62 = vmul.f32 %v7136_v4, %v5699_v19  ;;  %v1444_v3 = vmul.f32 %v7137_v30, %v5699_v19  ;;  %v1474_v47 = vmul.f32 %v7138_v56, %v5699_v19  ;;  %v1504_v50 = vmul.f32 %v7139_v49, %v5699_v19  ;;  %v5811_v57 = vpop.f32.mrb[18].mxu0  ;;  %v7144_v19 = vld [vmem:[#allocation31_spill] sm:$0xff] }
 0x1ac   : > { %v1128_v35 = vadd.f32 %v1118_v55, %v5619_v53  ;;  %v1168_v54 = vadd.f32 %v1158_v21, %v5621_v11  ;;  %v1198_v45 = vadd.f32 %v1188_v27, %v5623_v38  ;;  %v1228_v22 = vadd.f32 %v1218_v8, %v5625_v9  ;;  %v7145_v53 = vld [vmem:[#allocation32_spill] sm:$0xff]  ;;  %v7146_v38 = vld [vmem:[#allocation33_spill] sm:$0xff]  ;;  %v7147_v9 = vld [vmem:[#allocation34_spill] sm:$0xff] }
 0x1ad   : > { %v5803_v48 = vadd.f32 %v1404_v62, %v1127_v12  ;;  %v5805_v26 = vadd.f32 %v1444_v3, %v1167_v7  ;;  %v5807_v14 = vadd.f32 %v1474_v47, %v1197_v1  ;;  %v5809_v13 = vadd.f32 %v1504_v50, %v1227_v17  ;;  %v5821_v7 = vpop.f32.mrb[19].mxu0  ;;  %v5823_v1 = vpop.f32.mrb[18].mxu1 }
 0x1ae   : > { %v1405_v39 = vmul.f32 %v7144_v19, %v5709_v5  ;;  %v1445_v11 = vmul.f32 %v7145_v53, %v5709_v5  ;;  %v1475_v55 = vmul.f32 %v7146_v38, %v5709_v5  ;;  %v1505_v12 = vmul.f32 %v7147_v9, %v5709_v5  ;;  %7148 = vst [vmem:[#allocation31_spill] sm:$0xff] %v5821_v7  ;;  %v5833_v62 = vpop.f32.mrb[19].mxu1 }
 0x1af   : > { %7140 = vst [vmem:[#allocation27_spill] sm:$0xff] %v5803_v48  ;;  %7141 = vst [vmem:[#allocation28_spill] sm:$0xff] %v5805_v26  ;;  %v1119_v17 = vmul.f32 %v5124_v28, %v5719_v42  ;;  %v1159_v21 = vmul.f32 %v5127_v29, %v5719_v42  ;;  %v1189_v27 = vmul.f32 %v5133_v34, %v5719_v42  ;;  %v7154_v26 = vld [vmem:[#allocation83_spill] sm:$0xff]  ;;  %v5847_v33 = vpop.f32.mrb[20].mxu0 }
 0x1b0   : > { %7142 = vst [vmem:[#allocation29_spill] sm:$0xff] %v5807_v14  ;;  %7143 = vst [vmem:[#allocation30_spill] sm:$0xff] %v5809_v13  ;;  %v1219_v8 = vmul.f32 %v5143_v37, %v5719_v42  ;;  %v5835_v3 = vadd.f32 %v1405_v39, %v1128_v35  ;;  %v5837_v5 = vadd.f32 %v1445_v11, %v1168_v54  ;;  %v5857_v54 = vpop.f32.mrb[21].mxu0 }
 0x1b1   : > { %7149 = vst [vmem:[#allocation32_spill] sm:$0xff] %v5823_v1  ;;  %v5839_v47 = vadd.f32 %v1475_v55, %v1198_v45  ;;  %v5841_v50 = vadd.f32 %v1505_v12, %v1228_v22  ;;  %v1129_v13 = vadd.f32 %v1119_v17, %v5635_v43  ;;  %v1169_v14 = vadd.f32 %v1159_v21, %v5637_v6  ;;  %v7155_v1 = vld [vmem:[#allocation84_spill] sm:$0xff]  ;;  %v5859_v6 = vpop.f32.mrb[20].mxu1  ;;  %v7158_v12 = vld [vmem:[#allocation85_spill] sm:$0xff]  ;;  %v7160_v21 = vld [vmem:[#allocation87_spill] sm:$0xff] }
 0x1b2   : > { %7150 = vst [vmem:[#allocation33_spill] sm:$0xff] %v5835_v3  ;;  %7151 = vst [vmem:[#allocation34_spill] sm:$0xff] %v5837_v5  ;;  %v1199_v48 = vadd.f32 %v1189_v27, %v7154_v26  ;;  %v1229_v7 = vadd.f32 %v1219_v8, %v7155_v1  ;;  %v1120_v42 = vmul.f32 %v5165_v59, %v5729_v24  ;;  %v5869_v55 = vpop.f32.mrb[21].mxu1  ;;  %v7159_v1 = vld [vmem:[#allocation86_spill] sm:$0xff]  ;;  %v7161_v8 = vld [vmem:[#allocation88_spill] sm:$0xff] }
 0x1b3   : > { %7152 = vst [vmem:[#allocation104_spill] sm:$0xff] %v5839_v47  ;;  %7153 = vst [vmem:[#allocation105_spill] sm:$0xff] %v5841_v50  ;;  %v1160_v39 = vmul.f32 %v5175_v63, %v5729_v24  ;;  %v1190_v35 = vmul.f32 %v5184_v15, %v5729_v24  ;;  %v1220_v43 = vmul.f32 %v5187_v16, %v5729_v24 }
 0x1b4   : > { %7156 = vst [vmem:[#allocation83_spill] sm:$0xff] %v5857_v54  ;;  %7157 = vst [vmem:[#allocation84_spill] sm:$0xff] %v5859_v6  ;;  %v1406_v26 = vmul.f32 %v7136_v4, %v5731_v25  ;;  %v1446_v45 = vmul.f32 %v7137_v30, %v5731_v25  ;;  %v1476_v22 = vmul.f32 %v7138_v56, %v5731_v25  ;;  %v5883_v54 = vpop.f32.mrb[22].mxu0 }
 0x1b5   : > { %v1506_v11 = vmul.f32 %v7139_v49, %v5731_v25  ;;  %v1130_v24 = vadd.f32 %v1120_v42, %v7158_v12  ;;  %v1170_v17 = vadd.f32 %v1160_v39, %v7159_v1  ;;  %v1200_v27 = vadd.f32 %v1190_v35, %v7160_v21  ;;  %v7171_v1 = vld [vmem:[#allocation89_spill] sm:$0xff] }
 0x1b6   : > { %v1230_v50 = vadd.f32 %v1220_v43, %v7161_v8  ;;  %v5875_v47 = vadd.f32 %v1406_v26, %v1129_v13  ;;  %v5877_v5 = vadd.f32 %v1446_v45, %v1169_v14  ;;  %v5879_v3 = vadd.f32 %v1476_v22, %v1199_v48  ;;  %v5893_v14 = vpop.f32.mrb[23].mxu0  ;;  %v5895_v48 = vpop.f32.mrb[22].mxu1  ;;  %v7172_v8 = vld [vmem:[#allocation90_spill] sm:$0xff] }
 0x1b7   : > { %v5881_v6 = vadd.f32 %v1506_v11, %v1229_v7  ;;  %v1407_v25 = vmul.f32 %v7144_v19, %v5737_v58  ;;  %v1447_v42 = vmul.f32 %v7145_v53, %v5737_v58  ;;  %v1477_v39 = vmul.f32 %v7146_v38, %v5737_v58  ;;  %7166 = vst [vmem:[#allocation106_spill] sm:$0xff] %v5893_v14  ;;  %v5905_v45 = vpop.f32.mrb[23].mxu1  ;;  %v7173_v14 = vld [vmem:[#allocation91_spill] sm:$0xff] }
 0x1b8   : > { %7162 = vst [vmem:[#allocation85_spill] sm:$0xff] %v5875_v47  ;;  %7163 = vst [vmem:[#allocation86_spill] sm:$0xff] %v5877_v5  ;;  %v1507_v13 = vmul.f32 %v7147_v9, %v5737_v58  ;;  %v1121_v7 = vmul.f32 %v5124_v28, %v5751_v46  ;;  %v1161_v35 = vmul.f32 %v5127_v29, %v5751_v46  ;;  %v5919_v47 = vpop.f32.mrb[24].mxu0 }
 0x1b9   : > { %7164 = vst [vmem:[#allocation87_spill] sm:$0xff] %v5879_v3  ;;  %7165 = vst [vmem:[#allocation88_spill] sm:$0xff] %v5881_v6  ;;  %v1191_v43 = vmul.f32 %v5133_v34, %v5751_v46  ;;  %v1221_v26 = vmul.f32 %v5143_v37, %v5751_v46  ;;  %v5907_v22 = vadd.f32 %v1407_v25, %v1130_v24  ;;  %v7174_v3 = vld [vmem:[#allocation92_spill] sm:$0xff]  ;;  %v5931_v25 = vpop.f32.mrb[24].mxu1 }
 0x1ba   : > { %7167 = vst [vmem:[#allocation107_spill] sm:$0xff] %v5895_v48  ;;  %7168 = vst [vmem:[#allocation108_spill] sm:$0xff] %v5905_v45  ;;  %v5909_v58 = vadd.f32 %v1447_v42, %v1170_v17  ;;  %v5911_v11 = vadd.f32 %v1477_v39, %v1200_v27  ;;  %v5913_v12 = vadd.f32 %v1507_v13, %v1230_v50  ;;  %v5929_v27 = vpop.f32.mrb[25].mxu0 }
 0x1bb   : > { %v1131_v21 = vadd.f32 %v1121_v7, %v7171_v1  ;;  %v1171_v48 = vadd.f32 %v1161_v35, %v7172_v8  ;;  %v1201_v6 = vadd.f32 %v1191_v43, %v7173_v14  ;;  %v1231_v5 = vadd.f32 %v1221_v26, %v7174_v3  ;;  %7175 = vst [vmem:[#allocation89_spill] sm:$0xff] %v5919_v47  ;;  %v5941_v14 = vpop.f32.mrb[25].mxu1  ;;  %v7178_v7 = vld [vmem:[#allocation93_spill] sm:$0xff]  ;;  %v7179_v35 = vld [vmem:[#allocation94_spill] sm:$0xff]  ;;  %v7180_v26 = vld [vmem:[#allocation95_spill] sm:$0xff] }
 0x1bc   : > { %7169 = vst [vmem:[#allocation109_spill] sm:$0xff] %v5911_v11  ;;  %7170 = vst [vmem:[#allocation110_spill] sm:$0xff] %v5913_v12  ;;  %v1122_v46 = vmul.f32 %v5165_v59, %v5757_v36  ;;  %v1162_v24 = vmul.f32 %v5175_v63, %v5757_v36  ;;  %v1192_v50 = vmul.f32 %v5184_v15, %v5757_v36  ;;  %v7181_v8 = vld [vmem:[#allocation96_spill] sm:$0xff]  ;;  %v5955_v11 = vpop.f32.mrb[26].mxu0 }
 0x1bd   : > { %v1222_v17 = vmul.f32 %v5187_v16, %v5757_v36  ;;  %7176 = vst [vmem:[#allocation90_spill] sm:$0xff] %v5929_v27  ;;  %7177 = vst [vmem:[#allocation91_spill] sm:$0xff] %v5931_v25  ;;  %v1408_v3 = vmul.f32 %v7136_v4, %v5759_v41  ;;  %v1448_v42 = vmul.f32 %v7137_v30, %v5759_v41 }
 0x1be   : > { %v1478_v39 = vmul.f32 %v7138_v56, %v5759_v41  ;;  %v1508_v13 = vmul.f32 %v7139_v49, %v5759_v41  ;;  %v1132_v36 = vadd.f32 %v1122_v46, %v7178_v7  ;;  %v1172_v43 = vadd.f32 %v1162_v24, %v7179_v35  ;;  %7182 = vst [vmem:[#allocation92_spill] sm:$0xff] %v5955_v11 }
 0x1bf   : > { %v1202_v1 = vadd.f32 %v1192_v50, %v7180_v26  ;;  %v1232_v25 = vadd.f32 %v1222_v17, %v7181_v8  ;;  %v5947_v27 = vadd.f32 %v1408_v3, %v1131_v21  ;;  %v5949_v47 = vadd.f32 %v1448_v42, %v1171_v48  ;;  %v5965_v48 = vpop.f32.mrb[27].mxu0 }
 0x1c0   : > { %v5951_v45 = vadd.f32 %v1478_v39, %v1201_v6  ;;  %v5953_v12 = vadd.f32 %v1508_v13, %v1231_v5  ;;  %v1409_v41 = vmul.f32 %v7144_v19, %v5765_v2  ;;  %v1449_v46 = vmul.f32 %v7145_v53, %v5765_v2  ;;  %7183 = vst [vmem:[#allocation93_spill] sm:$0xff] %v5965_v48  ;;  %v5967_v6 = vpop.f32.mrb[26].mxu1  ;;  %v5991_v11 = vpop.f32.mrb[28].mxu0 }
 0x1c1   : > { %v1479_v24 = vmul.f32 %v7146_v38, %v5765_v2  ;;  %v1509_v21 = vmul.f32 %v7147_v9, %v5765_v2  ;;  %7184 = vst [vmem:[#allocation94_spill] sm:$0xff] %v5967_v6  ;;  %v1123_v5 = vmul.f32 %v5124_v28, %v5779_v18  ;;  %v1163_v50 = vmul.f32 %v5127_v29, %v5779_v18  ;;  %v5977_v42 = vpop.f32.mrb[27].mxu1  ;;  %v7185_v6 = vld [vmem:[#allocation97_spill] sm:$0xff] }
 0x1c2   : > { %v1193_v17 = vmul.f32 %v5133_v34, %v5779_v18  ;;  %v1223_v3 = vmul.f32 %v5143_v37, %v5779_v18  ;;  %v5979_v39 = vadd.f32 %v1409_v41, %v1132_v36  ;;  %v5981_v2 = vadd.f32 %v1449_v46, %v1172_v43  ;;  %v6001_v43 = vpop.f32.mrb[29].mxu0 }
 0x1c3   : > { %v5983_v13 = vadd.f32 %v1479_v24, %v1202_v1  ;;  %v5985_v7 = vadd.f32 %v1509_v21, %v1232_v25  ;;  %v1133_v35 = vadd.f32 %v1123_v5, %v5701_v31  ;;  %v1173_v26 = vadd.f32 %v1163_v50, %v5703_v20  ;;  %7186 = vst [vmem:[#allocation95_spill] sm:$0xff] %v6001_v43  ;;  %v6003_v20 = vpop.f32.mrb[28].mxu1  ;;  %v6027_v43 = vpop.f32.mrb[30].mxu0 }
 0x1c4   : > { %v1203_v8 = vadd.f32 %v1193_v17, %v5705_v32  ;;  %v1233_v48 = vadd.f32 %v1223_v3, %v7185_v6  ;;  %v1124_v18 = vmul.f32 %v5165_v59, %v5785_v23  ;;  %v1164_v36 = vmul.f32 %v5175_v63, %v5785_v23  ;;  %7187 = vst [vmem:[#allocation96_spill] sm:$0xff] %v6003_v20  ;;  %v6013_v24 = vpop.f32.mrb[29].mxu1 }
 0x1c5   : > { %v1194_v25 = vmul.f32 %v5184_v15, %v5785_v23  ;;  %v1224_v31 = vmul.f32 %v5187_v16, %v5785_v23  ;;  %v1410_v32 = vmul.f32 %v7136_v4, %v5787_v60  ;;  %v1450_v1 = vmul.f32 %v7137_v30, %v5787_v60  ;;  %7188 = vst [vmem:[#allocation97_spill] sm:$0xff] %v6013_v24  ;;  %v7242_v24 = vld [vmem:[#allocation105_spill] sm:$0xff] }
 0x1c6   : > { %v1480_v41 = vmul.f32 %v7138_v56, %v5787_v60  ;;  %v1510_v46 = vmul.f32 %v7139_v49, %v5787_v60  ;;  %v1134_v23 = vadd.f32 %v1124_v18, %v5721_v52  ;;  %v1174_v21 = vadd.f32 %v1164_v36, %v5723_v40  ;;  %7189 = vst [vmem:[#allocation111_spill] sm:$0xff] %v6027_v43  ;;  %v7241_v43 = vld [vmem:[#allocation104_spill] sm:$0xff] }
 0x1c7   : > { %v1204_v6 = vadd.f32 %v1194_v25, %v5725_v0  ;;  %v1234_v5 = vadd.f32 %v1224_v31, %v5727_v61  ;;  %v6019_v50 = vadd.f32 %v1410_v32, %v1133_v35  ;;  %v6021_v17 = vadd.f32 %v1450_v1, %v1173_v26  ;;  %v6037_v61 = vpop.f32.mrb[31].mxu0  ;;  %v6039_v35 = vpop.f32.mrb[30].mxu1  ;;  %v7193_v1 = vld [vmem:[#allocation98_spill] sm:$0xff] }
 0x1c8   : > { %v6023_v3 = vadd.f32 %v1480_v41, %v1203_v8  ;;  %v6025_v20 = vadd.f32 %v1510_v46, %v1233_v48  ;;  %v1411_v60 = vmul.f32 %v7144_v19, %v5797_v51  ;;  %v1451_v52 = vmul.f32 %v7145_v53, %v5797_v51  ;;  %7190 = vst [vmem:[#allocation112_spill] sm:$0xff] %v6037_v61  ;;  %v6049_v36 = vpop.f32.mrb[31].mxu1  ;;  %v7240_v61 = vld [vmem:[#allocation34_spill] sm:$0xff] }
 0x1c9   : > { %v1481_v40 = vmul.f32 %v7146_v38, %v5797_v51  ;;  %v1511_v0 = vmul.f32 %v7147_v9, %v5797_v51  ;;  %7191 = vst [vmem:[#allocation113_spill] sm:$0xff] %v6039_v35  ;;  %v1125_v48 = vmul.f32 %v5124_v28, %v5811_v57  ;;  %v1165_v26 = vmul.f32 %v5127_v29, %v5811_v57  ;;  %v6063_v35 = vpop.f32.mrb[32].mxu0 }
 0x1ca   : > { %v1195_v8 = vmul.f32 %v5133_v34, %v5811_v57  ;;  %v1225_v18 = vmul.f32 %v5143_v37, %v5811_v57  ;;  %7192 = vst [vmem:[#allocation114_spill] sm:$0xff] %v6049_v36  ;;  %v6051_v25 = vadd.f32 %v1411_v60, %v1134_v23  ;;  %v6053_v51 = vadd.f32 %v1451_v52, %v1174_v21  ;;  %v7194_v34 = vld [vmem:[#allocation99_spill] sm:$0xff]  ;;  %v7239_v36 = vld [vmem:[#allocation33_spill] sm:$0xff] }
 0x1cb   : > { %v6055_v31 = vadd.f32 %v1481_v40, %v1204_v6  ;;  %v6057_v32 = vadd.f32 %v1511_v0, %v1234_v5  ;;  %v1135_v28 = vadd.f32 %v1125_v48, %v5743_v10  ;;  %v1175_v29 = vadd.f32 %v1165_v26, %v5745_v44  ;;  %7195 = vst [vmem:[#allocation98_spill] sm:$0xff] %v6063_v35  ;;  %v7196_v37 = vld [vmem:[#allocation31_spill] sm:$0xff]  ;;  %v6073_v6 = vpop.f32.mrb[33].mxu0  ;;  %v6075_v44 = vpop.f32.mrb[32].mxu1  ;;  %v7199_v5 = vld [vmem:[#allocation32_spill] sm:$0xff]  ;;  %v7202_v0 = vld [vmem:[#allocation101_spill] sm:$0xff] }
 0x1cc   : > { %v1205_v41 = vadd.f32 %v1195_v8, %v7193_v1  ;;  %v1235_v46 = vadd.f32 %v1225_v18, %v7194_v34  ;;  %v1126_v57 = vmul.f32 %v5165_v59, %v7196_v37  ;;  %v1166_v23 = vmul.f32 %v5175_v63, %v7196_v37  ;;  %7197 = vst [vmem:[#allocation99_spill] sm:$0xff] %v6073_v6  ;;  %v7201_v40 = vld [vmem:[#allocation100_spill] sm:$0xff]  ;;  %v7203_v26 = vld [vmem:[#allocation102_spill] sm:$0xff]  ;;  %v7204_v18 = vld [vmem:[#allocation103_spill] sm:$0xff] }
 0x1cd   : > { %v1196_v21 = vmul.f32 %v5184_v15, %v7196_v37  ;;  %v1226_v10 = vmul.f32 %v5187_v16, %v7196_v37  ;;  %7198 = vst [vmem:[#allocation31_spill] sm:$0xff] %v6075_v44  ;;  %v1412_v60 = vmul.f32 %v7136_v4, %v7199_v5  ;;  %v1452_v52 = vmul.f32 %v7137_v30, %v7199_v5  ;;  %v6085_v15 = vpop.f32.mrb[33].mxu1  ;;  %v6099_v37 = vpop.f32.mrb[34].mxu0 }
 0x1ce   : > { %v1482_v59 = vmul.f32 %v7138_v56, %v7199_v5  ;;  %v1512_v63 = vmul.f32 %v7139_v49, %v7199_v5  ;;  %7200 = vst [vmem:[#allocation32_spill] sm:$0xff] %v6085_v15  ;;  %v1136_v16 = vadd.f32 %v1126_v57, %v7201_v40  ;;  %v1176_v48 = vadd.f32 %v1166_v23, %v7202_v0  ;;  %v7221_v40 = vld [vmem:[#allocation27_spill] sm:$0xff] }
 0x1cf   : > { %v1206_v8 = vadd.f32 %v1196_v21, %v7203_v26  ;;  %v1236_v1 = vadd.f32 %v1226_v10, %v7204_v18  ;;  %v6091_v4 = vadd.f32 %v1412_v60, %v1135_v28  ;;  %v6093_v34 = vadd.f32 %v1452_v52, %v1175_v29  ;;  %7209 = vst [vmem:[#allocation115_spill] sm:$0xff] %v6099_v37  ;;  %v6109_v29 = vpop.f32.mrb[35].mxu0  ;;  %v7213_v10 = vld [vmem:[#allocation36_spill] sm:$0xff]  ;;  %v7224_v37 = vld [vmem:[#allocation30_spill] sm:$0xff] }
 0x1d0   : > { %v6095_v30 = vadd.f32 %v1482_v59, %v1205_v41  ;;  %v6097_v56 = vadd.f32 %v1512_v63, %v1235_v46  ;;  %v1413_v49 = vmul.f32 %v7144_v19, %v5833_v62  ;;  %v1453_v57 = vmul.f32 %v7145_v53, %v5833_v62  ;;  %7210 = vst [vmem:[#allocation116_spill] sm:$0xff] %v6109_v29  ;;  %v6111_v41 = vpop.f32.mrb[34].mxu1  ;;  %v7212_v46 = vld [vmem:[#allocation35_spill] sm:$0xff]  ;;  %v7214_v19 = vld [vmem:[#allocation37_spill] sm:$0xff]  ;;  %v7215_v53 = vld [vmem:[#allocation38_spill] sm:$0xff]  ;;  %v6135_v44 = vpop.f32.mrb[36].mxu0 }
 0x1d1   : > { %7205 = vst [vmem:[#allocation100_spill] sm:$0xff] %v6091_v4  ;;  %7206 = vst [vmem:[#allocation101_spill] sm:$0xff] %v6093_v34  ;;  %v1483_v23 = vmul.f32 %v7146_v38, %v5833_v62  ;;  %v1513_v28 = vmul.f32 %v7147_v9, %v5833_v62  ;;  %v1691_v21 = vmul.f32 %v7212_v46, %v5847_v33  ;;  %v6121_v38 = vpop.f32.mrb[35].mxu1  ;;  %v7222_v26 = vld [vmem:[#allocation28_spill] sm:$0xff]  ;;  %v7261_v4 = vld [vmem:[#allocation106_spill] sm:$0xff] }
 0x1d2   : > { %7207 = vst [vmem:[#allocation102_spill] sm:$0xff] %v6095_v30  ;;  %7208 = vst [vmem:[#allocation103_spill] sm:$0xff] %v6097_v56  ;;  %v1731_v5 = vmul.f32 %v7213_v10, %v5847_v33  ;;  %v1761_v60 = vmul.f32 %v7214_v19, %v5847_v33  ;;  %v1791_v52 = vmul.f32 %v7215_v53, %v5847_v33  ;;  %v7226_v33 = vld [vmem:[#allocation83_spill] sm:$0xff] }
 0x1d3   : > { %7211 = vst [vmem:[#allocation117_spill] sm:$0xff] %v6111_v41  ;;  %7216 = vst [vmem:[#allocation35_spill] sm:$0xff] %v6121_v38  ;;  %v6123_v59 = vadd.f32 %v1413_v49, %v1136_v16  ;;  %v6125_v9 = vadd.f32 %v1453_v57, %v1176_v48  ;;  %v6127_v62 = vadd.f32 %v1483_v23, %v1206_v8  ;;  %v7223_v41 = vld [vmem:[#allocation29_spill] sm:$0xff]  ;;  %v7227_v38 = vld [vmem:[#allocation39_spill] sm:$0xff] }
 0x1d4   : > { %v6129_v63 = vadd.f32 %v1513_v28, %v1236_v1  ;;  %v1701_v0 = vadd.f32 %v1691_v21, %v7221_v40  ;;  %v1741_v18 = vadd.f32 %v1731_v5, %v7222_v26  ;;  %v1771_v29 = vadd.f32 %v1761_v60, %v7223_v41  ;;  %7225 = vst [vmem:[#allocation27_spill] sm:$0xff] %v6135_v44  ;;  %v7228_v48 = vld [vmem:[#allocation40_spill] sm:$0xff]  ;;  %v7229_v8 = vld [vmem:[#allocation41_spill] sm:$0xff]  ;;  %v7230_v57 = vld [vmem:[#allocation42_spill] sm:$0xff]  ;;  %v6145_v28 = vpop.f32.mrb[37].mxu0  ;;  %v6147_v21 = vpop.f32.mrb[36].mxu1 }
 0x1d5   : > { %7217 = vst [vmem:[#allocation36_spill] sm:$0xff] %v6123_v59  ;;  %7218 = vst [vmem:[#allocation37_spill] sm:$0xff] %v6125_v9  ;;  %v1801_v15 = vadd.f32 %v1791_v52, %v7224_v37  ;;  %v1692_v16 = vmul.f32 %v7227_v38, %v7226_v33  ;;  %v1732_v49 = vmul.f32 %v7228_v48, %v7226_v33  ;;  %v7233_v41 = vld [vmem:[#allocation84_spill] sm:$0xff]  ;;  %v7234_v37 = vld [vmem:[#allocation43_spill] sm:$0xff]  ;;  %v6157_v35 = vpop.f32.mrb[37].mxu1  ;;  %v6171_v30 = vpop.f32.mrb[38].mxu0 }
 0x1d6   : > { %7219 = vst [vmem:[#allocation38_spill] sm:$0xff] %v6127_v62  ;;  %7220 = vst [vmem:[#allocation118_spill] sm:$0xff] %v6129_v63  ;;  %v1762_v1 = vmul.f32 %v7229_v8, %v7226_v33  ;;  %v1792_v23 = vmul.f32 %v7230_v57, %v7226_v33  ;;  %v1978_v5 = vmul.f32 %v7234_v37, %v7233_v41  ;;  %v7235_v60 = vld [vmem:[#allocation44_spill] sm:$0xff]  ;;  %v7236_v40 = vld [vmem:[#allocation45_spill] sm:$0xff] }
 0x1d7   : > { %7231 = vst [vmem:[#allocation28_spill] sm:$0xff] %v6145_v28  ;;  %7232 = vst [vmem:[#allocation29_spill] sm:$0xff] %v6147_v21  ;;  %v2018_v52 = vmul.f32 %v7235_v60, %v7233_v41  ;;  %v2048_v26 = vmul.f32 %v7236_v40, %v7233_v41  ;;  %v7237_v44 = vld [vmem:[#allocation47_spill] sm:$0xff]  ;;  %v1702_v33 = vadd.f32 %v1692_v16, %v7239_v36  ;;  %v7249_v36 = vld [vmem:[#allocation49_spill] sm:$0xff] }
 0x1d8   : > { %v2078_v6 = vmul.f32 %v7237_v44, %v7233_v41  ;;  %7238 = vst [vmem:[#allocation30_spill] sm:$0xff] %v6157_v35  ;;  %v1742_v28 = vadd.f32 %v1732_v49, %v7240_v61  ;;  %v1772_v21 = vadd.f32 %v1762_v1, %v7241_v43  ;;  %v1802_v63 = vadd.f32 %v1792_v23, %v7242_v24  ;;  %v7248_v41 = vld [vmem:[#allocation46_spill] sm:$0xff]  ;;  %v7251_v24 = vld [vmem:[#allocation51_spill] sm:$0xff] }
 0x1d9   : > { %v6163_v62 = vadd.f32 %v1978_v5, %v1701_v0  ;;  %v6165_v9 = vadd.f32 %v2018_v52, %v1741_v18  ;;  %v6167_v59 = vadd.f32 %v2048_v26, %v1771_v29  ;;  %7247 = vst [vmem:[#allocation42_spill] sm:$0xff] %v6171_v30  ;;  %v1979_v35 = vmul.f32 %v7248_v41, %v5869_v55  ;;  %v7250_v43 = vld [vmem:[#allocation50_spill] sm:$0xff]  ;;  %v6181_v18 = vpop.f32.mrb[39].mxu0  ;;  %v6183_v29 = vpop.f32.mrb[38].mxu1 }
 0x1da   : > { %v6169_v56 = vadd.f32 %v2078_v6, %v1801_v15  ;;  %v2019_v61 = vmul.f32 %v7249_v36, %v5869_v55  ;;  %v2049_v16 = vmul.f32 %v7250_v43, %v5869_v55  ;;  %v2079_v0 = vmul.f32 %v7251_v24, %v5869_v55  ;;  %7252 = vst [vmem:[#allocation84_spill] sm:$0xff] %v6181_v18  ;;  %v6193_v23 = vpop.f32.mrb[39].mxu1  ;;  %v7258_v30 = vld [vmem:[#allocation86_spill] sm:$0xff] }
 0x1db   : > { %7243 = vst [vmem:[#allocation83_spill] sm:$0xff] %v6163_v62  ;;  %7244 = vst [vmem:[#allocation39_spill] sm:$0xff] %v6165_v9  ;;  %v1693_v6 = vmul.f32 %v7212_v46, %v5883_v54  ;;  %v1733_v15 = vmul.f32 %v7213_v10, %v5883_v54  ;;  %v1763_v49 = vmul.f32 %v7214_v19, %v5883_v54  ;;  %v7260_v62 = vld [vmem:[#allocation88_spill] sm:$0xff] }
 0x1dc   : > { %7245 = vst [vmem:[#allocation40_spill] sm:$0xff] %v6167_v59  ;;  %7246 = vst [vmem:[#allocation41_spill] sm:$0xff] %v6169_v56  ;;  %v1793_v1 = vmul.f32 %v7215_v53, %v5883_v54  ;;  %v6195_v5 = vadd.f32 %v1979_v35, %v1702_v33  ;;  %v6197_v55 = vadd.f32 %v2019_v61, %v1742_v28  ;;  %v7259_v59 = vld [vmem:[#allocation87_spill] sm:$0xff] }
 0x1dd   : > { %7253 = vst [vmem:[#allocation43_spill] sm:$0xff] %v6183_v29  ;;  %7254 = vst [vmem:[#allocation44_spill] sm:$0xff] %v6193_v23  ;;  %v6199_v52 = vadd.f32 %v2049_v16, %v1772_v21  ;;  %v6201_v26 = vadd.f32 %v2079_v0, %v1802_v63  ;;  %v7257_v29 = vld [vmem:[#allocation85_spill] sm:$0xff]  ;;  %v1743_v56 = vadd.f32 %v1733_v15, %v7258_v30  ;;  %v7262_v21 = vld [vmem:[#allocation107_spill] sm:$0xff] }
 0x1de   : > { %v1703_v18 = vadd.f32 %v1693_v6, %v7257_v29  ;;  %v1773_v9 = vadd.f32 %v1763_v49, %v7259_v59  ;;  %v1803_v34 = vadd.f32 %v1793_v1, %v7260_v62  ;;  %v1694_v54 = vmul.f32 %v7227_v38, %v7261_v4  ;;  %v7263_v0 = vld [vmem:[#allocation109_spill] sm:$0xff]  ;;  %v7264_v6 = vld [vmem:[#allocation110_spill] sm:$0xff] }
 0x1df   : > { %7255 = vst [vmem:[#allocation45_spill] sm:$0xff] %v6199_v52  ;;  %7256 = vst [vmem:[#allocation47_spill] sm:$0xff] %v6201_v26  ;;  %v1734_v35 = vmul.f32 %v7228_v48, %v7261_v4  ;;  %v1764_v28 = vmul.f32 %v7229_v8, %v7261_v4  ;;  %v1794_v63 = vmul.f32 %v7230_v57, %v7261_v4  ;;  %v7265_v26 = vld [vmem:[#allocation108_spill] sm:$0xff] }
 0x1e0   : > { %v1980_v33 = vmul.f32 %v7234_v37, %v7262_v21  ;;  %v2020_v30 = vmul.f32 %v7235_v60, %v7262_v21  ;;  %v2050_v59 = vmul.f32 %v7236_v40, %v7262_v21  ;;  %v2080_v62 = vmul.f32 %v7237_v44, %v7262_v21 }
 0x1e1   : > { %v1704_v61 = vadd.f32 %v1694_v54, %v5907_v22  ;;  %v1744_v16 = vadd.f32 %v1734_v35, %v5909_v58  ;;  %v1774_v29 = vadd.f32 %v1764_v28, %v7263_v0  ;;  %v1804_v4 = vadd.f32 %v1794_v63, %v7264_v6  ;;  %v7267_v0 = vld [vmem:[#allocation90_spill] sm:$0xff] }
 0x1e2   : > { %v6227_v15 = vadd.f32 %v1980_v33, %v1703_v18  ;;  %v6229_v49 = vadd.f32 %v2020_v30, %v1743_v56  ;;  %v6231_v1 = vadd.f32 %v2050_v59, %v1773_v9  ;;  %v6233_v23 = vadd.f32 %v2080_v62, %v1803_v34  ;;  %v7266_v18 = vld [vmem:[#allocation89_spill] sm:$0xff] }
 0x1e3   : > { %v1981_v52 = vmul.f32 %v7248_v41, %v7265_v26  ;;  %v2021_v22 = vmul.f32 %v7249_v36, %v7265_v26  ;;  %v2051_v58 = vmul.f32 %v7250_v43, %v7265_v26  ;;  %v2081_v54 = vmul.f32 %v7251_v24, %v7265_v26 }
 0x1e4   : > { %v1695_v56 = vmul.f32 %v7212_v46, %v7266_v18  ;;  %v1735_v9 = vmul.f32 %v7213_v10, %v7266_v18  ;;  %v1765_v34 = vmul.f32 %v7214_v19, %v7266_v18  ;;  %v1795_v35 = vmul.f32 %v7215_v53, %v7266_v18 }
 0x1e5   : > { %v6251_v28 = vadd.f32 %v1981_v52, %v1704_v61  ;;  %v6253_v63 = vadd.f32 %v2021_v22, %v1744_v16  ;;  %v6255_v21 = vadd.f32 %v2051_v58, %v1774_v29  ;;  %v6257_v33 = vadd.f32 %v2081_v54, %v1804_v4  ;;  %v7268_v29 = vld [vmem:[#allocation91_spill] sm:$0xff] }
 0x1e6   : > { %v1705_v26 = vadd.f32 %v1695_v56, %v5947_v27  ;;  %v1745_v30 = vadd.f32 %v1735_v9, %v5949_v47  ;;  %v1775_v59 = vadd.f32 %v1765_v34, %v5951_v45  ;;  %v1805_v62 = vadd.f32 %v1795_v35, %v5953_v12 }
 0x1e7   : > { %v1696_v6 = vmul.f32 %v7227_v38, %v7267_v0  ;;  %v1736_v52 = vmul.f32 %v7228_v48, %v7267_v0  ;;  %v1766_v61 = vmul.f32 %v7229_v8, %v7267_v0  ;;  %v1796_v16 = vmul.f32 %v7230_v57, %v7267_v0 }
 0x1e8   : > { %v1982_v27 = vmul.f32 %v7234_v37, %v7268_v29  ;;  %v2022_v47 = vmul.f32 %v7235_v60, %v7268_v29  ;;  %v2052_v45 = vmul.f32 %v7236_v40, %v7268_v29  ;;  %v2082_v12 = vmul.f32 %v7237_v44, %v7268_v29 }
 0x1e9   : > { %v1706_v4 = vadd.f32 %v1696_v6, %v5979_v39  ;;  %v1746_v22 = vadd.f32 %v1736_v52, %v5981_v2  ;;  %v1776_v58 = vadd.f32 %v1766_v61, %v5983_v13  ;;  %v1806_v54 = vadd.f32 %v1796_v16, %v5985_v7  ;;  %v7269_v7 = vld [vmem:[#allocation92_spill] sm:$0xff] }
 0x1ea   : > { %v6283_v18 = vadd.f32 %v1982_v27, %v1705_v26  ;;  %v6285_v56 = vadd.f32 %v2022_v47, %v1745_v30  ;;  %v6287_v9 = vadd.f32 %v2052_v45, %v1775_v59  ;;  %v6289_v34 = vadd.f32 %v2082_v12, %v1805_v62  ;;  %v7270_v47 = vld [vmem:[#allocation93_spill] sm:$0xff] }
 0x1eb   : > { %v1983_v35 = vmul.f32 %v7248_v41, %v5941_v14  ;;  %v2023_v39 = vmul.f32 %v7249_v36, %v5941_v14  ;;  %v2053_v2 = vmul.f32 %v7250_v43, %v5941_v14  ;;  %v2083_v13 = vmul.f32 %v7251_v24, %v5941_v14 }
 0x1ec   : > { %v1697_v26 = vmul.f32 %v7212_v46, %v7269_v7  ;;  %v1737_v30 = vmul.f32 %v7213_v10, %v7269_v7  ;;  %v1767_v59 = vmul.f32 %v7214_v19, %v7269_v7  ;;  %v1797_v62 = vmul.f32 %v7215_v53, %v7269_v7 }
 0x1ed   : > { %v6307_v0 = vadd.f32 %v1983_v35, %v1706_v4  ;;  %v6309_v6 = vadd.f32 %v2023_v39, %v1746_v22  ;;  %v6311_v52 = vadd.f32 %v2053_v2, %v1776_v58  ;;  %v6313_v61 = vadd.f32 %v2083_v13, %v1806_v54  ;;  %v7271_v58 = vld [vmem:[#allocation94_spill] sm:$0xff] }
 0x1ee   : > { %v1707_v14 = vadd.f32 %v1697_v26, %v6019_v50  ;;  %v1747_v16 = vadd.f32 %v1737_v30, %v6021_v17  ;;  %v1777_v29 = vadd.f32 %v1767_v59, %v6023_v3  ;;  %v1807_v27 = vadd.f32 %v1797_v62, %v6025_v20 }
 0x1ef   : > { %v1698_v45 = vmul.f32 %v7227_v38, %v7270_v47  ;;  %v1738_v12 = vmul.f32 %v7228_v48, %v7270_v47  ;;  %v1768_v4 = vmul.f32 %v7229_v8, %v7270_v47  ;;  %v1798_v22 = vmul.f32 %v7230_v57, %v7270_v47 }
 0x1f0   : > { %v1984_v50 = vmul.f32 %v7234_v37, %v7271_v58  ;;  %v2024_v17 = vmul.f32 %v7235_v60, %v7271_v58  ;;  %v2054_v20 = vmul.f32 %v7236_v40, %v7271_v58  ;;  %v2084_v3 = vmul.f32 %v7237_v44, %v7271_v58  ;;  %v7283_v58 = vld [vmem:[#allocation103_spill] sm:$0xff] }
 0x1f1   : > { %v1708_v54 = vadd.f32 %v1698_v45, %v6051_v25  ;;  %v1748_v35 = vadd.f32 %v1738_v12, %v6053_v51  ;;  %v1778_v39 = vadd.f32 %v1768_v4, %v6055_v31  ;;  %v1808_v2 = vadd.f32 %v1798_v22, %v6057_v32  ;;  %v7282_v22 = vld [vmem:[#allocation102_spill] sm:$0xff] }
 0x1f2   : > { %v6339_v13 = vadd.f32 %v1984_v50, %v1707_v14  ;;  %v6341_v7 = vadd.f32 %v2024_v17, %v1747_v16  ;;  %v6343_v26 = vadd.f32 %v2054_v20, %v1777_v29  ;;  %v6345_v30 = vadd.f32 %v2084_v3, %v1807_v27  ;;  %v7285_v3 = vld [vmem:[#allocation96_spill] sm:$0xff] }
 0x1f3   : > { %v1985_v59 = vmul.f32 %v7248_v41, %v5977_v42  ;;  %v2025_v25 = vmul.f32 %v7249_v36, %v5977_v42  ;;  %v2055_v51 = vmul.f32 %v7250_v43, %v5977_v42  ;;  %v2085_v31 = vmul.f32 %v7251_v24, %v5977_v42  ;;  %v7280_v42 = vld [vmem:[#allocation100_spill] sm:$0xff] }
 0x1f4   : > { %7272 = vst [vmem:[#allocation33_spill] sm:$0xff] %v6339_v13  ;;  %7273 = vst [vmem:[#allocation34_spill] sm:$0xff] %v6341_v7  ;;  %v1699_v32 = vmul.f32 %v7212_v46, %v5991_v11  ;;  %v1739_v62 = vmul.f32 %v7213_v10, %v5991_v11  ;;  %v1769_v14 = vmul.f32 %v7214_v19, %v5991_v11  ;;  %v7281_v46 = vld [vmem:[#allocation101_spill] sm:$0xff]  ;;  %v7284_v19 = vld [vmem:[#allocation95_spill] sm:$0xff] }
 0x1f5   : > { %7274 = vst [vmem:[#allocation104_spill] sm:$0xff] %v6343_v26  ;;  %7275 = vst [vmem:[#allocation105_spill] sm:$0xff] %v6345_v30  ;;  %v1799_v16 = vmul.f32 %v7215_v53, %v5991_v11  ;;  %v6363_v29 = vadd.f32 %v1985_v59, %v1708_v54  ;;  %v6365_v27 = vadd.f32 %v2025_v25, %v1748_v35  ;;  %v7288_v59 = vld [vmem:[#allocation37_spill] sm:$0xff]  ;;  %v7290_v25 = vld [vmem:[#allocation38_spill] sm:$0xff] }
 0x1f6   : > { %v6367_v47 = vadd.f32 %v2055_v51, %v1778_v39  ;;  %v6369_v45 = vadd.f32 %v2085_v31, %v1808_v2  ;;  %v1709_v12 = vadd.f32 %v1699_v32, %v7280_v42  ;;  %v1749_v4 = vadd.f32 %v1739_v62, %v7281_v46  ;;  %v7286_v2 = vld [vmem:[#allocation36_spill] sm:$0xff]  ;;  %v7292_v51 = vld [vmem:[#allocation118_spill] sm:$0xff]  ;;  %v7303_v46 = vld [vmem:[#allocation111_spill] sm:$0xff] }
 0x1f7   : > { %7276 = vst [vmem:[#allocation46_spill] sm:$0xff] %v6363_v29  ;;  %7277 = vst [vmem:[#allocation49_spill] sm:$0xff] %v6365_v27  ;;  %v1779_v10 = vadd.f32 %v1769_v14, %v7282_v22  ;;  %v1809_v50 = vadd.f32 %v1799_v16, %v7283_v58  ;;  %v1700_v17 = vmul.f32 %v7227_v38, %v7284_v19  ;;  %v7302_v42 = vld [vmem:[#allocation72_spill] sm:$0xff]  ;;  %v7332_v26 = vld [vmem:[#allocation79_spill] sm:$0xff] }
 0x1f8   : > { %7278 = vst [vmem:[#allocation50_spill] sm:$0xff] %v6367_v47  ;;  %7279 = vst [vmem:[#allocation51_spill] sm:$0xff] %v6369_v45  ;;  %v1740_v11 = vmul.f32 %v7228_v48, %v7284_v19  ;;  %v1770_v53 = vmul.f32 %v7229_v8, %v7284_v19  ;;  %v1800_v20 = vmul.f32 %v7230_v57, %v7284_v19  ;;  %v7307_v19 = vld [vmem:[#allocation57_spill] sm:$0xff]  ;;  %v7333_v7 = vld [vmem:[#allocation78_spill] sm:$0xff] }
 0x1f9   : > { %v1986_v54 = vmul.f32 %v7234_v37, %v7285_v3  ;;  %v2026_v35 = vmul.f32 %v7235_v60, %v7285_v3  ;;  %v2056_v39 = vmul.f32 %v7236_v40, %v7285_v3  ;;  %v2086_v38 = vmul.f32 %v7237_v44, %v7285_v3  ;;  %v7298_v44 = vld [vmem:[#allocation97_spill] sm:$0xff]  ;;  %v7311_v3 = vld [vmem:[#allocation60_spill] sm:$0xff] }
 0x1fa   : > { %v6392_v48 = vadd.f32 %v1700_v17, %v7286_v2  ;;  %v6395_v8 = vadd.f32 %v1740_v11, %v7288_v59  ;;  %v6398_v57 = vadd.f32 %v1770_v53, %v7290_v25  ;;  %v6401_v37 = vadd.f32 %v1800_v20, %v7292_v51  ;;  %v7309_v11 = vld [vmem:[#allocation58_spill] sm:$0xff]  ;;  %v7314_v59 = vld [vmem:[#allocation39_spill] sm:$0xff]  ;;  %v7315_v51 = vld [vmem:[#allocation40_spill] sm:$0xff] }
 0x1fb   : > { %v6403_v31 = vadd.f32 %v1986_v54, %v1709_v12  ;;  %v6405_v60 = vadd.f32 %v2026_v35, %v1749_v4  ;;  %v6407_v40 = vadd.f32 %v2056_v39, %v1779_v10  ;;  %v6409_v32 = vadd.f32 %v2086_v38, %v1809_v50  ;;  %v7304_v4 = vld [vmem:[#allocation53_spill] sm:$0xff]  ;;  %v7305_v10 = vld [vmem:[#allocation54_spill] sm:$0xff]  ;;  %v7306_v50 = vld [vmem:[#allocation55_spill] sm:$0xff] }
 0x1fc   : > { %7287 = vst [vmem:[#allocation85_spill] sm:$0xff] %v6392_v48  ;;  %7289 = vst [vmem:[#allocation86_spill] sm:$0xff] %v6395_v8  ;;  %v6413_v62 = vmul.f32 %v7248_v41, %v7298_v44  ;;  %v6417_v14 = vmul.f32 %v7249_v36, %v7298_v44  ;;  %v6421_v16 = vmul.f32 %v7250_v43, %v7298_v44  ;;  %v7308_v36 = vld [vmem:[#allocation112_spill] sm:$0xff]  ;;  %v7310_v43 = vld [vmem:[#allocation59_spill] sm:$0xff] }
 0x1fd   : > { %7291 = vst [vmem:[#allocation87_spill] sm:$0xff] %v6398_v57  ;;  %7293 = vst [vmem:[#allocation88_spill] sm:$0xff] %v6401_v37  ;;  %v2261_v22 = vmul.f32 %v7304_v4, %v7303_v46  ;;  %v2301_v58 = vmul.f32 %v7305_v10, %v7303_v46  ;;  %v2331_v41 = vmul.f32 %v7306_v50, %v7303_v46  ;;  %v7312_v35 = vld [vmem:[#allocation61_spill] sm:$0xff]  ;;  %v7313_v38 = vld [vmem:[#allocation83_spill] sm:$0xff] }
 0x1fe   : > { %7294 = vst [vmem:[#allocation106_spill] sm:$0xff] %v6403_v31  ;;  %7295 = vst [vmem:[#allocation107_spill] sm:$0xff] %v6405_v60  ;;  %v2361_v17 = vmul.f32 %v7307_v19, %v7303_v46  ;;  %v2262_v53 = vmul.f32 %v7309_v11, %v7308_v36  ;;  %v2302_v20 = vmul.f32 %v7310_v43, %v7308_v36  ;;  %v7316_v37 = vld [vmem:[#allocation41_spill] sm:$0xff]  ;;  %v7318_v8 = vld [vmem:[#allocation47_spill] sm:$0xff] }
 0x1ff   : > { %7296 = vst [vmem:[#allocation109_spill] sm:$0xff] %v6407_v40  ;;  %7297 = vst [vmem:[#allocation110_spill] sm:$0xff] %v6409_v32  ;;  %v2332_v54 = vmul.f32 %v7311_v3, %v7308_v36  ;;  %v2362_v39 = vmul.f32 %v7312_v35, %v7308_v36  ;;  %v2271_v2 = vadd.f32 %v2261_v22, %v7313_v38  ;;  %v7317_v57 = vld [vmem:[#allocation45_spill] sm:$0xff]  ;;  %v7320_v40 = vld [vmem:[#allocation62_spill] sm:$0xff] }
 0x200   : > { %7299 = vst [vmem:[#allocation108_spill] sm:$0xff] %v6413_v62  ;;  %7300 = vst [vmem:[#allocation89_spill] sm:$0xff] %v6417_v14  ;;  %v2311_v25 = vadd.f32 %v2301_v58, %v7314_v59  ;;  %v2341_v12 = vadd.f32 %v2331_v41, %v7315_v51  ;;  %v2371_v46 = vadd.f32 %v2361_v17, %v7316_v37  ;;  %v7319_v48 = vld [vmem:[#allocation113_spill] sm:$0xff]  ;;  %v7321_v36 = vld [vmem:[#allocation66_spill] sm:$0xff] }
 0x201   : > { %7301 = vst [vmem:[#allocation90_spill] sm:$0xff] %v6421_v16  ;;  %v2272_v32 = vadd.f32 %v2262_v53, %v6195_v5  ;;  %v2312_v16 = vadd.f32 %v2302_v20, %v6197_v55  ;;  %v2342_v14 = vadd.f32 %v2332_v54, %v7317_v57  ;;  %v2372_v62 = vadd.f32 %v2362_v39, %v7318_v8  ;;  %v7322_v58 = vld [vmem:[#allocation70_spill] sm:$0xff]  ;;  %v7323_v41 = vld [vmem:[#allocation71_spill] sm:$0xff]  ;;  %v7325_v5 = vld [vmem:[#allocation73_spill] sm:$0xff] }
 0x202   : > { %v2544_v60 = vmul.f32 %v7320_v40, %v7319_v48  ;;  %v2584_v22 = vmul.f32 %v7321_v36, %v7319_v48  ;;  %v2614_v38 = vmul.f32 %v7322_v58, %v7319_v48  ;;  %v2644_v37 = vmul.f32 %v7323_v41, %v7319_v48  ;;  %v7324_v17 = vld [vmem:[#allocation114_spill] sm:$0xff]  ;;  %v7326_v55 = vld [vmem:[#allocation75_spill] sm:$0xff]  ;;  %v7327_v8 = vld [vmem:[#allocation76_spill] sm:$0xff] }
 0x203   : > { %v2545_v53 = vmul.f32 %v7325_v5, %v7324_v17  ;;  %v2585_v57 = vmul.f32 %v7326_v55, %v7324_v17  ;;  %v2615_v20 = vmul.f32 %v7327_v8, %v7324_v17  ;;  %v7328_v54 = vld [vmem:[#allocation77_spill] sm:$0xff]  ;;  %v6474_v30 = vmul.f32 %v7251_v24, %v7298_v44 }
 0x204   : > { %v2645_v39 = vmul.f32 %v7328_v54, %v7324_v17  ;;  %v2554_v59 = vadd.f32 %v2544_v60, %v2271_v2  ;;  %v2594_v51 = vadd.f32 %v2584_v22, %v2311_v25  ;;  %v6464_v31 = vadd.f32 %v2614_v38, %v2341_v12  ;;  %v7334_v17 = vld [vmem:[#allocation81_spill] sm:$0xff]  ;;  %v7335_v60 = vld [vmem:[#allocation18_spill] sm:$0xff] }
 0x205   : > { %v6466_v45 = vadd.f32 %v2644_v37, %v2371_v46  ;;  %v2555_v47 = vadd.f32 %v2545_v53, %v2272_v32  ;;  %v2595_v48 = vadd.f32 %v2585_v57, %v2312_v16  ;;  %v6468_v27 = vadd.f32 %v2615_v20, %v2342_v14  ;;  %7331 = vst [vmem:[#allocation93_spill] sm:$0xff] %v6474_v30  ;;  %v7336_v12 = vld [vmem:[#allocation82_spill] sm:$0xff]  ;;  %v7339_v46 = vld [vmem:[#allocation80_spill] sm:$0xff]  ;;  %v7340_v37 = vld [vmem:[#allocation99_spill] sm:$0xff] }
 0x206   : > { %v6470_v29 = vadd.f32 %v2645_v39, %v2372_v62  ;;  %v2743_v13 = vadd.f32 %v7333_v7, %v7332_v26  ;;  %vm2783_vm5 = vcmp.eq.s32.totalorder %v7335_v60, %v7334_v17  ;;  %vm2807_vm6 = vcmp.eq.s32.totalorder %v7335_v60, %v7336_v12  ;;  %v7338_v62 = vld [vmem:[#allocation98_spill] sm:$0xff]  ;;  %v7347_v60 = vld [vmem:[#allocation32_spill] sm:$0xff] }
 0x207   : > { %7329 = vst [vmem:[#allocation91_spill] sm:$0xff] %v6466_v45  ;;  %v2822_v2 = vmul.f32 %v2554_v59, %v2554_v59  ;;  %v7337_v32 = vmov 0.0   ;;  %v2263_v25 = vmul.f32 %v7304_v4, %v7338_v62  ;;  %v2823_v44 = vmul.f32 %v2555_v47, %v2555_v47  ;;  %v7348_v30 = vld [vmem:[#allocation48_spill] sm:$0xff] }
 0x208   : > { %7330 = vst [vmem:[#allocation92_spill] sm:$0xff] %v6470_v29  ;;  %v3511_v16 = vsel %vm2783_vm5, 1.0, %v7337_v32  ;;  %v3515_v14 = vsel %vm2807_vm6, 1.0, %v7337_v32  ;;  %v2771_v24 = vadd.f32 %v7339_v46, %v2743_v13  ;;  %v2303_v7 = vmul.f32 %v7305_v10, %v7338_v62  ;;  %v7349_v29 = vld [vmem:[#allocation21_spill] sm:$0xff] }
 0x209   : > { %v2333_v26 = vmul.f32 %v7306_v50, %v7338_v62  ;;  %v2273_v22 = vadd.f32 %v2263_v25, %v6227_v15  ;;  %v2363_v38 = vmul.f32 %v7307_v19, %v7338_v62  ;;  %v2264_v53 = vmul.f32 %v7309_v11, %v7340_v37 }
 0x20a   : > { %v2304_v57 = vmul.f32 %v7310_v43, %v7340_v37  ;;  %v2795_v20 = vadd.f32 %v3511_v16, %v2771_v24  ;;  %v2313_v13 = vadd.f32 %v2303_v7, %v6229_v49  ;;  %v2334_v39 = vmul.f32 %v7311_v3, %v7340_v37  ;;  %v7341_v24 = vld [vmem:[#allocation31_spill] sm:$0xff] }
 0x20b   : > { %v2343_v47 = vadd.f32 %v2333_v26, %v6231_v1  ;;  %v2373_v59 = vadd.f32 %v2363_v38, %v6233_v23  ;;  %v2274_v15 = vadd.f32 %v2264_v53, %v6251_v28  ;;  %v2364_v25 = vmul.f32 %v7312_v35, %v7340_v37  ;;  %v7343_v26 = vld [vmem:[#allocation19_spill] sm:$0xff]  ;;  %v7344_v53 = vld [vmem:[#allocation24_spill] sm:$0xff] }
 0x20c   : > { %v2314_v62 = vadd.f32 %v2304_v57, %v6253_v63  ;;  %v6507_v46 = vadd.f32 %v3515_v14, %v2795_v20  ;;  %v2344_v16 = vadd.f32 %v2334_v39, %v6255_v21  ;;  %v2546_v49 = vmul.f32 %v7320_v40, %v7341_v24  ;;  %v7346_v39 = vld [vmem:[#allocation20_spill] sm:$0xff] }
 0x20d   : > { %v2586_v1 = vmul.f32 %v7321_v36, %v7341_v24  ;;  %v2374_v7 = vadd.f32 %v2364_v25, %v6257_v33  ;;  %v2616_v23 = vmul.f32 %v7322_v58, %v7341_v24  ;;  %v2646_v28 = vmul.f32 %v7323_v41, %v7341_v24 }
 0x20e   : > { %v7342_v63 = vrot.slane %v7302_v42, 3  ;;  %v2831_v21 = vrot.slane %v6507_v46, %v7343_v26  ;;  %v2556_v38 = vadd.f32 %v2546_v49, %v2273_v22  ;;  %v2905_v57 = vrot.slane %v7302_v42, %v7344_v53 }
 0x20f   : > { %v2596_v37 = vadd.f32 %v2586_v1, %v2313_v13  ;;  %v6526_v20 = vadd.f32 %v2616_v23, %v2343_v47  ;;  %v6528_v33 = vadd.f32 %v2646_v28, %v2373_v59  ;;  %v2547_v24 = vmul.f32 %v7325_v5, %v7347_v60 }
 0x210   : > { %v2842_v14 = vadd.f32 %v7342_v63, %v7302_v42  ;;  %vm2680_vm3 = vcmp.eq.s32.totalorder %v7349_v29, %v7348_v30  ;;  %v7350_v63 = vrot.slane %v7302_v42, %v7343_v26  ;;  %v2844_v13 = vmul.f32 %v2594_v51, %v2556_v38 }
 0x211   : > { %7345 = vst [vmem:[#allocation94_spill] sm:$0xff] %v6528_v33  ;;  %v2900_v49 = vmul.f32 %v2596_v37, %v2596_v37  ;;  %v2587_v47 = vmul.f32 %v7326_v55, %v7347_v60  ;;  %v2557_v1 = vadd.f32 %v2547_v24, %v2274_v15  ;;  %v2617_v59 = vmul.f32 %v7327_v8, %v7347_v60 }
 0x212   : > { %v2849_v25 = vrot.slane %v2842_v14, %v7346_v39  ;;  %v2832_v22 = vmul.f32 %v7350_v63, %v2822_v2  ;;  %v2647_v23 = vmul.f32 %v7328_v54, %v7347_v60  ;;  %v2839_v28 = vrot.slane %v6507_v46, 3  ;;  %v7351_v60 = vld [vmem:[#allocation115_spill] sm:$0xff] }
 0x213   : > { %v2833_v14 = vmul.f32 %v2831_v21, %v2823_v44  ;;  %v6545_v45 = vmul.f32 %v2905_v57, %v2900_v49  ;;  %v2597_v26 = vadd.f32 %v2587_v47, %v2314_v62  ;;  %v6547_v2 = vadd.f32 %v2617_v59, %v2344_v16  ;;  %v7353_v59 = vld [vmem:[#allocation117_spill] sm:$0xff] }
 0x214   : > { %v2854_v33 = vmul.f32 %v2849_v25, %v2844_v13  ;;  %v6549_v51 = vadd.f32 %v2647_v23, %v2374_v7  ;;  %v2843_v38 = vadd.f32 %v2839_v28, %v6507_v46  ;;  %v2845_v15 = vmul.f32 %v2595_v48, %v2557_v1  ;;  %v7352_v48 = vld [vmem:[#allocation116_spill] sm:$0xff] }
 0x215   : > { %v2909_v24 = vrot.slane %v6507_v46, %v7344_v53  ;;  %v2265_v63 = vmul.f32 %v7304_v4, %v7351_v60  ;;  %v2305_v44 = vmul.f32 %v7305_v10, %v7351_v60  ;;  %v2335_v16 = vmul.f32 %v7306_v50, %v7351_v60 }
 0x216   : > { %v6552_v37 = vadd.f32 %v2854_v33, %v2832_v22  ;;  %v2853_v62 = vrot.slane %v2843_v38, %v7346_v39  ;;  %v2365_v7 = vmul.f32 %v7307_v19, %v7351_v60  ;;  %v2266_v21 = vmul.f32 %v7309_v11, %v7352_v48 }
 0x217   : > { %v2901_v57 = vmul.f32 %v2597_v26, %v2597_v26  ;;  %v2275_v53 = vadd.f32 %v2265_v63, %v6283_v18  ;;  %v2315_v33 = vadd.f32 %v2305_v44, %v6285_v56  ;;  %v2306_v25 = vmul.f32 %v7310_v43, %v7352_v48  ;;  %v7354_v63 = vld [vmem:[#allocation52_spill] sm:$0xff] }
 0x218   : > { %v2855_v22 = vmul.f32 %v2853_v62, %v2845_v15  ;;  %v2345_v39 = vadd.f32 %v2335_v16, %v6287_v9  ;;  %v2375_v13 = vadd.f32 %v2365_v7, %v6289_v34  ;;  %v2276_v49 = vadd.f32 %v2266_v21, %v6307_v0  ;;  %v7355_v62 = vld [vmem:[#allocation56_spill] sm:$0xff] }
 0x219   : > { %v2316_v47 = vadd.f32 %v2306_v25, %v6309_v6  ;;  %v2336_v1 = vmul.f32 %v7311_v3, %v7352_v48  ;;  %v2366_v18 = vmul.f32 %v7312_v35, %v7352_v48  ;;  %v2548_v56 = vmul.f32 %v7320_v40, %v7353_v59 }
 0x21a   : > { %v6581_v23 = vadd.f32 %v2855_v22, %v2833_v14  ;;  %v2588_v9 = vmul.f32 %v7321_v36, %v7353_v59  ;;  %v2618_v34 = vmul.f32 %v7322_v58, %v7353_v59  ;;  %v2648_v0 = vmul.f32 %v7323_v41, %v7353_v59  ;;  %v7360_v59 = vld [vmem:[#allocation67_spill] sm:$0xff] }
 0x21b   : > { %v2346_v6 = vadd.f32 %v2336_v1, %v6311_v52  ;;  %v2376_v28 = vadd.f32 %v2366_v18, %v6313_v61  ;;  %v2558_v26 = vadd.f32 %v2548_v56, %v2275_v53  ;;  %v3496_v14 = vsel %vm2680_vm3, 1.0, %v7337_v32  ;;  %v7356_v52 = vld [vmem:[#allocation63_spill] sm:$0xff]  ;;  %v7357_v61 = vld [vmem:[#allocation64_spill] sm:$0xff]  ;;  %v7358_v53 = vld [vmem:[#allocation65_spill] sm:$0xff] }
 0x21c   : > { %v2598_v38 = vadd.f32 %v2588_v9, %v2315_v33  ;;  %v2628_v15 = vadd.f32 %v2618_v34, %v2345_v39  ;;  %v6595_v60 = vadd.f32 %v2648_v0, %v2375_v13  ;;  %vm2708_vm11 = vcmp.eq.s32.totalorder %v7349_v29, %v7354_v63 }
 0x21d   : > { %v3500_v44 = vsel %vm2708_vm11, 1.0, %v7337_v32  ;;  %vm2732_vm7 = vcmp.eq.s32.totalorder %v7349_v29, %v7355_v62  ;;  %vm2760_vm8 = vcmp.eq.s32.totalorder %v7349_v29, %v7356_v52  ;;  %vm2784_vm9 = vcmp.eq.s32.totalorder %v7349_v29, %v7357_v61  ;;  %v7363_v52 = vld [vmem:[#allocation74_spill] sm:$0xff] }
 0x21e   : > { %v6606_v30 = vmul.f32 %v2909_v24, %v2901_v57  ;;  %v2720_v16 = vadd.f32 %v3500_v44, %v3496_v14  ;;  %v3504_v7 = vsel %vm2732_vm7, 1.0, %v7337_v32  ;;  %v3508_v48 = vsel %vm2760_vm8, 1.0, %v7337_v32  ;;  %v7359_v24 = vld [vmem:[#allocation35_spill] sm:$0xff] }
 0x21f   : > { %v3512_v21 = vsel %vm2784_vm9, 1.0, %v7337_v32  ;;  %vm2808_vm4 = vcmp.eq.s32.totalorder %v7349_v29, %v7358_v53  ;;  %v2866_v33 = vmul.f32 %v6464_v31, %v2558_v26  ;;  %v6615_v25 = vmul.f32 %v6526_v20, %v2598_v38  ;;  %v7361_v31 = vld [vmem:[#allocation68_spill] sm:$0xff]  ;;  %v7362_v38 = vld [vmem:[#allocation69_spill] sm:$0xff] }
 0x220   : > { %v2744_v22 = vadd.f32 %v3504_v7, %v2720_v16  ;;  %v3516_v39 = vsel %vm2808_vm4, 1.0, %v7337_v32  ;;  %v2549_v57 = vmul.f32 %v7325_v5, %v7359_v24  ;;  %v2589_v13 = vmul.f32 %v7326_v55, %v7359_v24 }
 0x221   : > { %v2619_v1 = vmul.f32 %v7327_v8, %v7359_v24  ;;  %v2649_v18 = vmul.f32 %v7328_v54, %v7359_v24  ;;  %vm2681_vm13 = vcmp.eq.s32.totalorder %v7349_v29, %v7360_v59  ;;  %vm2709_vm10 = vcmp.eq.s32.totalorder %v7349_v29, %v7361_v31  ;;  %v7366_v24 = vld [vmem:[#allocation34_spill] sm:$0xff] }
 0x222   : > { %v2772_v20 = vadd.f32 %v3508_v48, %v2744_v22  ;;  %v2559_v56 = vadd.f32 %v2549_v57, %v2276_v49  ;;  %v2599_v9 = vadd.f32 %v2589_v13, %v2316_v47  ;;  %v3497_v34 = vsel %vm2681_vm13, 1.0, %v7337_v32 }
 0x223   : > { %v2629_v0 = vadd.f32 %v2619_v1, %v2346_v6  ;;  %v6631_v26 = vadd.f32 %v2649_v18, %v2376_v28  ;;  %v3501_v14 = vsel %vm2709_vm10, 1.0, %v7337_v32  ;;  %vm2733_vm12 = vcmp.eq.s32.totalorder %v7349_v29, %v7362_v38  ;;  %v7367_v18 = vld [vmem:[#allocation22_spill] sm:$0xff] }
 0x224   : > { %v2796_v63 = vadd.f32 %v3512_v21, %v2772_v20  ;;  %v2721_v44 = vadd.f32 %v3501_v14, %v3497_v34  ;;  %v3505_v62 = vsel %vm2733_vm12, 1.0, %v7337_v32  ;;  %vm2761_vm15 = vcmp.eq.s32.totalorder %v7349_v29, %v7363_v52  ;;  %v7364_v21 = vld [vmem:[#allocation27_spill] sm:$0xff]  ;;  %v7368_v20 = vld [vmem:[#allocation104_spill] sm:$0xff] }
 0x225   : > { %v3509_v49 = vsel %vm2761_vm15, 1.0, %v7337_v32  ;;  %vm2785_vm1 = vcmp.eq.s32.totalorder %v7349_v29, %v7334_v17  ;;  %vm2809_vm2 = vcmp.eq.s32.totalorder %v7349_v29, %v7336_v12  ;;  %v2867_v47 = vmul.f32 %v6468_v27, %v2559_v56 }
 0x226   : > { %v6645_v6 = vadd.f32 %v3516_v39, %v2796_v63  ;;  %v2948_v28 = vmul.f32 %v2628_v15, %v2628_v15  ;;  %v2745_v61 = vadd.f32 %v3505_v62, %v2721_v44  ;;  %v3513_v16 = vsel %vm2785_vm1, 1.0, %v7337_v32  ;;  %v7365_v15 = vld [vmem:[#allocation33_spill] sm:$0xff] }
 0x227   : > { %v3517_v7 = vsel %vm2809_vm2, 1.0, %v7337_v32  ;;  %v2921_v48 = vmul.f32 %v6547_v2, %v2599_v9  ;;  %v2267_v53 = vmul.f32 %v7304_v4, %v7364_v21  ;;  %v2307_v17 = vmul.f32 %v7305_v10, %v7364_v21  ;;  %v7369_v9 = vld [vmem:[#allocation105_spill] sm:$0xff] }
 0x228   : > { %v2860_v29 = vrot.slane %v6645_v6, 6  ;;  %v2914_v27 = vrot.slane %v6645_v6, 3  ;;  %v2773_v12 = vadd.f32 %v3509_v49, %v2745_v61  ;;  %v2949_v22 = vmul.f32 %v2629_v0, %v2629_v0  ;;  %v7370_v0 = vld [vmem:[#allocation28_spill] sm:$0xff]  ;;  %v7371_v44 = vld [vmem:[#allocation25_spill] sm:$0xff]  ;;  %v7372_v61 = vld [vmem:[#allocation46_spill] sm:$0xff] }
 0x229   : > { %v2277_v39 = vadd.f32 %v2267_v53, %v7365_v15  ;;  %v2317_v57 = vadd.f32 %v2307_v17, %v7366_v24  ;;  %v2337_v32 = vmul.f32 %v7306_v50, %v7364_v21  ;;  %v2367_v2 = vmul.f32 %v7307_v19, %v7364_v21  ;;  %v7373_v21 = vld [vmem:[#allocation49_spill] sm:$0xff] }
 0x22a   : > { %v2864_v13 = vadd.f32 %v2860_v29, %v7302_v42  ;;  %v2918_v1 = vadd.f32 %v2914_v27, %v7302_v42  ;;  %v2953_v59 = vrot.slane %v6645_v6, %v7367_v18  ;;  %v2797_v31 = vadd.f32 %v3513_v16, %v2773_v12  ;;  %v7374_v29 = vld [vmem:[#allocation29_spill] sm:$0xff] }
 0x22b   : > { %v2347_v56 = vadd.f32 %v2337_v32, %v7368_v20  ;;  %v2377_v34 = vadd.f32 %v2367_v2, %v7369_v9  ;;  %v2268_v14 = vmul.f32 %v7309_v11, %v7370_v0  ;;  %v2308_v38 = vmul.f32 %v7310_v43, %v7370_v0  ;;  %v7376_v20 = vld [vmem:[#allocation51_spill] sm:$0xff] }
 0x22c   : > { %v2871_v63 = vrot.slane %v2864_v13, %v7367_v18  ;;  %v2925_v62 = vrot.slane %v2918_v1, %v7371_v44  ;;  %v6674_v52 = vadd.f32 %v3517_v7, %v2797_v31  ;;  %v2338_v49 = vmul.f32 %v7311_v3, %v7370_v0  ;;  %v7375_v1 = vld [vmem:[#allocation50_spill] sm:$0xff] }
 0x22d   : > { %v2278_v16 = vadd.f32 %v2268_v14, %v7372_v61  ;;  %v2318_v53 = vadd.f32 %v2308_v38, %v7373_v21  ;;  %v2368_v17 = vmul.f32 %v7312_v35, %v7370_v0  ;;  %v2550_v12 = vmul.f32 %v7320_v40, %v7374_v29  ;;  %v7380_v40 = vld [vmem:[#allocation23_spill] sm:$0xff] }
 0x22e   : > { %v2876_v15 = vmul.f32 %v2871_v63, %v2866_v33  ;;  %v6684_v24 = vmul.f32 %v2953_v59, %v2948_v28  ;;  %v2861_v32 = vrot.slane %v6674_v52, 6  ;;  %v2915_v7 = vrot.slane %v6674_v52, 3 }
 0x22f   : > { %v2957_v2 = vrot.slane %v6674_v52, %v7367_v18  ;;  %v2348_v31 = vadd.f32 %v2338_v49, %v7375_v1  ;;  %v2378_v9 = vadd.f32 %v2368_v17, %v7376_v20  ;;  %v2560_v14 = vadd.f32 %v2550_v12, %v2277_v39  ;;  %v7377_v17 = vld [vmem:[#allocation91_spill] sm:$0xff] }
 0x230   : > { %v2878_v0 = vadd.f32 %v2876_v15, %v6552_v37  ;;  %v2865_v38 = vadd.f32 %v2861_v32, %v6507_v46  ;;  %v2919_v33 = vadd.f32 %v2915_v7, %v6507_v46  ;;  %v2590_v28 = vmul.f32 %v7321_v36, %v7374_v29  ;;  %v7379_v36 = vld [vmem:[#allocation94_spill] sm:$0xff] }
 0x231   : > { %v2930_v59 = vmul.f32 %v2925_v62, %v6615_v25  ;;  %v2620_v63 = vmul.f32 %v7322_v58, %v7374_v29  ;;  %v2650_v49 = vmul.f32 %v7323_v41, %v7374_v29  ;;  %v2880_v61 = vrot.slane %v6645_v6, 1  ;;  %v7378_v25 = vld [vmem:[#allocation26_spill] sm:$0xff] }
 0x232   : > { %v2875_v39 = vrot.slane %v2865_v38, %v7367_v18  ;;  %v2929_v37 = vrot.slane %v2919_v33, %v7371_v44  ;;  %v2600_v21 = vadd.f32 %v2590_v28, %v2317_v57  ;;  %v2886_v12 = vmul.f32 %v7377_v17, %v2560_v14 }
 0x233   : > { %v2630_v15 = vadd.f32 %v2620_v63, %v2347_v56  ;;  %v2660_v32 = vadd.f32 %v2650_v49, %v2377_v34  ;;  %v2884_v1 = vadd.f32 %v2880_v61, %v7302_v42  ;;  %v2939_v62 = vrot.slane %v2864_v13, %v7378_v25  ;;  %v7381_v13 = vld [vmem:[#allocation30_spill] sm:$0xff] }
 0x234   : > { %v2877_v20 = vmul.f32 %v2875_v39, %v2867_v47  ;;  %v6708_v58 = vmul.f32 %v2957_v2, %v2949_v22  ;;  %v2934_v29 = vmul.f32 %v7379_v36, %v2600_v21  ;;  %v2962_v41 = vadd.f32 %v2914_v27, %v6645_v6  ;;  %v7382_v39 = vld [vmem:[#allocation92_spill] sm:$0xff] }
 0x235   : > { %v2891_v18 = vrot.slane %v2884_v1, %v7380_v40  ;;  %v2964_v44 = vmul.f32 %v6595_v60, %v2630_v15  ;;  %v2978_v57 = vmul.f32 %v2660_v32, %v2660_v32  ;;  %v2983_v56 = vrot.slane %v6645_v6, %v7378_v25 }
 0x236   : > { %v2879_v34 = vadd.f32 %v2877_v20, %v6581_v23  ;;  %v2931_v42 = vmul.f32 %v2929_v37, %v2921_v48  ;;  %v2944_v14 = vmul.f32 %v2939_v62, %v2934_v29  ;;  %v2551_v47 = vmul.f32 %v7325_v5, %v7381_v13  ;;  %v7384_v62 = vld [vmem:[#allocation106_spill] sm:$0xff]  ;;  %v7385_v29 = vld [vmem:[#allocation107_spill] sm:$0xff] }
 0x237   : > { %v2896_v22 = vmul.f32 %v2891_v18, %v2886_v12  ;;  %v2969_v36 = vrot.slane %v2962_v41, %v7380_v40  ;;  %v2591_v27 = vmul.f32 %v7326_v55, %v7381_v13  ;;  %v2621_v60 = vmul.f32 %v7327_v8, %v7381_v13 }
 0x238   : > { %v2988_v2 = vmul.f32 %v2983_v56, %v2978_v57  ;;  %v2561_v33 = vadd.f32 %v2551_v47, %v2278_v16  ;;  %v2651_v6 = vmul.f32 %v7328_v54, %v7381_v13  ;;  %v2881_v23 = vrot.slane %v6674_v52, 1  ;;  %v7388_v57 = vld [vmem:[#allocation108_spill] sm:$0xff]  ;;  %v7389_v56 = vld [vmem:[#allocation86_spill] sm:$0xff]  ;;  %v7390_v13 = vld [vmem:[#allocation89_spill] sm:$0xff] }
 0x239   : > { %v2898_v48 = vadd.f32 %v2896_v22, %v2878_v0  ;;  %v2601_v28 = vadd.f32 %v2591_v27, %v2318_v53  ;;  %v2631_v63 = vadd.f32 %v2621_v60, %v2348_v31  ;;  %v2943_v49 = vrot.slane %v2865_v38, %v7378_v25  ;;  %v7391_v47 = vld [vmem:[#allocation87_spill] sm:$0xff]  ;;  %v7392_v22 = vld [vmem:[#allocation90_spill] sm:$0xff] }
 0x23a   : > { %v2661_v61 = vadd.f32 %v2651_v6, %v2378_v9  ;;  %v2885_v41 = vadd.f32 %v2881_v23, %v6507_v46  ;;  %v2887_v37 = vmul.f32 %v7382_v39, %v2561_v33  ;;  %v2963_v21 = vadd.f32 %v2915_v7, %v6674_v52  ;;  %v7383_v9 = vld [vmem:[#allocation42_spill] sm:$0xff]  ;;  %v7394_v33 = vld [vmem:[#allocation88_spill] sm:$0xff]  ;;  %v7395_v6 = vld [vmem:[#allocation93_spill] sm:$0xff] }
 0x23b   : > { %v2912_v17 = vadd.f32 %v6545_v45, %v2898_v48  ;;  %v2974_v16 = vmul.f32 %v2969_v36, %v2964_v44  ;;  %v2935_v12 = vmul.f32 %v6549_v51, %v2601_v28  ;;  %v2965_v15 = vmul.f32 %v6631_v26, %v2631_v63  ;;  %v7387_v44 = vld [vmem:[#allocation85_spill] sm:$0xff]  ;;  %v7396_v48 = vld [vmem:[#allocation84_spill] sm:$0xff]  ;;  %v7398_v39 = vld [vmem:[#allocation62_spill] sm:$0xff] }
 0x23c   : > { %v2895_v0 = vrot.slane %v2885_v41, %v7380_v40  ;;  %v2973_v53 = vrot.slane %v2963_v21, %v7380_v40  ;;  %v2987_v31 = vrot.slane %v6674_v52, %v7378_v25  ;;  %v2269_v46 = vmul.f32 %v7304_v4, %v7383_v9  ;;  %v7386_v52 = vld [vmem:[#allocation109_spill] sm:$0xff]  ;;  %v7397_v41 = vld [vmem:[#allocation43_spill] sm:$0xff]  ;;  %v7399_v21 = vld [vmem:[#allocation66_spill] sm:$0xff] }
 0x23d   : > { %v2932_v38 = vadd.f32 %v2930_v59, %v2912_v17  ;;  %v2979_v32 = vmul.f32 %v2661_v61, %v2661_v61  ;;  %v2309_v45 = vmul.f32 %v7305_v10, %v7383_v9  ;;  %v2339_v51 = vmul.f32 %v7306_v50, %v7383_v9 }
 0x23e   : > { %v2897_v7 = vmul.f32 %v2895_v0, %v2887_v37  ;;  %v2945_v26 = vmul.f32 %v2943_v49, %v2935_v12  ;;  %v2975_v1 = vmul.f32 %v2973_v53, %v2965_v15  ;;  %v2279_v20 = vadd.f32 %v2269_v46, %v7384_v62 }
 0x23f   : > { %v2946_v40 = vadd.f32 %v2944_v14, %v2932_v38  ;;  %v2319_v18 = vadd.f32 %v2309_v45, %v7385_v29  ;;  %v2349_v25 = vadd.f32 %v2339_v51, %v7386_v52  ;;  %v2369_v4 = vmul.f32 %v7307_v19, %v7383_v9  ;;  %v7393_v14 = vld [vmem:[#allocation110_spill] sm:$0xff]  ;;  %v7402_v38 = vld [vmem:[#allocation44_spill] sm:$0xff] }
 0x240   : > { %v2899_v59 = vadd.f32 %v2897_v7, %v2879_v34  ;;  %v1997_v10 = vadd.f32 %v7388_v57, %v7387_v44  ;;  %v2037_v50 = vadd.f32 %v7390_v13, %v7389_v56  ;;  %v2067_v36 = vadd.f32 %v7392_v22, %v7391_v47 }
 0x241   : > { %v2960_v27 = vadd.f32 %v6684_v24, %v2946_v40  ;;  %v2379_v60 = vadd.f32 %v2369_v4, %v7393_v14  ;;  %v2097_v23 = vadd.f32 %v7395_v6, %v7394_v33  ;;  %v2270_v19 = vmul.f32 %v7309_v11, %v7396_v48 }
 0x242   : > { %v2913_v34 = vadd.f32 %v6606_v30, %v2899_v59  ;;  %v2310_v28 = vmul.f32 %v7310_v43, %v7396_v48  ;;  %v2340_v63 = vmul.f32 %v7311_v3, %v7396_v48  ;;  %v2370_v49 = vmul.f32 %v7312_v35, %v7396_v48  ;;  %v7400_v3 = vld [vmem:[#allocation70_spill] sm:$0xff]  ;;  %v7401_v35 = vld [vmem:[#allocation71_spill] sm:$0xff] }
 0x243   : > { %v2976_v24 = vadd.f32 %v2974_v16, %v2960_v27  ;;  %v2280_v61 = vadd.f32 %v2270_v19, %v1997_v10  ;;  %v2552_v37 = vmul.f32 %v7398_v39, %v7397_v41  ;;  %v2592_v17 = vmul.f32 %v7399_v21, %v7397_v41 }
 0x244   : > { %v2933_v11 = vadd.f32 %v2931_v42, %v2913_v34  ;;  %v2320_v12 = vadd.f32 %v2310_v28, %v2037_v50  ;;  %v2350_v30 = vadd.f32 %v2340_v63, %v2067_v36  ;;  %v2380_v15 = vadd.f32 %v2370_v49, %v2097_v23  ;;  %v7403_v34 = vld [vmem:[#allocation18_spill] sm:$0xff] }
 0x245   : > { %v2990_v0 = vadd.f32 %v2988_v2, %v2976_v24  ;;  %v2562_v43 = vadd.f32 %v2552_v37, %v2279_v20  ;;  %v2602_v53 = vadd.f32 %v2592_v17, %v2319_v18  ;;  %v2622_v9 = vmul.f32 %v7400_v3, %v7397_v41 }
 0x246   : > { %v2947_v46 = vadd.f32 %v2945_v26, %v2933_v11  ;;  %v2652_v16 = vmul.f32 %v7401_v35, %v7397_v41  ;;  %v2553_v45 = vmul.f32 %v7325_v5, %v7402_v38  ;;  %v2593_v51 = vmul.f32 %v7326_v55, %v7402_v38 }
 0x247   : > { %v2992_v42 = vrot.slane %v2990_v0, 4  ;;  %v2632_v7 = vadd.f32 %v2622_v9, %v2349_v25  ;;  %v3004_v62 = vadd.f32 %v2602_v53, %v2562_v43  ;;  %v2623_v2 = vmul.f32 %v7327_v8, %v7402_v38 }
 0x248   : > { %v2961_v20 = vadd.f32 %v6708_v58, %v2947_v46  ;;  %v2662_v40 = vadd.f32 %v2652_v16, %v2379_v60  ;;  %v2563_v29 = vadd.f32 %v2553_v45, %v2280_v61  ;;  %v2603_v26 = vadd.f32 %v2593_v51, %v2320_v12 }
 0x249   : > { %v2993_v18 = vadd.f32 %v2992_v42, %v2990_v0  ;;  %v3006_v52 = vadd.f32 %v3004_v62, %v2632_v7  ;;  %v2633_v4 = vadd.f32 %v2623_v2, %v2350_v30  ;;  %v2653_v5 = vmul.f32 %v7328_v54, %v7402_v38 }
 0x24a   : > { %v2977_v59 = vadd.f32 %v2975_v1, %v2961_v20  ;;  %v2989_v44 = vmul.f32 %v2987_v31, %v2979_v32  ;;  %v3005_v55 = vadd.f32 %v2603_v26, %v2563_v29  ;;  %v3931_v1 = vmov 1966171168  }
 0x24b   : > { %v2994_v57 = vrot.slane %v2993_v18, 2  ;;  %v3008_v25 = vadd.f32 %v3006_v52, %v2662_v40  ;;  %v2663_v10 = vadd.f32 %v2653_v5, %v2380_v15  ;;  %v3020_v31 = vunpack.c.l.s4 %v3931_v1 }
 0x24c   : > { %v2991_v56 = vadd.f32 %v2989_v44, %v2977_v59  ;;  %v3007_v13 = vadd.f32 %v3005_v55, %v2633_v4  ;;  %v3013_v60 = vstv %s3012_s13  ;;  %v7404_v24 = vlaneseq }
 0x24d   : > { %v2995_v8 = vadd.f32 %v2994_v57, %v2993_v18  ;;  %v3021_v6 = vunpack.c.0.s8 %v3020_v31 }
 0x24e   : > { %v2998_v58 = vrot.slane %v2991_v56, 4  ;;  %v3009_v50 = vadd.f32 %v3007_v13, %v2663_v10  ;;  %vm3036_vm14 = vcmp.lt.s32.totalorder %v7404_v24, 256 }
 0x24f   : > { %v2996_v47 = vrot.slane %v2995_v8, 1  ;;  %v3024_v28 = vsub.s32 %v3021_v6, %v7403_v34 }
 0x250   : > { %v2999_v22 = vadd.f32 %v2998_v58, %v2991_v56 }
 0x251   : > { %v2997_v36 = vadd.f32 %v2996_v47, %v2995_v8 }
 0x252   : > { %v3000_v27 = vrot.slane %v2999_v22, 2 }
 0x253   : > { %v3010_v14 = vadd.f32 %v3008_v25, %v2997_v36 }
 0x254   : > { %v3001_v54 = vadd.f32 %v3000_v27, %v2999_v22 }
 0x255   : > { %v3014_v48 = vadd.f32 %v3013_v60, %v3010_v14 }
 0x256   : > { %v3002_v32 = vrot.slane %v3001_v54, 1 }
 0x258   : > { %v3003_v33 = vadd.f32 %v3002_v32, %v3001_v54 }
 0x25a   : > { %v3011_v23 = vadd.f32 %v3009_v50, %v3003_v33 }
 0x25c   : > { %v3015_v19 = vadd.f32 %v3013_v60, %v3011_v23 }
 0x25e   : > { %v3018_v63 = vcombine.low %v3014_v48, %v3015_v19 }
 0x260   : > { %v3025_v49 = vrot.slane %v3018_v63, %v3024_v28 }
 0x262   : > { %v3032_v61 = vrot.slane %v3025_v49, %v3024_v28 }
 0x264   : > { %3038 = vst.msk [vmem:[%s329_s17] sm:$0x3] %vm3036_vm14, %v3032_v61 }
 0x265   : > { %3859 = shalt.err (!%p3856_p3)
}
 0x266   : > { %s3860_s14 = scalar_lea.hbm %s6792_s27, 32  ;;  %s3864_s11 = scalar_lea.hbm %s6841_s5, 64 }
 0x267   : > { %p3861_p1 = scmp.ne.s32.totalorder %s6792_s27, %s3860_s14  ;;  %p3865_p11 = scmp.lt.u32.totalorder %s6792_s27, %s6841_s5 }
 0x268   : > { %p3866_p9 = scmp.lt.u32.totalorder %s3864_s11, %s3860_s14  ;;  %p3868_p0 = scmp.lt.u32.totalorder %s3860_s14, %s6792_s27 }
 0x269   : > { %p3862_p7 = pnand %p3861_p1, %p7405_p2 }
 0x26a   : > { %p3867_p6 = por %p3866_p9, %p3865_p11 }
 0x26b   : > { %p3863_p5 = pneg %p3862_p7 }
 0x26c   : > { %p3869_p12 = por %p3868_p0, %p3867_p6 }
 0x26e   : > { %p3870_p10 = pnand %p3869_p12, %p3863_p5 }
 0x270   : > { %3873 = shalt.err (!%p3870_p10)
}
 0x271   : > { %3665 = dma.vmem_to_hbm [thread:$0]  (%p7405_p2), %s6794_s6, 32, %s6792_s27, %s3040_s29  }
 0x272 PF: > { %s3066_s19 = sand.u32 1, %s3908_s20   ;;  %p7406_p13 = scmp.ne.s32.totalorder %s6984_s10, 0 }
 0x273   : > { %p7407_p4 = scmp.ge.s32.totalorder %s3920_s23, 2  ;;  %s3067_s4 = scalar_lea.sflag [#allocation5], %s3066_s19 }
 0x275   : > { %p3682_p8 = pnand %p7407_p4, %p7406_p13 }
 0x277   : > { %3903 = dma.done.wait (!%p3682_p8), %s3067_s4, 32  }
 0x278   : > { %3905 = vsyncadd (!%p3682_p8), %s3067_s4, 4294967264  ;;  %s7408_s23 = sld [smem:[#allocation16_spill]]  ;;  %s7409_s13 = sld [smem:[#allocation17_spill]] }
 0x279   : > { %s7410_s20 = smov %s3912_s21  ;;  %s7411_s21 = smov %s3916_s22 }
 0x27e   : > { %p23_p3 = scmp.ge.s32.totalorder %s7408_s23, 4   ;;  %s7412_s22 = smov %s7409_s13 }
 0x280   :  { %25 = sbr.rel (!%p23_p3) target bundleno = 11 (0xb), region = 114 }
 0x287   :  { %3072 = vsyncpa [#allocation4], 1 }
 0x288   :  { %3074 = vsyncpa [#allocation4 + $0x1], 1 }
 0x289   :  { %3075 = vsyncpa [#allocation7], 1 }
 0x28a   :  { %3077 = vsyncpa [#allocation7 + $0x1], 1 }
 0x28b   :  { %3078 = vsyncpa [#allocation10], 1 }
 0x28c   :  { %3080 = vsyncpa [#allocation10 + $0x1], 1 }
 0x28d   :  { %3081 = vsyncpa [#allocation5], 1 }
 0x28e   :  { %3083 = vsyncpa [#allocation5 + $0x1], 1 }

</bundles_post_ra>
